<compile_context>
chip_gen: v6e
topology: v6e:2x2x1
jax: 0.10.0
libtpu: 0.0.40
codegen_flags: <defaults>
</compile_context>

<pallas_src>
import functools

import jax
import jax.numpy as jnp
from jax.experimental import pallas as pl
from jax.experimental.pallas import tpu as pltpu

COMPUTE_DTYPE = jnp.bfloat16   # MXU operand dtype; accumulate / epilogue in f32
EPS = 1e-5
NEG_SLOPE = 0.2
K = 4                          # all convs are 4x4


# --------------------------------------------------------------------------
# static geometry
# --------------------------------------------------------------------------
def _layer_dims(h, w, c0p, nf):
    """Per stride-2 layer: (OH, OW, Cin, Cout)."""
    dims = []
    cin, cout = c0p, nf
    oh, ow = h, w
    for _ in range(4):
        oh, ow = oh // 2, ow // 2
        dims.append((oh, ow, cin, cout))
        cin, cout = cout, cout * 2
    return dims


def _prep_weight_folded(wq, cin_pad=None):
    """(Cout, Cin, 4, 4) -> (4, 4*Cin[_pad], Cout): kh leading, kw folded into
    the contraction (index kw*Cin + ci), matmul-ready in COMPUTE_DTYPE."""
    cout, cin, k, _ = wq.shape
    wt = jnp.transpose(wq, (2, 3, 1, 0))                 # (kh, kw, ci, co)
    if cin_pad is not None and cin_pad > cin:
        wt = jnp.pad(wt, ((0, 0), (0, 0), (0, cin_pad - cin), (0, 0)))
        cin = cin_pad
    return wt.reshape(k, k * cin, cout).astype(COMPUTE_DTYPE)


def _const_spec(arr):
    """Full-array block with constant index map -> resident in VMEM."""
    ndim = arr.ndim

    def imap(i):
        return (0,) * ndim

    return pl.BlockSpec(arr.shape, imap)


# --------------------------------------------------------------------------
# in-kernel helpers
# --------------------------------------------------------------------------
def _leaky(x):
    return jnp.where(x > 0, x, NEG_SLOPE * x)


def _conv_s2(ae_ref, ao_ref, w_ref, b_ref, oh, ow, use_norm):
    """Stride-2 4x4 conv from row-phase folded buffers: 4 MXU matmuls, f32 acc."""
    m = oh * ow
    y = jnp.dot(ae_ref[0:m, :], w_ref[0], preferred_element_type=jnp.float32)
    y = y + jnp.dot(ao_ref[0:m, :], w_ref[1], preferred_element_type=jnp.float32)
    y = y + jnp.dot(ae_ref[ow:ow + m, :], w_ref[2],
                    preferred_element_type=jnp.float32)
    y = y + jnp.dot(ao_ref[ow:ow + m, :], w_ref[3],
                    preferred_element_type=jnp.float32)
    y = y + b_ref[...]
    if use_norm:
        # InstanceNorm2d (no affine, biased variance) over the FULL spatial
        # extent of this sample -- one grid step sees all of it.
        mu = jnp.mean(y, axis=0, keepdims=True)
        var = jnp.mean(jnp.square(y - mu), axis=0, keepdims=True)
        y = (y - mu) * jax.lax.rsqrt(var + EPS)
    return _leaky(y)


def _repack(y, y_ref, ae_nxt, ao_nxt, oh, ow, c):
    """Turn activation y (oh*ow, c) into the NEXT layer's folded phase buffers
    AE'/AO' of shape ((oh/2+1)*(ow/2), 4*c):
      AE'[r, j, kw*c+ci] = Ypad[2r,   2j+kw, ci]
      AO'[r, j, kw*c+ci] = Ypad[2r+1, 2j+kw, ci]   (Ypad = y zero-padded by 1).
    """
    ow2, oh2 = ow // 2, oh // 2
    m2 = oh * ow2

    # One wide store, then two hardware strided loads (even / odd columns).
    y_ref[...] = y.astype(y_ref.dtype)
    e = y_ref[pl.ds(0, m2, 2), :]            # Y[:, even cols]  -> (m2, c)
    o = y_ref[pl.ds(1, m2, 2), :]            # Y[:, odd  cols]

    zrow = jnp.zeros((1, c), y_ref.dtype)
    rid = jax.lax.broadcasted_iota(jnp.int32, (m2, 1), 0)
    o_m1 = jnp.concatenate([zrow, o[:-1, :]], axis=0)            # col shift -1
    o_m1 = jnp.where(rid % ow2 == 0, jnp.zeros_like(o_m1), o_m1)
    e_p1 = jnp.concatenate([e[1:, :], zrow], axis=0)             # col shift +1
    e_p1 = jnp.where(rid % ow2 == ow2 - 1, jnp.zeros_like(e_p1), e_p1)

    # lane layout matches the folded weights: [kw=0 | kw=1 | kw=2 | kw=3]
    pack = jnp.concatenate([o_m1, e, o, e_p1], axis=1)           # (m2, 4c)
    pack = pack.astype(ae_nxt.dtype)

    # zero-pad ring rows (top row of AE', bottom row of AO'); interiors are
    # fully rewritten every grid step, so this is all the zeroing needed.
    zblk = jnp.zeros((ow2, 4 * c), ae_nxt.dtype)
    ae_nxt[0:ow2, :] = zblk
    ao_nxt[oh2 * ow2:(oh2 + 1) * ow2, :] = zblk

    # row-phase split: even Y image rows -> AO', odd Y image rows -> AE'.
    for r in range(oh2):
        ao_nxt[r * ow2:(r + 1) * ow2, :] = \
            pack[(2 * r) * ow2:(2 * r + 1) * ow2, :]
        ae_nxt[(r + 1) * ow2:(r + 2) * ow2, :] = \
            pack[(2 * r + 1) * ow2:(2 * r + 2) * ow2, :]


# --------------------------------------------------------------------------
# the fused kernel (one grid step == one sample)
# --------------------------------------------------------------------------
def _fused_kernel(ae1_ref, ao1_ref,
                  w1_ref, w2_ref, w3_ref, w4_ref, w5_ref,
                  b1_ref, b2_ref, b3_ref, b4_ref,
                  o_ref,
                  y1_ref, ae2_ref, ao2_ref, y2_ref, ae3_ref, ao3_ref,
                  y3_ref, ae4_ref, ao4_ref, p5_ref,
                  *, dims):
    (oh1, ow1, _, c1), (oh2, ow2, _, c2), (oh3, ow3, _, c3), (oh4, ow4, _, c4) \
        = dims

    # layer 1: conv + LeakyReLU (no InstanceNorm)
    a1 = _conv_s2(ae1_ref, ao1_ref, w1_ref, b1_ref, oh1, ow1, use_norm=False)
    _repack(a1, y1_ref, ae2_ref, ao2_ref, oh1, ow1, c1)
    # layers 2..4: conv + InstanceNorm + LeakyReLU
    a2 = _conv_s2(ae2_ref, ao2_ref, w2_ref, b2_ref, oh2, ow2, use_norm=True)
    _repack(a2, y2_ref, ae3_ref, ao3_ref, oh2, ow2, c2)
    a3 = _conv_s2(ae3_ref, ao3_ref, w3_ref, b3_ref, oh3, ow3, use_norm=True)
    _repack(a3, y3_ref, ae4_ref, ao4_ref, oh3, ow3, c3)
    a4 = _conv_s2(ae4_ref, ao4_ref, w4_ref, b4_ref, oh4, ow4, use_norm=True)

    # output layer: ZeroPad2d((1,0,1,0)) + Conv(4x4, s1, p1, Cout=1, bias=False)
    # effective padding: top/left 2, bottom/right 1.
    p5_ref[...] = jnp.zeros(p5_ref.shape, p5_ref.dtype)
    p5_ref[2:2 + oh4, 2:2 + ow4, :] = \
        a4.reshape(oh4, ow4, c4).astype(p5_ref.dtype)
    acc = jnp.zeros((oh4, ow4, c4), jnp.float32)
    for kh in range(K):
        for kw in range(K):
            tap = p5_ref[kh:kh + oh4, kw:kw + ow4, :].astype(jnp.float32)
            acc = acc + tap * w5_ref[kh * K + kw:kh * K + kw + 1, :]   # VPU
    # lane reduce over channels, ONE lane-dense store of the whole patch map.
    o_ref[...] = jnp.sum(acc, axis=-1)


# --------------------------------------------------------------------------
# host-side wrapper (boundary-only layout change)
# --------------------------------------------------------------------------
def cgan_patchgan_discriminator(params, x, y):
    n, c_in, h, w = x.shape
    assert h % 16 == 0 and w % 16 == 0, "spatial dims must be divisible by 16"
    c0 = c_in + y.shape[1]
    c0p = ((c0 + 7) // 8) * 8
    nf = params["w1"].shape[0]
    dims = _layer_dims(h, w, c0p, nf)
    (oh1, ow1, _, c1), (oh2, ow2, _, c2), (oh3, ow3, _, c3), (oh4, ow4, _, c4) \
        = dims

    # torch.cat([x, y], dim=1); build layer-1 folded phase buffers on the host:
    #   AE1[r, j, kw*c0p+ci] = Xpad[2r,   2j+kw, ci]
    #   AO1[r, j, kw*c0p+ci] = Xpad[2r+1, 2j+kw, ci]
    inp = jnp.concatenate([x, y], axis=1)
    t = jnp.transpose(inp, (0, 2, 3, 1))                           # NHWC
    xp = jnp.pad(t, ((0, 0), (1, 1), (1, 1), (0, c0p - c0)))       # spat+chan
    cols = [xp[:, :, kw:kw + w - 1:2, :] for kw in range(K)]       # kw taps
    folded = jnp.concatenate(cols, axis=-1).astype(COMPUTE_DTYPE)  # (N,H+2,W/2,4c0p)
    f1 = 4 * c0p
    r1 = (oh1 + 1) * ow1
    ae1 = folded[:, 0::2].reshape(n, r1, f1)
    ao1 = folded[:, 1::2].reshape(n, r1, f1)

    wf1 = _prep_weight_folded(params["w1"], c0p)
    wf2 = _prep_weight_folded(params["w2"])
    wf3 = _prep_weight_folded(params["w3"])
    wf4 = _prep_weight_folded(params["w4"])
    # final conv (Cout=1): (1, C4, 4, 4) -> (16, C4) f32 (VPU path)
    w5 = jnp.transpose(params["w_out"], (2, 3, 1, 0)).reshape(
        K * K, c4).astype(jnp.float32)
    b1 = params["b1"].reshape(1, -1).astype(jnp.float32)
    b2 = params["b2"].reshape(1, -1).astype(jnp.float32)
    b3 = params["b3"].reshape(1, -1).astype(jnp.float32)
    b4 = params["b4"].reshape(1, -1).astype(jnp.float32)

    cdt = COMPUTE_DTYPE
    kernel = functools.partial(_fused_kernel, dims=tuple(dims))

    flops = 2 * n * sum(oh * ow * 16 * cin * cout
                        for (oh, ow, cin, cout) in dims)
    flops += 2 * n * oh4 * ow4 * 16 * c4
    w_bytes = sum(wf.size * 2 for wf in (wf1, wf2, wf3, wf4)) + w5.size * 4
    cost = pl.CostEstimate(
        flops=int(flops),
        transcendentals=int(n * (c2 + c3 + c4)),
        bytes_accessed=int(2 * n * r1 * f1 * 2 + w_bytes
                           + n * oh4 * ow4 * 4))

    out = pl.pallas_call(
        kernel,
        out_shape=jax.ShapeDtypeStruct((n, oh4, ow4), jnp.float32),
        grid_spec=pltpu.PrefetchScalarGridSpec(
            num_scalar_prefetch=0,
            grid=(n,),
            in_specs=[
                pl.BlockSpec((None, r1, f1), lambda i: (i, 0, 0)),
                pl.BlockSpec((None, r1, f1), lambda i: (i, 0, 0)),
                _const_spec(wf1), _const_spec(wf2), _const_spec(wf3),
                _const_spec(wf4), _const_spec(w5),
                _const_spec(b1), _const_spec(b2), _const_spec(b3),
                _const_spec(b4),
            ],
            out_specs=pl.BlockSpec((None, oh4, ow4), lambda i: (i, 0, 0)),
            scratch_shapes=[
                pltpu.VMEM((oh1 * ow1, c1), jnp.float32),            # y1
                pltpu.VMEM(((oh2 + 1) * ow2, 4 * c1), cdt),          # ae2
                pltpu.VMEM(((oh2 + 1) * ow2, 4 * c1), cdt),          # ao2
                pltpu.VMEM((oh2 * ow2, c2), jnp.float32),            # y2
                pltpu.VMEM(((oh3 + 1) * ow3, 4 * c2), cdt),          # ae3
                pltpu.VMEM(((oh3 + 1) * ow3, 4 * c2), cdt),          # ao3
                pltpu.VMEM((oh3 * ow3, c3), jnp.float32),            # y3
                pltpu.VMEM(((oh4 + 1) * ow4, 4 * c3), cdt),          # ae4
                pltpu.VMEM(((oh4 + 1) * ow4, 4 * c3), cdt),          # ao4
                pltpu.VMEM((oh4 + 3, ow4 + 3, c4), cdt),             # p5
            ]),
        compiler_params=pltpu.CompilerParams(
            dimension_semantics=("parallel",),
            vmem_limit_bytes=32 * 1024 * 1024),
        cost_estimate=cost,
    )(ae1, ao1, wf1, wf2, wf3, wf4, w5, b1, b2, b3, b4)
    # (N, OH5, OW5) -> flat, same order as PyTorch output.view(-1)
    return out.reshape(-1)


# --------------------------------------------------------------------------
# synthetic params (module shapes) + pure-JAX reference
# --------------------------------------------------------------------------
def init_params(key, n_in_channels=3, n_classes=10, n_fmaps=32):
    c0 = n_in_channels + n_classes
    layer_dims = [(n_fmaps, c0), (n_fmaps * 2, n_fmaps),
                  (n_fmaps * 4, n_fmaps * 2), (n_fmaps * 8, n_fmaps * 4)]
    keys = jax.random.split(key, 2 * len(layer_dims) + 1)
    params = {}
    for i, (co, ci) in enumerate(layer_dims):
        scale = 1.0 / jnp.sqrt(ci * 16.0)
        params[f"w{i + 1}"] = scale * jax.random.normal(
            keys[2 * i], (co, ci, 4, 4), jnp.float32)
        params[f"b{i + 1}"] = scale * jax.random.normal(
            keys[2 * i + 1], (co,), jnp.float32)
    scale = 1.0 / jnp.sqrt(n_fmaps * 8 * 16.0)
    params["w_out"] = scale * jax.random.normal(
        keys[-1], (1, n_fmaps * 8, 4, 4), jnp.float32)   # bias=False
    return params


def _ref_forward(params, x, y):
    """Pure-JAX f32 reference (lax.conv) for correctness check."""
    def conv(o, wq, b, stride, pads):
        o = jax.lax.conv_general_dilated(
            o, wq, window_strides=(stride, stride),
            padding=((pads[0], pads[1]), (pads[2], pads[3])),
            dimension_numbers=("NCHW", "OIHW", "NCHW"))
        if b is not None:
            o = o + b[None, :, None, None]
        return o

    def inorm(o, eps=EPS):
        mu = o.mean(axis=(2, 3), keepdims=True)
        var = jnp.square(o - mu).mean(axis=(2, 3), keepdims=True)
        return (o - mu) * jax.lax.rsqrt(var + eps)

    def lrelu(o):
        return jnp.where(o > 0, o, NEG_SLOPE * o)

    out = jnp.concatenate([x, y], axis=1)
    out = lrelu(conv(out, params["w1"], params["b1"], 2, (1, 1, 1, 1)))
    out = lrelu(inorm(conv(out, params["w2"], params["b2"], 2, (1, 1, 1, 1))))
    out = lrelu(inorm(conv(out, params["w3"], params["b3"], 2, (1, 1, 1, 1))))
    out = lrelu(inorm(conv(out, params["w4"], params["b4"], 2, (1, 1, 1, 1))))
    out = conv(out, params["w_out"], None, 1, (2, 1, 2, 1))
    return out.reshape(-1)


if __name__ == "__main__":
    key = jax.random.PRNGKey(0)
    kx, ky, kp = jax.random.split(key, 3)
    N, C_IN, N_CLS, H, W = 2, 3, 10, 32, 32
    x = jax.random.normal(kx, (N, C_IN, H, W), jnp.float32)
    y = jax.random.normal(ky, (N, N_CLS, H, W), jnp.float32)
    params = init_params(kp, n_in_channels=C_IN, n_classes=N_CLS, n_fmaps=32)

    out = jax.jit(cgan_patchgan_discriminator)(params, x, y)
    out = jax.block_until_ready(out)

    # 32 -> 16 -> 8 -> 4 -> 2 spatial; output conv keeps 2x2 -> N*4 values.
    assert out.shape == (N * 2 * 2,), out.shape

    ref = jax.block_until_ready(_ref_forward(params, x, y))
    # bf16 matmul operands (f32 accumulate/epilogue) vs pure-f32 reference.
    err = float(jnp.max(jnp.abs(out - ref)))
    assert err < 2e-1, err

    print("KERNEL_OK")
</pallas_src>

<mosaic_0001>
module attributes {stable_mosaic.version = 11 : i64} {
  func.func @_fused_kernel(%arg0: i32, %arg1: memref<1x272x64xbf16, #tpu.memory_space<vmem>>, %arg2: memref<1x272x64xbf16, #tpu.memory_space<vmem>>, %arg3: memref<4x64x32xbf16, #tpu.memory_space<vmem>>, %arg4: memref<4x128x64xbf16, #tpu.memory_space<vmem>>, %arg5: memref<4x256x128xbf16, #tpu.memory_space<vmem>>, %arg6: memref<4x512x256xbf16, #tpu.memory_space<vmem>>, %arg7: memref<16x256xf32, #tpu.memory_space<vmem>>, %arg8: memref<1x32xf32, #tpu.memory_space<vmem>>, %arg9: memref<1x64xf32, #tpu.memory_space<vmem>>, %arg10: memref<1x128xf32, #tpu.memory_space<vmem>>, %arg11: memref<1x256xf32, #tpu.memory_space<vmem>>, %arg12: memref<1x2x2xf32, #tpu.memory_space<vmem>>, %arg13: memref<256x32xf32, #tpu.memory_space<vmem>>, %arg14: memref<72x128xbf16, #tpu.memory_space<vmem>>, %arg15: memref<72x128xbf16, #tpu.memory_space<vmem>>, %arg16: memref<64x64xf32, #tpu.memory_space<vmem>>, %arg17: memref<20x256xbf16, #tpu.memory_space<vmem>>, %arg18: memref<20x256xbf16, #tpu.memory_space<vmem>>, %arg19: memref<16x128xf32, #tpu.memory_space<vmem>>, %arg20: memref<6x512xbf16, #tpu.memory_space<vmem>>, %arg21: memref<6x512xbf16, #tpu.memory_space<vmem>>, %arg22: memref<5x5x256xbf16, #tpu.memory_space<vmem>>) attributes {dimension_semantics = [#tpu.dimension_semantics<parallel>], iteration_bounds = array<i64: 2>, scalar_prefetch = 0 : i64, scratch_operands = 10 : i64, tpu.core_type = #tpu.core_type<tc>, window_params = [{transform_indices = @transform_0, window_bounds = array<i64: 1, 272, 64>}, {transform_indices = @transform_1, window_bounds = array<i64: 1, 272, 64>}, {pipeline_mode = #tpu.pipeline_mode<synchronous>, transform_indices = @transform_2, window_bounds = array<i64: 4, 64, 32>}, {pipeline_mode = #tpu.pipeline_mode<synchronous>, transform_indices = @transform_3, window_bounds = array<i64: 4, 128, 64>}, {pipeline_mode = #tpu.pipeline_mode<synchronous>, transform_indices = @transform_4, window_bounds = array<i64: 4, 256, 128>}, {pipeline_mode = #tpu.pipeline_mode<synchronous>, transform_indices = @transform_5, window_bounds = array<i64: 4, 512, 256>}, {pipeline_mode = #tpu.pipeline_mode<synchronous>, transform_indices = @transform_6, window_bounds = array<i64: 16, 256>}, {pipeline_mode = #tpu.pipeline_mode<synchronous>, transform_indices = @transform_7, window_bounds = array<i64: 1, 32>}, {pipeline_mode = #tpu.pipeline_mode<synchronous>, transform_indices = @transform_8, window_bounds = array<i64: 1, 64>}, {pipeline_mode = #tpu.pipeline_mode<synchronous>, transform_indices = @transform_9, window_bounds = array<i64: 1, 128>}, {pipeline_mode = #tpu.pipeline_mode<synchronous>, transform_indices = @transform_10, window_bounds = array<i64: 1, 256>}, {transform_indices = @transform_11, window_bounds = array<i64: 1, 2, 2>}]} {
    %c0 = arith.constant 0 : index
    %c0_0 = arith.constant 0 : index
    %c0_1 = arith.constant 0 : index
    %0 = vector.load %arg1[%c0, %c0_0, %c0_1] : memref<1x272x64xbf16, #tpu.memory_space<vmem>>, vector<1x256x64xbf16>
    %1 = vector.shape_cast %0 : vector<1x256x64xbf16> to vector<256x64xbf16>
    %c0_2 = arith.constant 0 : index
    %c0_3 = arith.constant 0 : index
    %c0_4 = arith.constant 0 : index
    %2 = vector.load %arg3[%c0_2, %c0_3, %c0_4] : memref<4x64x32xbf16, #tpu.memory_space<vmem>>, vector<1x64x32xbf16>
    %3 = vector.shape_cast %2 : vector<1x64x32xbf16> to vector<64x32xbf16>
    %cst = arith.constant dense<0.000000e+00> : vector<256x32xf32>
    %4 = tpu.matmul %1, %3, %cst {dimension_numbers = #tpu.dot_dimension_numbers<[1], [0], [0], [1], [0, 0, 1, 1], [], []>} : vector<256x64xbf16>, vector<64x32xbf16>, vector<256x32xf32> -> vector<256x32xf32>
    %c0_5 = arith.constant 0 : index
    %c0_6 = arith.constant 0 : index
    %c0_7 = arith.constant 0 : index
    %5 = vector.load %arg2[%c0_5, %c0_6, %c0_7] : memref<1x272x64xbf16, #tpu.memory_space<vmem>>, vector<1x256x64xbf16>
    %6 = vector.shape_cast %5 : vector<1x256x64xbf16> to vector<256x64xbf16>
    %c1 = arith.constant 1 : index
    %c0_8 = arith.constant 0 : index
    %c0_9 = arith.constant 0 : index
    %7 = vector.load %arg3[%c1, %c0_8, %c0_9] : memref<4x64x32xbf16, #tpu.memory_space<vmem>>, vector<1x64x32xbf16>
    %8 = vector.shape_cast %7 : vector<1x64x32xbf16> to vector<64x32xbf16>
    %cst_10 = arith.constant dense<0.000000e+00> : vector<256x32xf32>
    %9 = tpu.matmul %6, %8, %cst_10 {dimension_numbers = #tpu.dot_dimension_numbers<[1], [0], [0], [1], [0, 0, 1, 1], [], []>} : vector<256x64xbf16>, vector<64x32xbf16>, vector<256x32xf32> -> vector<256x32xf32>
    %10 = arith.addf %4, %9 : vector<256x32xf32>
    %c0_11 = arith.constant 0 : index
    %c16 = arith.constant 16 : index
    %c0_12 = arith.constant 0 : index
    %11 = vector.load %arg1[%c0_11, %c16, %c0_12] : memref<1x272x64xbf16, #tpu.memory_space<vmem>>, vector<1x256x64xbf16>
    %12 = vector.shape_cast %11 : vector<1x256x64xbf16> to vector<256x64xbf16>
    %c2 = arith.constant 2 : index
    %c0_13 = arith.constant 0 : index
    %c0_14 = arith.constant 0 : index
    %13 = vector.load %arg3[%c2, %c0_13, %c0_14] : memref<4x64x32xbf16, #tpu.memory_space<vmem>>, vector<1x64x32xbf16>
    %14 = vector.shape_cast %13 : vector<1x64x32xbf16> to vector<64x32xbf16>
    %cst_15 = arith.constant dense<0.000000e+00> : vector<256x32xf32>
    %15 = tpu.matmul %12, %14, %cst_15 {dimension_numbers = #tpu.dot_dimension_numbers<[1], [0], [0], [1], [0, 0, 1, 1], [], []>} : vector<256x64xbf16>, vector<64x32xbf16>, vector<256x32xf32> -> vector<256x32xf32>
    %16 = arith.addf %10, %15 : vector<256x32xf32>
    %c0_16 = arith.constant 0 : index
    %c16_17 = arith.constant 16 : index
    %c0_18 = arith.constant 0 : index
    %17 = vector.load %arg2[%c0_16, %c16_17, %c0_18] : memref<1x272x64xbf16, #tpu.memory_space<vmem>>, vector<1x256x64xbf16>
    %18 = vector.shape_cast %17 : vector<1x256x64xbf16> to vector<256x64xbf16>
    %c3 = arith.constant 3 : index
    %c0_19 = arith.constant 0 : index
    %c0_20 = arith.constant 0 : index
    %19 = vector.load %arg3[%c3, %c0_19, %c0_20] : memref<4x64x32xbf16, #tpu.memory_space<vmem>>, vector<1x64x32xbf16>
    %20 = vector.shape_cast %19 : vector<1x64x32xbf16> to vector<64x32xbf16>
    %cst_21 = arith.constant dense<0.000000e+00> : vector<256x32xf32>
    %21 = tpu.matmul %18, %20, %cst_21 {dimension_numbers = #tpu.dot_dimension_numbers<[1], [0], [0], [1], [0, 0, 1, 1], [], []>} : vector<256x64xbf16>, vector<64x32xbf16>, vector<256x32xf32> -> vector<256x32xf32>
    %22 = arith.addf %16, %21 : vector<256x32xf32>
    %c0_22 = arith.constant 0 : index
    %c0_23 = arith.constant 0 : index
    %23 = vector.load %arg8[%c0_22, %c0_23] : memref<1x32xf32, #tpu.memory_space<vmem>>, vector<1x32xf32>
    %24 = vector.broadcast %23 : vector<1x32xf32> to vector<256x32xf32>
    %25 = arith.addf %22, %24 : vector<256x32xf32>
    %cst_24 = arith.constant 0.000000e+00 : f32
    %26 = vector.broadcast %cst_24 : f32 to vector<256x32xf32>
    %27 = arith.cmpf ogt, %25, %26 : vector<256x32xf32>
    %cst_25 = arith.constant 2.000000e-01 : f32
    %28 = vector.broadcast %cst_25 : f32 to vector<256x32xf32>
    %29 = arith.mulf %28, %25 : vector<256x32xf32>
    %30 = arith.select %27, %25, %29 : vector<256x32xi1>, vector<256x32xf32>
    %c0_26 = arith.constant 0 : index
    %c0_27 = arith.constant 0 : index
    %31 = vector.load %arg13[%c0_26, %c0_27] : memref<256x32xf32, #tpu.memory_space<vmem>>, vector<256x32xf32>
    tpu.vector_store %arg13[%c0_26, %c0_27], %30 {strides = array<i32>} : memref<256x32xf32, #tpu.memory_space<vmem>>, vector<256x32xf32>,
    %c0_28 = arith.constant 0 : index
    %c0_29 = arith.constant 0 : index
    %32 = tpu.strided_load %arg13[%c0_28, %c0_29] {strides = array<i32: 2, 1>} : memref<256x32xf32, #tpu.memory_space<vmem>>, vector<128x32xf32>
    %c1_30 = arith.constant 1 : index
    %c0_31 = arith.constant 0 : index
    %33 = tpu.strided_load %arg13[%c1_30, %c0_31] {strides = array<i32: 2, 1>} : memref<256x32xf32, #tpu.memory_space<vmem>>, vector<128x32xf32>
    %cst_32 = arith.constant 0.000000e+00 : f32
    %34 = vector.broadcast %cst_32 : f32 to vector<1x32xf32>
    %35 = tpu.iota {dimensions = array<i32: 0>} : vector<128x1xi32>
    %36 = vector.extract_strided_slice %33 {offsets = [0, 0], sizes = [127, 32], strides = [1, 1]} : vector<128x32xf32> to vector<127x32xf32>
    %37 = tpu.concatenate %34, %36 in 0 : vector<1x32xf32>, vector<127x32xf32> -> vector<128x32xf32>
    %c8_i32 = arith.constant 8 : i32
    %c0_i32 = arith.constant 0 : i32
    %38 = arith.cmpi eq, %c8_i32, %c0_i32 : i32
    %c1_i32 = arith.constant 1 : i32
    %39 = arith.select %38, %c1_i32, %c8_i32 : i32
    %40 = vector.broadcast %39 : i32 to vector<128x1xi32>
    %41 = arith.remsi %35, %40 : vector<128x1xi32>
    %c0_i32_33 = arith.constant 0 : i32
    %42 = vector.broadcast %c0_i32_33 : i32 to vector<128x1xi32>
    %43 = arith.cmpi ne, %41, %42 : vector<128x1xi32>
    %c0_i32_34 = arith.constant 0 : i32
    %44 = vector.broadcast %c0_i32_34 : i32 to vector<128x1xi32>
    %45 = arith.cmpi slt, %41, %44 : vector<128x1xi32>
    %c0_i32_35 = arith.constant 0 : i32
    %46 = arith.cmpi slt, %39, %c0_i32_35 : i32
    %47 = vector.broadcast %46 : i1 to vector<128x1xi1>
    %48 = vector.broadcast %47 : vector<128x1xi1> to vector<128x1xi1>
    %49 = arith.xori %45, %48 : vector<128x1xi1>
    %50 = arith.andi %49, %43 : vector<128x1xi1>
    %51 = vector.broadcast %39 : i32 to vector<128x1xi32>
    %52 = arith.addi %41, %51 : vector<128x1xi32>
    %53 = arith.select %50, %52, %41 : vector<128x1xi1>, vector<128x1xi32>
    %c0_i32_36 = arith.constant 0 : i32
    %54 = vector.broadcast %c0_i32_36 : i32 to vector<128x1xi32>
    %55 = arith.cmpi eq, %53, %54 : vector<128x1xi32>
    %cst_37 = arith.constant 0.000000e+00 : f32
    %56 = vector.broadcast %cst_37 : f32 to vector<128x32xf32>
    %57 = vector.shape_cast %55 : vector<128x1xi1> to vector<128x1xi1>
    %58 = vector.broadcast %57 : vector<128x1xi1> to vector<128x32xi1>
    %59 = arith.select %58, %56, %37 : vector<128x32xi1>, vector<128x32xf32>
    %60 = vector.extract_strided_slice %32 {offsets = [1, 0], sizes = [127, 32], strides = [1, 1]} : vector<128x32xf32> to vector<127x32xf32>
    %61 = tpu.concatenate %60, %34 in 0 : vector<127x32xf32>, vector<1x32xf32> -> vector<128x32xf32>
    %c8_i32_38 = arith.constant 8 : i32
    %c0_i32_39 = arith.constant 0 : i32
    %62 = arith.cmpi eq, %c8_i32_38, %c0_i32_39 : i32
    %c1_i32_40 = arith.constant 1 : i32
    %63 = arith.select %62, %c1_i32_40, %c8_i32_38 : i32
    %64 = vector.broadcast %63 : i32 to vector<128x1xi32>
    %65 = arith.remsi %35, %64 : vector<128x1xi32>
    %c0_i32_41 = arith.constant 0 : i32
    %66 = vector.broadcast %c0_i32_41 : i32 to vector<128x1xi32>
    %67 = arith.cmpi ne, %65, %66 : vector<128x1xi32>
    %c0_i32_42 = arith.constant 0 : i32
    %68 = vector.broadcast %c0_i32_42 : i32 to vector<128x1xi32>
    %69 = arith.cmpi slt, %65, %68 : vector<128x1xi32>
    %c0_i32_43 = arith.constant 0 : i32
    %70 = arith.cmpi slt, %63, %c0_i32_43 : i32
    %71 = vector.broadcast %70 : i1 to vector<128x1xi1>
    %72 = vector.broadcast %71 : vector<128x1xi1> to vector<128x1xi1>
    %73 = arith.xori %69, %72 : vector<128x1xi1>
    %74 = arith.andi %73, %67 : vector<128x1xi1>
    %75 = vector.broadcast %63 : i32 to vector<128x1xi32>
    %76 = arith.addi %65, %75 : vector<128x1xi32>
    %77 = arith.select %74, %76, %65 : vector<128x1xi1>, vector<128x1xi32>
    %c7_i32 = arith.constant 7 : i32
    %78 = vector.broadcast %c7_i32 : i32 to vector<128x1xi32>
    %79 = arith.cmpi eq, %77, %78 : vector<128x1xi32>
    %cst_44 = arith.constant 0.000000e+00 : f32
    %80 = vector.broadcast %cst_44 : f32 to vector<128x32xf32>
    %81 = vector.shape_cast %79 : vector<128x1xi1> to vector<128x1xi1>
    %82 = vector.broadcast %81 : vector<128x1xi1> to vector<128x32xi1>
    %83 = arith.select %82, %80, %61 : vector<128x32xi1>, vector<128x32xf32>
    %84 = tpu.concatenate %59, %32, %33, %83 in 1 : vector<128x32xf32>, vector<128x32xf32>, vector<128x32xf32>, vector<128x32xf32> -> vector<128x128xf32>
    %85 = arith.truncf %84 : vector<128x128xf32> to vector<128x128xbf16>
    %cst_45 = arith.constant 0.000000e+00 : bf16
    %86 = vector.broadcast %cst_45 : bf16 to vector<8x128xbf16>
    %c0_46 = arith.constant 0 : index
    %c0_47 = arith.constant 0 : index
    %87 = vector.load %arg14[%c0_46, %c0_47] : memref<72x128xbf16, #tpu.memory_space<vmem>>, vector<8x128xbf16>
    tpu.vector_store %arg14[%c0_46, %c0_47], %86 {strides = array<i32>} : memref<72x128xbf16, #tpu.memory_space<vmem>>, vector<8x128xbf16>,
    %c64 = arith.constant 64 : index
    %c0_48 = arith.constant 0 : index
    %88 = vector.load %arg15[%c64, %c0_48] : memref<72x128xbf16, #tpu.memory_space<vmem>>, vector<8x128xbf16>
    tpu.vector_store %arg15[%c64, %c0_48], %86 {strides = array<i32>} : memref<72x128xbf16, #tpu.memory_space<vmem>>, vector<8x128xbf16>,
    %89 = vector.extract_strided_slice %85 {offsets = [0, 0], sizes = [8, 128], strides = [1, 1]} : vector<128x128xbf16> to vector<8x128xbf16>
    %c0_49 = arith.constant 0 : index
    %c0_50 = arith.constant 0 : index
    %90 = vector.load %arg15[%c0_49, %c0_50] : memref<72x128xbf16, #tpu.memory_space<vmem>>, vector<8x128xbf16>
    tpu.vector_store %arg15[%c0_49, %c0_50], %89 {strides = array<i32>} : memref<72x128xbf16, #tpu.memory_space<vmem>>, vector<8x128xbf16>,
    %91 = vector.extract_strided_slice %85 {offsets = [8, 0], sizes = [8, 128], strides = [1, 1]} : vector<128x128xbf16> to vector<8x128xbf16>
    %c8 = arith.constant 8 : index
    %c0_51 = arith.constant 0 : index
    %92 = vector.load %arg14[%c8, %c0_51] : memref<72x128xbf16, #tpu.memory_space<vmem>>, vector<8x128xbf16>
    tpu.vector_store %arg14[%c8, %c0_51], %91 {strides = array<i32>} : memref<72x128xbf16, #tpu.memory_space<vmem>>, vector<8x128xbf16>,
    %93 = vector.extract_strided_slice %85 {offsets = [16, 0], sizes = [8, 128], strides = [1, 1]} : vector<128x128xbf16> to vector<8x128xbf16>
    %c8_52 = arith.constant 8 : index
    %c0_53 = arith.constant 0 : index
    %94 = vector.load %arg15[%c8_52, %c0_53] : memref<72x128xbf16, #tpu.memory_space<vmem>>, vector<8x128xbf16>
    tpu.vector_store %arg15[%c8_52, %c0_53], %93 {strides = array<i32>} : memref<72x128xbf16, #tpu.memory_space<vmem>>, vector<8x128xbf16>,
    %95 = vector.extract_strided_slice %85 {offsets = [24, 0], sizes = [8, 128], strides = [1, 1]} : vector<128x128xbf16> to vector<8x128xbf16>
    %c16_54 = arith.constant 16 : index
    %c0_55 = arith.constant 0 : index
    %96 = vector.load %arg14[%c16_54, %c0_55] : memref<72x128xbf16, #tpu.memory_space<vmem>>, vector<8x128xbf16>
    tpu.vector_store %arg14[%c16_54, %c0_55], %95 {strides = array<i32>} : memref<72x128xbf16, #tpu.memory_space<vmem>>, vector<8x128xbf16>,
    %97 = vector.extract_strided_slice %85 {offsets = [32, 0], sizes = [8, 128], strides = [1, 1]} : vector<128x128xbf16> to vector<8x128xbf16>
    %c16_56 = arith.constant 16 : index
    %c0_57 = arith.constant 0 : index
    %98 = vector.load %arg15[%c16_56, %c0_57] : memref<72x128xbf16, #tpu.memory_space<vmem>>, vector<8x128xbf16>
    tpu.vector_store %arg15[%c16_56, %c0_57], %97 {strides = array<i32>} : memref<72x128xbf16, #tpu.memory_space<vmem>>, vector<8x128xbf16>,
    %99 = vector.extract_strided_slice %85 {offsets = [40, 0], sizes = [8, 128], strides = [1, 1]} : vector<128x128xbf16> to vector<8x128xbf16>
    %c24 = arith.constant 24 : index
    %c0_58 = arith.constant 0 : index
    %100 = vector.load %arg14[%c24, %c0_58] : memref<72x128xbf16, #tpu.memory_space<vmem>>, vector<8x128xbf16>
    tpu.vector_store %arg14[%c24, %c0_58], %99 {strides = array<i32>} : memref<72x128xbf16, #tpu.memory_space<vmem>>, vector<8x128xbf16>,
    %101 = vector.extract_strided_slice %85 {offsets = [48, 0], sizes = [8, 128], strides = [1, 1]} : vector<128x128xbf16> to vector<8x128xbf16>
    %c24_59 = arith.constant 24 : index
    %c0_60 = arith.constant 0 : index
    %102 = vector.load %arg15[%c24_59, %c0_60] : memref<72x128xbf16, #tpu.memory_space<vmem>>, vector<8x128xbf16>
    tpu.vector_store %arg15[%c24_59, %c0_60], %101 {strides = array<i32>} : memref<72x128xbf16, #tpu.memory_space<vmem>>, vector<8x128xbf16>,
    %103 = vector.extract_strided_slice %85 {offsets = [56, 0], sizes = [8, 128], strides = [1, 1]} : vector<128x128xbf16> to vector<8x128xbf16>
    %c32 = arith.constant 32 : index
    %c0_61 = arith.constant 0 : index
    %104 = vector.load %arg14[%c32, %c0_61] : memref<72x128xbf16, #tpu.memory_space<vmem>>, vector<8x128xbf16>
    tpu.vector_store %arg14[%c32, %c0_61], %103 {strides = array<i32>} : memref<72x128xbf16, #tpu.memory_space<vmem>>, vector<8x128xbf16>,
    %105 = vector.extract_strided_slice %85 {offsets = [64, 0], sizes = [8, 128], strides = [1, 1]} : vector<128x128xbf16> to vector<8x128xbf16>
    %c32_62 = arith.constant 32 : index
    %c0_63 = arith.constant 0 : index
    %106 = vector.load %arg15[%c32_62, %c0_63] : memref<72x128xbf16, #tpu.memory_space<vmem>>, vector<8x128xbf16>
    tpu.vector_store %arg15[%c32_62, %c0_63], %105 {strides = array<i32>} : memref<72x128xbf16, #tpu.memory_space<vmem>>, vector<8x128xbf16>,
    %107 = vector.extract_strided_slice %85 {offsets = [72, 0], sizes = [8, 128], strides = [1, 1]} : vector<128x128xbf16> to vector<8x128xbf16>
    %c40 = arith.constant 40 : index
    %c0_64 = arith.constant 0 : index
    %108 = vector.load %arg14[%c40, %c0_64] : memref<72x128xbf16, #tpu.memory_space<vmem>>, vector<8x128xbf16>
    tpu.vector_store %arg14[%c40, %c0_64], %107 {strides = array<i32>} : memref<72x128xbf16, #tpu.memory_space<vmem>>, vector<8x128xbf16>,
    %109 = vector.extract_strided_slice %85 {offsets = [80, 0], sizes = [8, 128], strides = [1, 1]} : vector<128x128xbf16> to vector<8x128xbf16>
    %c40_65 = arith.constant 40 : index
    %c0_66 = arith.constant 0 : index
    %110 = vector.load %arg15[%c40_65, %c0_66] : memref<72x128xbf16, #tpu.memory_space<vmem>>, vector<8x128xbf16>
    tpu.vector_store %arg15[%c40_65, %c0_66], %109 {strides = array<i32>} : memref<72x128xbf16, #tpu.memory_space<vmem>>, vector<8x128xbf16>,
    %111 = vector.extract_strided_slice %85 {offsets = [88, 0], sizes = [8, 128], strides = [1, 1]} : vector<128x128xbf16> to vector<8x128xbf16>
    %c48 = arith.constant 48 : index
    %c0_67 = arith.constant 0 : index
    %112 = vector.load %arg14[%c48, %c0_67] : memref<72x128xbf16, #tpu.memory_space<vmem>>, vector<8x128xbf16>
    tpu.vector_store %arg14[%c48, %c0_67], %111 {strides = array<i32>} : memref<72x128xbf16, #tpu.memory_space<vmem>>, vector<8x128xbf16>,
    %113 = vector.extract_strided_slice %85 {offsets = [96, 0], sizes = [8, 128], strides = [1, 1]} : vector<128x128xbf16> to vector<8x128xbf16>
    %c48_68 = arith.constant 48 : index
    %c0_69 = arith.constant 0 : index
    %114 = vector.load %arg15[%c48_68, %c0_69] : memref<72x128xbf16, #tpu.memory_space<vmem>>, vector<8x128xbf16>
    tpu.vector_store %arg15[%c48_68, %c0_69], %113 {strides = array<i32>} : memref<72x128xbf16, #tpu.memory_space<vmem>>, vector<8x128xbf16>,
    %115 = vector.extract_strided_slice %85 {offsets = [104, 0], sizes = [8, 128], strides = [1, 1]} : vector<128x128xbf16> to vector<8x128xbf16>
    %c56 = arith.constant 56 : index
    %c0_70 = arith.constant 0 : index
    %116 = vector.load %arg14[%c56, %c0_70] : memref<72x128xbf16, #tpu.memory_space<vmem>>, vector<8x128xbf16>
    tpu.vector_store %arg14[%c56, %c0_70], %115 {strides = array<i32>} : memref<72x128xbf16, #tpu.memory_space<vmem>>, vector<8x128xbf16>,
    %117 = vector.extract_strided_slice %85 {offsets = [112, 0], sizes = [8, 128], strides = [1, 1]} : vector<128x128xbf16> to vector<8x128xbf16>
    %c56_71 = arith.constant 56 : index
    %c0_72 = arith.constant 0 : index
    %118 = vector.load %arg15[%c56_71, %c0_72] : memref<72x128xbf16, #tpu.memory_space<vmem>>, vector<8x128xbf16>
    tpu.vector_store %arg15[%c56_71, %c0_72], %117 {strides = array<i32>} : memref<72x128xbf16, #tpu.memory_space<vmem>>, vector<8x128xbf16>,
    %119 = vector.extract_strided_slice %85 {offsets = [120, 0], sizes = [8, 128], strides = [1, 1]} : vector<128x128xbf16> to vector<8x128xbf16>
    %c64_73 = arith.constant 64 : index
    %c0_74 = arith.constant 0 : index
    %120 = vector.load %arg14[%c64_73, %c0_74] : memref<72x128xbf16, #tpu.memory_space<vmem>>, vector<8x128xbf16>
    tpu.vector_store %arg14[%c64_73, %c0_74], %119 {strides = array<i32>} : memref<72x128xbf16, #tpu.memory_space<vmem>>, vector<8x128xbf16>,
    %c0_75 = arith.constant 0 : index
    %c0_76 = arith.constant 0 : index
    %121 = vector.load %arg14[%c0_75, %c0_76] : memref<72x128xbf16, #tpu.memory_space<vmem>>, vector<64x128xbf16>
    %c0_77 = arith.constant 0 : index
    %c0_78 = arith.constant 0 : index
    %c0_79 = arith.constant 0 : index
    %122 = vector.load %arg4[%c0_77, %c0_78, %c0_79] : memref<4x128x64xbf16, #tpu.memory_space<vmem>>, vector<1x128x64xbf16>
    %123 = vector.shape_cast %122 : vector<1x128x64xbf16> to vector<128x64xbf16>
    %cst_80 = arith.constant dense<0.000000e+00> : vector<64x64xf32>
    %124 = tpu.matmul %121, %123, %cst_80 {dimension_numbers = #tpu.dot_dimension_numbers<[1], [0], [0], [1], [0, 0, 1, 1], [], []>} : vector<64x128xbf16>, vector<128x64xbf16>, vector<64x64xf32> -> vector<64x64xf32>
    %c0_81 = arith.constant 0 : index
    %c0_82 = arith.constant 0 : index
    %125 = vector.load %arg15[%c0_81, %c0_82] : memref<72x128xbf16, #tpu.memory_space<vmem>>, vector<64x128xbf16>
    %c1_83 = arith.constant 1 : index
    %c0_84 = arith.constant 0 : index
    %c0_85 = arith.constant 0 : index
    %126 = vector.load %arg4[%c1_83, %c0_84, %c0_85] : memref<4x128x64xbf16, #tpu.memory_space<vmem>>, vector<1x128x64xbf16>
    %127 = vector.shape_cast %126 : vector<1x128x64xbf16> to vector<128x64xbf16>
    %cst_86 = arith.constant dense<0.000000e+00> : vector<64x64xf32>
    %128 = tpu.matmul %125, %127, %cst_86 {dimension_numbers = #tpu.dot_dimension_numbers<[1], [0], [0], [1], [0, 0, 1, 1], [], []>} : vector<64x128xbf16>, vector<128x64xbf16>, vector<64x64xf32> -> vector<64x64xf32>
    %129 = arith.addf %124, %128 : vector<64x64xf32>
    %c8_87 = arith.constant 8 : index
    %c0_88 = arith.constant 0 : index
    %130 = vector.load %arg14[%c8_87, %c0_88] : memref<72x128xbf16, #tpu.memory_space<vmem>>, vector<64x128xbf16>
    %c2_89 = arith.constant 2 : index
    %c0_90 = arith.constant 0 : index
    %c0_91 = arith.constant 0 : index
    %131 = vector.load %arg4[%c2_89, %c0_90, %c0_91] : memref<4x128x64xbf16, #tpu.memory_space<vmem>>, vector<1x128x64xbf16>
    %132 = vector.shape_cast %131 : vector<1x128x64xbf16> to vector<128x64xbf16>
    %cst_92 = arith.constant dense<0.000000e+00> : vector<64x64xf32>
    %133 = tpu.matmul %130, %132, %cst_92 {dimension_numbers = #tpu.dot_dimension_numbers<[1], [0], [0], [1], [0, 0, 1, 1], [], []>} : vector<64x128xbf16>, vector<128x64xbf16>, vector<64x64xf32> -> vector<64x64xf32>
    %134 = arith.addf %129, %133 : vector<64x64xf32>
    %c8_93 = arith.constant 8 : index
    %c0_94 = arith.constant 0 : index
    %135 = vector.load %arg15[%c8_93, %c0_94] : memref<72x128xbf16, #tpu.memory_space<vmem>>, vector<64x128xbf16>
    %c3_95 = arith.constant 3 : index
    %c0_96 = arith.constant 0 : index
    %c0_97 = arith.constant 0 : index
    %136 = vector.load %arg4[%c3_95, %c0_96, %c0_97] : memref<4x128x64xbf16, #tpu.memory_space<vmem>>, vector<1x128x64xbf16>
    %137 = vector.shape_cast %136 : vector<1x128x64xbf16> to vector<128x64xbf16>
    %cst_98 = arith.constant dense<0.000000e+00> : vector<64x64xf32>
    %138 = tpu.matmul %135, %137, %cst_98 {dimension_numbers = #tpu.dot_dimension_numbers<[1], [0], [0], [1], [0, 0, 1, 1], [], []>} : vector<64x128xbf16>, vector<128x64xbf16>, vector<64x64xf32> -> vector<64x64xf32>
    %139 = arith.addf %134, %138 : vector<64x64xf32>
    %c0_99 = arith.constant 0 : index
    %c0_100 = arith.constant 0 : index
    %140 = vector.load %arg9[%c0_99, %c0_100] : memref<1x64xf32, #tpu.memory_space<vmem>>, vector<1x64xf32>
    %141 = vector.broadcast %140 : vector<1x64xf32> to vector<64x64xf32>
    %142 = arith.addf %139, %141 : vector<64x64xf32>
    %cst_101 = arith.constant dense<0.000000e+00> : vector<64xf32>
    %143 = vector.multi_reduction <add>, %142, %cst_101 [0] : vector<64x64xf32> to vector<64xf32>
    %144 = vector.shape_cast %143 : vector<64xf32> to vector<1x64xf32>
    %cst_102 = arith.constant 6.400000e+01 : f32
    %145 = vector.broadcast %cst_102 : f32 to vector<1x64xf32>
    %146 = arith.divf %144, %145 : vector<1x64xf32>
    %147 = vector.broadcast %146 : vector<1x64xf32> to vector<64x64xf32>
    %148 = arith.subf %142, %147 : vector<64x64xf32>
    %149 = arith.mulf %148, %148 : vector<64x64xf32>
    %cst_103 = arith.constant dense<0.000000e+00> : vector<64xf32>
    %150 = vector.multi_reduction <add>, %149, %cst_103 [0] : vector<64x64xf32> to vector<64xf32>
    %151 = vector.shape_cast %150 : vector<64xf32> to vector<1x64xf32>
    %cst_104 = arith.constant 6.400000e+01 : f32
    %152 = vector.broadcast %cst_104 : f32 to vector<1x64xf32>
    %153 = arith.divf %151, %152 : vector<1x64xf32>
    %154 = vector.broadcast %146 : vector<1x64xf32> to vector<64x64xf32>
    %155 = arith.subf %142, %154 : vector<64x64xf32>
    %cst_105 = arith.constant 9.99999974E-6 : f32
    %156 = vector.broadcast %cst_105 : f32 to vector<1x64xf32>
    %157 = arith.addf %153, %156 : vector<1x64xf32>
    %158 = math.rsqrt %157 : vector<1x64xf32>
    %159 = vector.broadcast %158 : vector<1x64xf32> to vector<64x64xf32>
    %160 = arith.mulf %155, %159 : vector<64x64xf32>
    %cst_106 = arith.constant 0.000000e+00 : f32
    %161 = vector.broadcast %cst_106 : f32 to vector<64x64xf32>
    %162 = arith.cmpf ogt, %160, %161 : vector<64x64xf32>
    %cst_107 = arith.constant 2.000000e-01 : f32
    %163 = vector.broadcast %cst_107 : f32 to vector<64x64xf32>
    %164 = arith.mulf %163, %160 : vector<64x64xf32>
    %165 = arith.select %162, %160, %164 : vector<64x64xi1>, vector<64x64xf32>
    %c0_108 = arith.constant 0 : index
    %c0_109 = arith.constant 0 : index
    %166 = vector.load %arg16[%c0_108, %c0_109] : memref<64x64xf32, #tpu.memory_space<vmem>>, vector<64x64xf32>
    tpu.vector_store %arg16[%c0_108, %c0_109], %165 {strides = array<i32>} : memref<64x64xf32, #tpu.memory_space<vmem>>, vector<64x64xf32>,
    %c0_110 = arith.constant 0 : index
    %c0_111 = arith.constant 0 : index
    %167 = tpu.strided_load %arg16[%c0_110, %c0_111] {strides = array<i32: 2, 1>} : memref<64x64xf32, #tpu.memory_space<vmem>>, vector<32x64xf32>
    %c1_112 = arith.constant 1 : index
    %c0_113 = arith.constant 0 : index
    %168 = tpu.strided_load %arg16[%c1_112, %c0_113] {strides = array<i32: 2, 1>} : memref<64x64xf32, #tpu.memory_space<vmem>>, vector<32x64xf32>
    %cst_114 = arith.constant 0.000000e+00 : f32
    %169 = vector.broadcast %cst_114 : f32 to vector<1x64xf32>
    %170 = tpu.iota {dimensions = array<i32: 0>} : vector<32x1xi32>
    %171 = vector.extract_strided_slice %168 {offsets = [0, 0], sizes = [31, 64], strides = [1, 1]} : vector<32x64xf32> to vector<31x64xf32>
    %172 = tpu.concatenate %169, %171 in 0 : vector<1x64xf32>, vector<31x64xf32> -> vector<32x64xf32>
    %c4_i32 = arith.constant 4 : i32
    %c0_i32_115 = arith.constant 0 : i32
    %173 = arith.cmpi eq, %c4_i32, %c0_i32_115 : i32
    %c1_i32_116 = arith.constant 1 : i32
    %174 = arith.select %173, %c1_i32_116, %c4_i32 : i32
    %175 = vector.broadcast %174 : i32 to vector<32x1xi32>
    %176 = arith.remsi %170, %175 : vector<32x1xi32>
    %c0_i32_117 = arith.constant 0 : i32
    %177 = vector.broadcast %c0_i32_117 : i32 to vector<32x1xi32>
    %178 = arith.cmpi ne, %176, %177 : vector<32x1xi32>
    %c0_i32_118 = arith.constant 0 : i32
    %179 = vector.broadcast %c0_i32_118 : i32 to vector<32x1xi32>
    %180 = arith.cmpi slt, %176, %179 : vector<32x1xi32>
    %c0_i32_119 = arith.constant 0 : i32
    %181 = arith.cmpi slt, %174, %c0_i32_119 : i32
    %182 = vector.broadcast %181 : i1 to vector<32x1xi1>
    %183 = vector.broadcast %182 : vector<32x1xi1> to vector<32x1xi1>
    %184 = arith.xori %180, %183 : vector<32x1xi1>
    %185 = arith.andi %184, %178 : vector<32x1xi1>
    %186 = vector.broadcast %174 : i32 to vector<32x1xi32>
    %187 = arith.addi %176, %186 : vector<32x1xi32>
    %188 = arith.select %185, %187, %176 : vector<32x1xi1>, vector<32x1xi32>
    %c0_i32_120 = arith.constant 0 : i32
    %189 = vector.broadcast %c0_i32_120 : i32 to vector<32x1xi32>
    %190 = arith.cmpi eq, %188, %189 : vector<32x1xi32>
    %cst_121 = arith.constant 0.000000e+00 : f32
    %191 = vector.broadcast %cst_121 : f32 to vector<32x64xf32>
    %192 = vector.shape_cast %190 : vector<32x1xi1> to vector<32x1xi1>
    %193 = vector.broadcast %192 : vector<32x1xi1> to vector<32x64xi1>
    %194 = arith.select %193, %191, %172 : vector<32x64xi1>, vector<32x64xf32>
    %195 = vector.extract_strided_slice %167 {offsets = [1, 0], sizes = [31, 64], strides = [1, 1]} : vector<32x64xf32> to vector<31x64xf32>
    %196 = tpu.concatenate %195, %169 in 0 : vector<31x64xf32>, vector<1x64xf32> -> vector<32x64xf32>
    %c4_i32_122 = arith.constant 4 : i32
    %c0_i32_123 = arith.constant 0 : i32
    %197 = arith.cmpi eq, %c4_i32_122, %c0_i32_123 : i32
    %c1_i32_124 = arith.constant 1 : i32
    %198 = arith.select %197, %c1_i32_124, %c4_i32_122 : i32
    %199 = vector.broadcast %198 : i32 to vector<32x1xi32>
    %200 = arith.remsi %170, %199 : vector<32x1xi32>
    %c0_i32_125 = arith.constant 0 : i32
    %201 = vector.broadcast %c0_i32_125 : i32 to vector<32x1xi32>
    %202 = arith.cmpi ne, %200, %201 : vector<32x1xi32>
    %c0_i32_126 = arith.constant 0 : i32
    %203 = vector.broadcast %c0_i32_126 : i32 to vector<32x1xi32>
    %204 = arith.cmpi slt, %200, %203 : vector<32x1xi32>
    %c0_i32_127 = arith.constant 0 : i32
    %205 = arith.cmpi slt, %198, %c0_i32_127 : i32
    %206 = vector.broadcast %205 : i1 to vector<32x1xi1>
    %207 = vector.broadcast %206 : vector<32x1xi1> to vector<32x1xi1>
    %208 = arith.xori %204, %207 : vector<32x1xi1>
    %209 = arith.andi %208, %202 : vector<32x1xi1>
    %210 = vector.broadcast %198 : i32 to vector<32x1xi32>
    %211 = arith.addi %200, %210 : vector<32x1xi32>
    %212 = arith.select %209, %211, %200 : vector<32x1xi1>, vector<32x1xi32>
    %c3_i32 = arith.constant 3 : i32
    %213 = vector.broadcast %c3_i32 : i32 to vector<32x1xi32>
    %214 = arith.cmpi eq, %212, %213 : vector<32x1xi32>
    %cst_128 = arith.constant 0.000000e+00 : f32
    %215 = vector.broadcast %cst_128 : f32 to vector<32x64xf32>
    %216 = vector.shape_cast %214 : vector<32x1xi1> to vector<32x1xi1>
    %217 = vector.broadcast %216 : vector<32x1xi1> to vector<32x64xi1>
    %218 = arith.select %217, %215, %196 : vector<32x64xi1>, vector<32x64xf32>
    %219 = tpu.concatenate %194, %167, %168, %218 in 1 : vector<32x64xf32>, vector<32x64xf32>, vector<32x64xf32>, vector<32x64xf32> -> vector<32x256xf32>
    %220 = arith.truncf %219 : vector<32x256xf32> to vector<32x256xbf16>
    %cst_129 = arith.constant 0.000000e+00 : bf16
    %221 = vector.broadcast %cst_129 : bf16 to vector<4x256xbf16>
    %c0_130 = arith.constant 0 : index
    %c0_131 = arith.constant 0 : index
    %222 = vector.load %arg17[%c0_130, %c0_131] : memref<20x256xbf16, #tpu.memory_space<vmem>>, vector<4x256xbf16>
    tpu.vector_store %arg17[%c0_130, %c0_131], %221 {strides = array<i32>} : memref<20x256xbf16, #tpu.memory_space<vmem>>, vector<4x256xbf16>,
    %c16_132 = arith.constant 16 : index
    %c0_133 = arith.constant 0 : index
    %223 = vector.load %arg18[%c16_132, %c0_133] : memref<20x256xbf16, #tpu.memory_space<vmem>>, vector<4x256xbf16>
    tpu.vector_store %arg18[%c16_132, %c0_133], %221 {strides = array<i32>} : memref<20x256xbf16, #tpu.memory_space<vmem>>, vector<4x256xbf16>,
    %224 = vector.extract_strided_slice %220 {offsets = [0, 0], sizes = [4, 256], strides = [1, 1]} : vector<32x256xbf16> to vector<4x256xbf16>
    %c0_134 = arith.constant 0 : index
    %c0_135 = arith.constant 0 : index
    %225 = vector.load %arg18[%c0_134, %c0_135] : memref<20x256xbf16, #tpu.memory_space<vmem>>, vector<4x256xbf16>
    tpu.vector_store %arg18[%c0_134, %c0_135], %224 {strides = array<i32>} : memref<20x256xbf16, #tpu.memory_space<vmem>>, vector<4x256xbf16>,
    %226 = vector.extract_strided_slice %220 {offsets = [4, 0], sizes = [4, 256], strides = [1, 1]} : vector<32x256xbf16> to vector<4x256xbf16>
    %c4 = arith.constant 4 : index
    %c0_136 = arith.constant 0 : index
    %227 = vector.load %arg17[%c4, %c0_136] : memref<20x256xbf16, #tpu.memory_space<vmem>>, vector<4x256xbf16>
    tpu.vector_store %arg17[%c4, %c0_136], %226 {strides = array<i32>} : memref<20x256xbf16, #tpu.memory_space<vmem>>, vector<4x256xbf16>,
    %228 = vector.extract_strided_slice %220 {offsets = [8, 0], sizes = [4, 256], strides = [1, 1]} : vector<32x256xbf16> to vector<4x256xbf16>
    %c4_137 = arith.constant 4 : index
    %c0_138 = arith.constant 0 : index
    %229 = vector.load %arg18[%c4_137, %c0_138] : memref<20x256xbf16, #tpu.memory_space<vmem>>, vector<4x256xbf16>
    tpu.vector_store %arg18[%c4_137, %c0_138], %228 {strides = array<i32>} : memref<20x256xbf16, #tpu.memory_space<vmem>>, vector<4x256xbf16>,
    %230 = vector.extract_strided_slice %220 {offsets = [12, 0], sizes = [4, 256], strides = [1, 1]} : vector<32x256xbf16> to vector<4x256xbf16>
    %c8_139 = arith.constant 8 : index
    %c0_140 = arith.constant 0 : index
    %231 = vector.load %arg17[%c8_139, %c0_140] : memref<20x256xbf16, #tpu.memory_space<vmem>>, vector<4x256xbf16>
    tpu.vector_store %arg17[%c8_139, %c0_140], %230 {strides = array<i32>} : memref<20x256xbf16, #tpu.memory_space<vmem>>, vector<4x256xbf16>,
    %232 = vector.extract_strided_slice %220 {offsets = [16, 0], sizes = [4, 256], strides = [1, 1]} : vector<32x256xbf16> to vector<4x256xbf16>
    %c8_141 = arith.constant 8 : index
    %c0_142 = arith.constant 0 : index
    %233 = vector.load %arg18[%c8_141, %c0_142] : memref<20x256xbf16, #tpu.memory_space<vmem>>, vector<4x256xbf16>
    tpu.vector_store %arg18[%c8_141, %c0_142], %232 {strides = array<i32>} : memref<20x256xbf16, #tpu.memory_space<vmem>>, vector<4x256xbf16>,
    %234 = vector.extract_strided_slice %220 {offsets = [20, 0], sizes = [4, 256], strides = [1, 1]} : vector<32x256xbf16> to vector<4x256xbf16>
    %c12 = arith.constant 12 : index
    %c0_143 = arith.constant 0 : index
    %235 = vector.load %arg17[%c12, %c0_143] : memref<20x256xbf16, #tpu.memory_space<vmem>>, vector<4x256xbf16>
    tpu.vector_store %arg17[%c12, %c0_143], %234 {strides = array<i32>} : memref<20x256xbf16, #tpu.memory_space<vmem>>, vector<4x256xbf16>,
    %236 = vector.extract_strided_slice %220 {offsets = [24, 0], sizes = [4, 256], strides = [1, 1]} : vector<32x256xbf16> to vector<4x256xbf16>
    %c12_144 = arith.constant 12 : index
    %c0_145 = arith.constant 0 : index
    %237 = vector.load %arg18[%c12_144, %c0_145] : memref<20x256xbf16, #tpu.memory_space<vmem>>, vector<4x256xbf16>
    tpu.vector_store %arg18[%c12_144, %c0_145], %236 {strides = array<i32>} : memref<20x256xbf16, #tpu.memory_space<vmem>>, vector<4x256xbf16>,
    %238 = vector.extract_strided_slice %220 {offsets = [28, 0], sizes = [4, 256], strides = [1, 1]} : vector<32x256xbf16> to vector<4x256xbf16>
    %c16_146 = arith.constant 16 : index
    %c0_147 = arith.constant 0 : index
    %239 = vector.load %arg17[%c16_146, %c0_147] : memref<20x256xbf16, #tpu.memory_space<vmem>>, vector<4x256xbf16>
    tpu.vector_store %arg17[%c16_146, %c0_147], %238 {strides = array<i32>} : memref<20x256xbf16, #tpu.memory_space<vmem>>, vector<4x256xbf16>,
    %c0_148 = arith.constant 0 : index
    %c0_149 = arith.constant 0 : index
    %240 = vector.load %arg17[%c0_148, %c0_149] : memref<20x256xbf16, #tpu.memory_space<vmem>>, vector<16x256xbf16>
    %c0_150 = arith.constant 0 : index
    %c0_151 = arith.constant 0 : index
    %c0_152 = arith.constant 0 : index
    %241 = vector.load %arg5[%c0_150, %c0_151, %c0_152] : memref<4x256x128xbf16, #tpu.memory_space<vmem>>, vector<1x256x128xbf16>
    %242 = vector.shape_cast %241 : vector<1x256x128xbf16> to vector<256x128xbf16>
    %cst_153 = arith.constant dense<0.000000e+00> : vector<16x128xf32>
    %243 = tpu.matmul %240, %242, %cst_153 {dimension_numbers = #tpu.dot_dimension_numbers<[1], [0], [0], [1], [0, 0, 1, 1], [], []>} : vector<16x256xbf16>, vector<256x128xbf16>, vector<16x128xf32> -> vector<16x128xf32>
    %c0_154 = arith.constant 0 : index
    %c0_155 = arith.constant 0 : index
    %244 = vector.load %arg18[%c0_154, %c0_155] : memref<20x256xbf16, #tpu.memory_space<vmem>>, vector<16x256xbf16>
    %c1_156 = arith.constant 1 : index
    %c0_157 = arith.constant 0 : index
    %c0_158 = arith.constant 0 : index
    %245 = vector.load %arg5[%c1_156, %c0_157, %c0_158] : memref<4x256x128xbf16, #tpu.memory_space<vmem>>, vector<1x256x128xbf16>
    %246 = vector.shape_cast %245 : vector<1x256x128xbf16> to vector<256x128xbf16>
    %cst_159 = arith.constant dense<0.000000e+00> : vector<16x128xf32>
    %247 = tpu.matmul %244, %246, %cst_159 {dimension_numbers = #tpu.dot_dimension_numbers<[1], [0], [0], [1], [0, 0, 1, 1], [], []>} : vector<16x256xbf16>, vector<256x128xbf16>, vector<16x128xf32> -> vector<16x128xf32>
    %248 = arith.addf %243, %247 : vector<16x128xf32>
    %c4_160 = arith.constant 4 : index
    %c0_161 = arith.constant 0 : index
    %249 = vector.load %arg17[%c4_160, %c0_161] : memref<20x256xbf16, #tpu.memory_space<vmem>>, vector<16x256xbf16>
    %c2_162 = arith.constant 2 : index
    %c0_163 = arith.constant 0 : index
    %c0_164 = arith.constant 0 : index
    %250 = vector.load %arg5[%c2_162, %c0_163, %c0_164] : memref<4x256x128xbf16, #tpu.memory_space<vmem>>, vector<1x256x128xbf16>
    %251 = vector.shape_cast %250 : vector<1x256x128xbf16> to vector<256x128xbf16>
    %cst_165 = arith.constant dense<0.000000e+00> : vector<16x128xf32>
    %252 = tpu.matmul %249, %251, %cst_165 {dimension_numbers = #tpu.dot_dimension_numbers<[1], [0], [0], [1], [0, 0, 1, 1], [], []>} : vector<16x256xbf16>, vector<256x128xbf16>, vector<16x128xf32> -> vector<16x128xf32>
    %253 = arith.addf %248, %252 : vector<16x128xf32>
    %c4_166 = arith.constant 4 : index
    %c0_167 = arith.constant 0 : index
    %254 = vector.load %arg18[%c4_166, %c0_167] : memref<20x256xbf16, #tpu.memory_space<vmem>>, vector<16x256xbf16>
    %c3_168 = arith.constant 3 : index
    %c0_169 = arith.constant 0 : index
    %c0_170 = arith.constant 0 : index
    %255 = vector.load %arg5[%c3_168, %c0_169, %c0_170] : memref<4x256x128xbf16, #tpu.memory_space<vmem>>, vector<1x256x128xbf16>
    %256 = vector.shape_cast %255 : vector<1x256x128xbf16> to vector<256x128xbf16>
    %cst_171 = arith.constant dense<0.000000e+00> : vector<16x128xf32>
    %257 = tpu.matmul %254, %256, %cst_171 {dimension_numbers = #tpu.dot_dimension_numbers<[1], [0], [0], [1], [0, 0, 1, 1], [], []>} : vector<16x256xbf16>, vector<256x128xbf16>, vector<16x128xf32> -> vector<16x128xf32>
    %258 = arith.addf %253, %257 : vector<16x128xf32>
    %c0_172 = arith.constant 0 : index
    %c0_173 = arith.constant 0 : index
    %259 = vector.load %arg10[%c0_172, %c0_173] : memref<1x128xf32, #tpu.memory_space<vmem>>, vector<1x128xf32>
    %260 = vector.broadcast %259 : vector<1x128xf32> to vector<16x128xf32>
    %261 = arith.addf %258, %260 : vector<16x128xf32>
    %cst_174 = arith.constant dense<0.000000e+00> : vector<128xf32>
    %262 = vector.multi_reduction <add>, %261, %cst_174 [0] : vector<16x128xf32> to vector<128xf32>
    %263 = vector.shape_cast %262 : vector<128xf32> to vector<1x128xf32>
    %cst_175 = arith.constant 1.600000e+01 : f32
    %264 = vector.broadcast %cst_175 : f32 to vector<1x128xf32>
    %265 = arith.divf %263, %264 : vector<1x128xf32>
    %266 = vector.broadcast %265 : vector<1x128xf32> to vector<16x128xf32>
    %267 = arith.subf %261, %266 : vector<16x128xf32>
    %268 = arith.mulf %267, %267 : vector<16x128xf32>
    %cst_176 = arith.constant dense<0.000000e+00> : vector<128xf32>
    %269 = vector.multi_reduction <add>, %268, %cst_176 [0] : vector<16x128xf32> to vector<128xf32>
    %270 = vector.shape_cast %269 : vector<128xf32> to vector<1x128xf32>
    %cst_177 = arith.constant 1.600000e+01 : f32
    %271 = vector.broadcast %cst_177 : f32 to vector<1x128xf32>
    %272 = arith.divf %270, %271 : vector<1x128xf32>
    %273 = vector.broadcast %265 : vector<1x128xf32> to vector<16x128xf32>
    %274 = arith.subf %261, %273 : vector<16x128xf32>
    %cst_178 = arith.constant 9.99999974E-6 : f32
    %275 = vector.broadcast %cst_178 : f32 to vector<1x128xf32>
    %276 = arith.addf %272, %275 : vector<1x128xf32>
    %277 = math.rsqrt %276 : vector<1x128xf32>
    %278 = vector.broadcast %277 : vector<1x128xf32> to vector<16x128xf32>
    %279 = arith.mulf %274, %278 : vector<16x128xf32>
    %cst_179 = arith.constant 0.000000e+00 : f32
    %280 = vector.broadcast %cst_179 : f32 to vector<16x128xf32>
    %281 = arith.cmpf ogt, %279, %280 : vector<16x128xf32>
    %cst_180 = arith.constant 2.000000e-01 : f32
    %282 = vector.broadcast %cst_180 : f32 to vector<16x128xf32>
    %283 = arith.mulf %282, %279 : vector<16x128xf32>
    %284 = arith.select %281, %279, %283 : vector<16x128xi1>, vector<16x128xf32>
    %c0_181 = arith.constant 0 : index
    %c0_182 = arith.constant 0 : index
    %285 = vector.load %arg19[%c0_181, %c0_182] : memref<16x128xf32, #tpu.memory_space<vmem>>, vector<16x128xf32>
    tpu.vector_store %arg19[%c0_181, %c0_182], %284 {strides = array<i32>} : memref<16x128xf32, #tpu.memory_space<vmem>>, vector<16x128xf32>,
    %c0_183 = arith.constant 0 : index
    %c0_184 = arith.constant 0 : index
    %286 = tpu.strided_load %arg19[%c0_183, %c0_184] {strides = array<i32: 2, 1>} : memref<16x128xf32, #tpu.memory_space<vmem>>, vector<8x128xf32>
    %c1_185 = arith.constant 1 : index
    %c0_186 = arith.constant 0 : index
    %287 = tpu.strided_load %arg19[%c1_185, %c0_186] {strides = array<i32: 2, 1>} : memref<16x128xf32, #tpu.memory_space<vmem>>, vector<8x128xf32>
    %cst_187 = arith.constant 0.000000e+00 : f32
    %288 = vector.broadcast %cst_187 : f32 to vector<1x128xf32>
    %289 = tpu.iota {dimensions = array<i32: 0>} : vector<8x1xi32>
    %290 = vector.extract_strided_slice %287 {offsets = [0, 0], sizes = [7, 128], strides = [1, 1]} : vector<8x128xf32> to vector<7x128xf32>
    %291 = tpu.concatenate %288, %290 in 0 : vector<1x128xf32>, vector<7x128xf32> -> vector<8x128xf32>
    %c2_i32 = arith.constant 2 : i32
    %c0_i32_188 = arith.constant 0 : i32
    %292 = arith.cmpi eq, %c2_i32, %c0_i32_188 : i32
    %c1_i32_189 = arith.constant 1 : i32
    %293 = arith.select %292, %c1_i32_189, %c2_i32 : i32
    %294 = vector.broadcast %293 : i32 to vector<8x1xi32>
    %295 = arith.remsi %289, %294 : vector<8x1xi32>
    %c0_i32_190 = arith.constant 0 : i32
    %296 = vector.broadcast %c0_i32_190 : i32 to vector<8x1xi32>
    %297 = arith.cmpi ne, %295, %296 : vector<8x1xi32>
    %c0_i32_191 = arith.constant 0 : i32
    %298 = vector.broadcast %c0_i32_191 : i32 to vector<8x1xi32>
    %299 = arith.cmpi slt, %295, %298 : vector<8x1xi32>
    %c0_i32_192 = arith.constant 0 : i32
    %300 = arith.cmpi slt, %293, %c0_i32_192 : i32
    %301 = vector.broadcast %300 : i1 to vector<8x1xi1>
    %302 = vector.broadcast %301 : vector<8x1xi1> to vector<8x1xi1>
    %303 = arith.xori %299, %302 : vector<8x1xi1>
    %304 = arith.andi %303, %297 : vector<8x1xi1>
    %305 = vector.broadcast %293 : i32 to vector<8x1xi32>
    %306 = arith.addi %295, %305 : vector<8x1xi32>
    %307 = arith.select %304, %306, %295 : vector<8x1xi1>, vector<8x1xi32>
    %c0_i32_193 = arith.constant 0 : i32
    %308 = vector.broadcast %c0_i32_193 : i32 to vector<8x1xi32>
    %309 = arith.cmpi eq, %307, %308 : vector<8x1xi32>
    %cst_194 = arith.constant 0.000000e+00 : f32
    %310 = vector.broadcast %cst_194 : f32 to vector<8x128xf32>
    %311 = vector.shape_cast %309 : vector<8x1xi1> to vector<8x1xi1>
    %312 = vector.broadcast %311 : vector<8x1xi1> to vector<8x128xi1>
    %313 = arith.select %312, %310, %291 : vector<8x128xi1>, vector<8x128xf32>
    %314 = vector.extract_strided_slice %286 {offsets = [1, 0], sizes = [7, 128], strides = [1, 1]} : vector<8x128xf32> to vector<7x128xf32>
    %315 = tpu.concatenate %314, %288 in 0 : vector<7x128xf32>, vector<1x128xf32> -> vector<8x128xf32>
    %c2_i32_195 = arith.constant 2 : i32
    %c0_i32_196 = arith.constant 0 : i32
    %316 = arith.cmpi eq, %c2_i32_195, %c0_i32_196 : i32
    %c1_i32_197 = arith.constant 1 : i32
    %317 = arith.select %316, %c1_i32_197, %c2_i32_195 : i32
    %318 = vector.broadcast %317 : i32 to vector<8x1xi32>
    %319 = arith.remsi %289, %318 : vector<8x1xi32>
    %c0_i32_198 = arith.constant 0 : i32
    %320 = vector.broadcast %c0_i32_198 : i32 to vector<8x1xi32>
    %321 = arith.cmpi ne, %319, %320 : vector<8x1xi32>
    %c0_i32_199 = arith.constant 0 : i32
    %322 = vector.broadcast %c0_i32_199 : i32 to vector<8x1xi32>
    %323 = arith.cmpi slt, %319, %322 : vector<8x1xi32>
    %c0_i32_200 = arith.constant 0 : i32
    %324 = arith.cmpi slt, %317, %c0_i32_200 : i32
    %325 = vector.broadcast %324 : i1 to vector<8x1xi1>
    %326 = vector.broadcast %325 : vector<8x1xi1> to vector<8x1xi1>
    %327 = arith.xori %323, %326 : vector<8x1xi1>
    %328 = arith.andi %327, %321 : vector<8x1xi1>
    %329 = vector.broadcast %317 : i32 to vector<8x1xi32>
    %330 = arith.addi %319, %329 : vector<8x1xi32>
    %331 = arith.select %328, %330, %319 : vector<8x1xi1>, vector<8x1xi32>
    %c1_i32_201 = arith.constant 1 : i32
    %332 = vector.broadcast %c1_i32_201 : i32 to vector<8x1xi32>
    %333 = arith.cmpi eq, %331, %332 : vector<8x1xi32>
    %cst_202 = arith.constant 0.000000e+00 : f32
    %334 = vector.broadcast %cst_202 : f32 to vector<8x128xf32>
    %335 = vector.shape_cast %333 : vector<8x1xi1> to vector<8x1xi1>
    %336 = vector.broadcast %335 : vector<8x1xi1> to vector<8x128xi1>
    %337 = arith.select %336, %334, %315 : vector<8x128xi1>, vector<8x128xf32>
    %338 = tpu.concatenate %313, %286, %287, %337 in 1 : vector<8x128xf32>, vector<8x128xf32>, vector<8x128xf32>, vector<8x128xf32> -> vector<8x512xf32>
    %339 = arith.truncf %338 : vector<8x512xf32> to vector<8x512xbf16>
    %cst_203 = arith.constant 0.000000e+00 : bf16
    %340 = vector.broadcast %cst_203 : bf16 to vector<2x512xbf16>
    %c0_204 = arith.constant 0 : index
    %c0_205 = arith.constant 0 : index
    %341 = vector.load %arg20[%c0_204, %c0_205] : memref<6x512xbf16, #tpu.memory_space<vmem>>, vector<2x512xbf16>
    tpu.vector_store %arg20[%c0_204, %c0_205], %340 {strides = array<i32>} : memref<6x512xbf16, #tpu.memory_space<vmem>>, vector<2x512xbf16>,
    %c4_206 = arith.constant 4 : index
    %c0_207 = arith.constant 0 : index
    %342 = vector.load %arg21[%c4_206, %c0_207] : memref<6x512xbf16, #tpu.memory_space<vmem>>, vector<2x512xbf16>
    tpu.vector_store %arg21[%c4_206, %c0_207], %340 {strides = array<i32>} : memref<6x512xbf16, #tpu.memory_space<vmem>>, vector<2x512xbf16>,
    %343 = vector.extract_strided_slice %339 {offsets = [0, 0], sizes = [2, 512], strides = [1, 1]} : vector<8x512xbf16> to vector<2x512xbf16>
    %c0_208 = arith.constant 0 : index
    %c0_209 = arith.constant 0 : index
    %344 = vector.load %arg21[%c0_208, %c0_209] : memref<6x512xbf16, #tpu.memory_space<vmem>>, vector<2x512xbf16>
    tpu.vector_store %arg21[%c0_208, %c0_209], %343 {strides = array<i32>} : memref<6x512xbf16, #tpu.memory_space<vmem>>, vector<2x512xbf16>,
    %345 = vector.extract_strided_slice %339 {offsets = [2, 0], sizes = [2, 512], strides = [1, 1]} : vector<8x512xbf16> to vector<2x512xbf16>
    %c2_210 = arith.constant 2 : index
    %c0_211 = arith.constant 0 : index
    %346 = vector.load %arg20[%c2_210, %c0_211] : memref<6x512xbf16, #tpu.memory_space<vmem>>, vector<2x512xbf16>
    tpu.vector_store %arg20[%c2_210, %c0_211], %345 {strides = array<i32>} : memref<6x512xbf16, #tpu.memory_space<vmem>>, vector<2x512xbf16>,
    %347 = vector.extract_strided_slice %339 {offsets = [4, 0], sizes = [2, 512], strides = [1, 1]} : vector<8x512xbf16> to vector<2x512xbf16>
    %c2_212 = arith.constant 2 : index
    %c0_213 = arith.constant 0 : index
    %348 = vector.load %arg21[%c2_212, %c0_213] : memref<6x512xbf16, #tpu.memory_space<vmem>>, vector<2x512xbf16>
    tpu.vector_store %arg21[%c2_212, %c0_213], %347 {strides = array<i32>} : memref<6x512xbf16, #tpu.memory_space<vmem>>, vector<2x512xbf16>,
    %349 = vector.extract_strided_slice %339 {offsets = [6, 0], sizes = [2, 512], strides = [1, 1]} : vector<8x512xbf16> to vector<2x512xbf16>
    %c4_214 = arith.constant 4 : index
    %c0_215 = arith.constant 0 : index
    %350 = vector.load %arg20[%c4_214, %c0_215] : memref<6x512xbf16, #tpu.memory_space<vmem>>, vector<2x512xbf16>
    tpu.vector_store %arg20[%c4_214, %c0_215], %349 {strides = array<i32>} : memref<6x512xbf16, #tpu.memory_space<vmem>>, vector<2x512xbf16>,
    %c0_216 = arith.constant 0 : index
    %c0_217 = arith.constant 0 : index
    %351 = vector.load %arg20[%c0_216, %c0_217] : memref<6x512xbf16, #tpu.memory_space<vmem>>, vector<4x512xbf16>
    %c0_218 = arith.constant 0 : index
    %c0_219 = arith.constant 0 : index
    %c0_220 = arith.constant 0 : index
    %352 = vector.load %arg6[%c0_218, %c0_219, %c0_220] : memref<4x512x256xbf16, #tpu.memory_space<vmem>>, vector<1x512x256xbf16>
    %353 = vector.shape_cast %352 : vector<1x512x256xbf16> to vector<512x256xbf16>
    %cst_221 = arith.constant dense<0.000000e+00> : vector<4x256xf32>
    %354 = tpu.matmul %351, %353, %cst_221 {dimension_numbers = #tpu.dot_dimension_numbers<[1], [0], [0], [1], [0, 0, 1, 1], [], []>} : vector<4x512xbf16>, vector<512x256xbf16>, vector<4x256xf32> -> vector<4x256xf32>
    %c0_222 = arith.constant 0 : index
    %c0_223 = arith.constant 0 : index
    %355 = vector.load %arg21[%c0_222, %c0_223] : memref<6x512xbf16, #tpu.memory_space<vmem>>, vector<4x512xbf16>
    %c1_224 = arith.constant 1 : index
    %c0_225 = arith.constant 0 : index
    %c0_226 = arith.constant 0 : index
    %356 = vector.load %arg6[%c1_224, %c0_225, %c0_226] : memref<4x512x256xbf16, #tpu.memory_space<vmem>>, vector<1x512x256xbf16>
    %357 = vector.shape_cast %356 : vector<1x512x256xbf16> to vector<512x256xbf16>
    %cst_227 = arith.constant dense<0.000000e+00> : vector<4x256xf32>
    %358 = tpu.matmul %355, %357, %cst_227 {dimension_numbers = #tpu.dot_dimension_numbers<[1], [0], [0], [1], [0, 0, 1, 1], [], []>} : vector<4x512xbf16>, vector<512x256xbf16>, vector<4x256xf32> -> vector<4x256xf32>
    %359 = arith.addf %354, %358 : vector<4x256xf32>
    %c2_228 = arith.constant 2 : index
    %c0_229 = arith.constant 0 : index
    %360 = vector.load %arg20[%c2_228, %c0_229] : memref<6x512xbf16, #tpu.memory_space<vmem>>, vector<4x512xbf16>
    %c2_230 = arith.constant 2 : index
    %c0_231 = arith.constant 0 : index
    %c0_232 = arith.constant 0 : index
    %361 = vector.load %arg6[%c2_230, %c0_231, %c0_232] : memref<4x512x256xbf16, #tpu.memory_space<vmem>>, vector<1x512x256xbf16>
    %362 = vector.shape_cast %361 : vector<1x512x256xbf16> to vector<512x256xbf16>
    %cst_233 = arith.constant dense<0.000000e+00> : vector<4x256xf32>
    %363 = tpu.matmul %360, %362, %cst_233 {dimension_numbers = #tpu.dot_dimension_numbers<[1], [0], [0], [1], [0, 0, 1, 1], [], []>} : vector<4x512xbf16>, vector<512x256xbf16>, vector<4x256xf32> -> vector<4x256xf32>
    %364 = arith.addf %359, %363 : vector<4x256xf32>
    %c2_234 = arith.constant 2 : index
    %c0_235 = arith.constant 0 : index
    %365 = vector.load %arg21[%c2_234, %c0_235] : memref<6x512xbf16, #tpu.memory_space<vmem>>, vector<4x512xbf16>
    %c3_236 = arith.constant 3 : index
    %c0_237 = arith.constant 0 : index
    %c0_238 = arith.constant 0 : index
    %366 = vector.load %arg6[%c3_236, %c0_237, %c0_238] : memref<4x512x256xbf16, #tpu.memory_space<vmem>>, vector<1x512x256xbf16>
    %367 = vector.shape_cast %366 : vector<1x512x256xbf16> to vector<512x256xbf16>
    %cst_239 = arith.constant dense<0.000000e+00> : vector<4x256xf32>
    %368 = tpu.matmul %365, %367, %cst_239 {dimension_numbers = #tpu.dot_dimension_numbers<[1], [0], [0], [1], [0, 0, 1, 1], [], []>} : vector<4x512xbf16>, vector<512x256xbf16>, vector<4x256xf32> -> vector<4x256xf32>
    %369 = arith.addf %364, %368 : vector<4x256xf32>
    %c0_240 = arith.constant 0 : index
    %c0_241 = arith.constant 0 : index
    %370 = vector.load %arg11[%c0_240, %c0_241] : memref<1x256xf32, #tpu.memory_space<vmem>>, vector<1x256xf32>
    %371 = vector.broadcast %370 : vector<1x256xf32> to vector<4x256xf32>
    %372 = arith.addf %369, %371 : vector<4x256xf32>
    %cst_242 = arith.constant dense<0.000000e+00> : vector<256xf32>
    %373 = vector.multi_reduction <add>, %372, %cst_242 [0] : vector<4x256xf32> to vector<256xf32>
    %374 = vector.shape_cast %373 : vector<256xf32> to vector<1x256xf32>
    %cst_243 = arith.constant 4.000000e+00 : f32
    %375 = vector.broadcast %cst_243 : f32 to vector<1x256xf32>
    %376 = arith.divf %374, %375 : vector<1x256xf32>
    %377 = vector.broadcast %376 : vector<1x256xf32> to vector<4x256xf32>
    %378 = arith.subf %372, %377 : vector<4x256xf32>
    %379 = arith.mulf %378, %378 : vector<4x256xf32>
    %cst_244 = arith.constant dense<0.000000e+00> : vector<256xf32>
    %380 = vector.multi_reduction <add>, %379, %cst_244 [0] : vector<4x256xf32> to vector<256xf32>
    %381 = vector.shape_cast %380 : vector<256xf32> to vector<1x256xf32>
    %cst_245 = arith.constant 4.000000e+00 : f32
    %382 = vector.broadcast %cst_245 : f32 to vector<1x256xf32>
    %383 = arith.divf %381, %382 : vector<1x256xf32>
    %384 = vector.broadcast %376 : vector<1x256xf32> to vector<4x256xf32>
    %385 = arith.subf %372, %384 : vector<4x256xf32>
    %cst_246 = arith.constant 9.99999974E-6 : f32
    %386 = vector.broadcast %cst_246 : f32 to vector<1x256xf32>
    %387 = arith.addf %383, %386 : vector<1x256xf32>
    %388 = math.rsqrt %387 : vector<1x256xf32>
    %389 = vector.broadcast %388 : vector<1x256xf32> to vector<4x256xf32>
    %390 = arith.mulf %385, %389 : vector<4x256xf32>
    %cst_247 = arith.constant 0.000000e+00 : f32
    %391 = vector.broadcast %cst_247 : f32 to vector<4x256xf32>
    %392 = arith.cmpf ogt, %390, %391 : vector<4x256xf32>
    %cst_248 = arith.constant 2.000000e-01 : f32
    %393 = vector.broadcast %cst_248 : f32 to vector<4x256xf32>
    %394 = arith.mulf %393, %390 : vector<4x256xf32>
    %395 = arith.select %392, %390, %394 : vector<4x256xi1>, vector<4x256xf32>
    %cst_249 = arith.constant 0.000000e+00 : bf16
    %396 = vector.broadcast %cst_249 : bf16 to vector<5x5x256xbf16>
    %c0_250 = arith.constant 0 : index
    %c0_251 = arith.constant 0 : index
    %c0_252 = arith.constant 0 : index
    %397 = vector.load %arg22[%c0_250, %c0_251, %c0_252] : memref<5x5x256xbf16, #tpu.memory_space<vmem>>, vector<5x5x256xbf16>
    tpu.vector_store %arg22[%c0_250, %c0_251, %c0_252], %396 {strides = array<i32>} : memref<5x5x256xbf16, #tpu.memory_space<vmem>>, vector<5x5x256xbf16>,
    %398 = vector.shape_cast %395 : vector<4x256xf32> to vector<2x2x256xf32>
    %399 = arith.truncf %398 : vector<2x2x256xf32> to vector<2x2x256xbf16>
    %c2_253 = arith.constant 2 : index
    %c2_254 = arith.constant 2 : index
    %c0_255 = arith.constant 0 : index
    %400 = vector.load %arg22[%c2_253, %c2_254, %c0_255] : memref<5x5x256xbf16, #tpu.memory_space<vmem>>, vector<2x2x256xbf16>
    tpu.vector_store %arg22[%c2_253, %c2_254, %c0_255], %399 {strides = array<i32>} : memref<5x5x256xbf16, #tpu.memory_space<vmem>>, vector<2x2x256xbf16>,
    %cst_256 = arith.constant 0.000000e+00 : f32
    %401 = vector.broadcast %cst_256 : f32 to vector<2x2x256xf32>
    %c0_257 = arith.constant 0 : index
    %c0_258 = arith.constant 0 : index
    %c0_259 = arith.constant 0 : index
    %402 = vector.load %arg22[%c0_257, %c0_258, %c0_259] : memref<5x5x256xbf16, #tpu.memory_space<vmem>>, vector<2x2x256xbf16>
    %403 = arith.extf %402 : vector<2x2x256xbf16> to vector<2x2x256xf32>
    %c0_260 = arith.constant 0 : index
    %c0_261 = arith.constant 0 : index
    %404 = vector.load %arg7[%c0_260, %c0_261] : memref<16x256xf32, #tpu.memory_space<vmem>>, vector<1x256xf32>
    %405 = vector.shape_cast %404 : vector<1x256xf32> to vector<1x1x256xf32>
    %406 = vector.broadcast %405 : vector<1x1x256xf32> to vector<2x2x256xf32>
    %407 = arith.mulf %403, %406 : vector<2x2x256xf32>
    %408 = arith.addf %401, %407 : vector<2x2x256xf32>
    %c0_262 = arith.constant 0 : index
    %c1_263 = arith.constant 1 : index
    %c0_264 = arith.constant 0 : index
    %409 = vector.load %arg22[%c0_262, %c1_263, %c0_264] : memref<5x5x256xbf16, #tpu.memory_space<vmem>>, vector<2x2x256xbf16>
    %410 = arith.extf %409 : vector<2x2x256xbf16> to vector<2x2x256xf32>
    %c1_265 = arith.constant 1 : index
    %c0_266 = arith.constant 0 : index
    %411 = vector.load %arg7[%c1_265, %c0_266] : memref<16x256xf32, #tpu.memory_space<vmem>>, vector<1x256xf32>
    %412 = vector.shape_cast %411 : vector<1x256xf32> to vector<1x1x256xf32>
    %413 = vector.broadcast %412 : vector<1x1x256xf32> to vector<2x2x256xf32>
    %414 = arith.mulf %410, %413 : vector<2x2x256xf32>
    %415 = arith.addf %408, %414 : vector<2x2x256xf32>
    %c0_267 = arith.constant 0 : index
    %c2_268 = arith.constant 2 : index
    %c0_269 = arith.constant 0 : index
    %416 = vector.load %arg22[%c0_267, %c2_268, %c0_269] : memref<5x5x256xbf16, #tpu.memory_space<vmem>>, vector<2x2x256xbf16>
    %417 = arith.extf %416 : vector<2x2x256xbf16> to vector<2x2x256xf32>
    %c2_270 = arith.constant 2 : index
    %c0_271 = arith.constant 0 : index
    %418 = vector.load %arg7[%c2_270, %c0_271] : memref<16x256xf32, #tpu.memory_space<vmem>>, vector<1x256xf32>
    %419 = vector.shape_cast %418 : vector<1x256xf32> to vector<1x1x256xf32>
    %420 = vector.broadcast %419 : vector<1x1x256xf32> to vector<2x2x256xf32>
    %421 = arith.mulf %417, %420 : vector<2x2x256xf32>
    %422 = arith.addf %415, %421 : vector<2x2x256xf32>
    %c0_272 = arith.constant 0 : index
    %c3_273 = arith.constant 3 : index
    %c0_274 = arith.constant 0 : index
    %423 = vector.load %arg22[%c0_272, %c3_273, %c0_274] : memref<5x5x256xbf16, #tpu.memory_space<vmem>>, vector<2x2x256xbf16>
    %424 = arith.extf %423 : vector<2x2x256xbf16> to vector<2x2x256xf32>
    %c3_275 = arith.constant 3 : index
    %c0_276 = arith.constant 0 : index
    %425 = vector.load %arg7[%c3_275, %c0_276] : memref<16x256xf32, #tpu.memory_space<vmem>>, vector<1x256xf32>
    %426 = vector.shape_cast %425 : vector<1x256xf32> to vector<1x1x256xf32>
    %427 = vector.broadcast %426 : vector<1x1x256xf32> to vector<2x2x256xf32>
    %428 = arith.mulf %424, %427 : vector<2x2x256xf32>
    %429 = arith.addf %422, %428 : vector<2x2x256xf32>
    %c1_277 = arith.constant 1 : index
    %c0_278 = arith.constant 0 : index
    %c0_279 = arith.constant 0 : index
    %430 = vector.load %arg22[%c1_277, %c0_278, %c0_279] : memref<5x5x256xbf16, #tpu.memory_space<vmem>>, vector<2x2x256xbf16>
    %431 = arith.extf %430 : vector<2x2x256xbf16> to vector<2x2x256xf32>
    %c4_280 = arith.constant 4 : index
    %c0_281 = arith.constant 0 : index
    %432 = vector.load %arg7[%c4_280, %c0_281] : memref<16x256xf32, #tpu.memory_space<vmem>>, vector<1x256xf32>
    %433 = vector.shape_cast %432 : vector<1x256xf32> to vector<1x1x256xf32>
    %434 = vector.broadcast %433 : vector<1x1x256xf32> to vector<2x2x256xf32>
    %435 = arith.mulf %431, %434 : vector<2x2x256xf32>
    %436 = arith.addf %429, %435 : vector<2x2x256xf32>
    %c1_282 = arith.constant 1 : index
    %c1_283 = arith.constant 1 : index
    %c0_284 = arith.constant 0 : index
    %437 = vector.load %arg22[%c1_282, %c1_283, %c0_284] : memref<5x5x256xbf16, #tpu.memory_space<vmem>>, vector<2x2x256xbf16>
    %438 = arith.extf %437 : vector<2x2x256xbf16> to vector<2x2x256xf32>
    %c5 = arith.constant 5 : index
    %c0_285 = arith.constant 0 : index
    %439 = vector.load %arg7[%c5, %c0_285] : memref<16x256xf32, #tpu.memory_space<vmem>>, vector<1x256xf32>
    %440 = vector.shape_cast %439 : vector<1x256xf32> to vector<1x1x256xf32>
    %441 = vector.broadcast %440 : vector<1x1x256xf32> to vector<2x2x256xf32>
    %442 = arith.mulf %438, %441 : vector<2x2x256xf32>
    %443 = arith.addf %436, %442 : vector<2x2x256xf32>
    %c1_286 = arith.constant 1 : index
    %c2_287 = arith.constant 2 : index
    %c0_288 = arith.constant 0 : index
    %444 = vector.load %arg22[%c1_286, %c2_287, %c0_288] : memref<5x5x256xbf16, #tpu.memory_space<vmem>>, vector<2x2x256xbf16>
    %445 = arith.extf %444 : vector<2x2x256xbf16> to vector<2x2x256xf32>
    %c6 = arith.constant 6 : index
    %c0_289 = arith.constant 0 : index
    %446 = vector.load %arg7[%c6, %c0_289] : memref<16x256xf32, #tpu.memory_space<vmem>>, vector<1x256xf32>
    %447 = vector.shape_cast %446 : vector<1x256xf32> to vector<1x1x256xf32>
    %448 = vector.broadcast %447 : vector<1x1x256xf32> to vector<2x2x256xf32>
    %449 = arith.mulf %445, %448 : vector<2x2x256xf32>
    %450 = arith.addf %443, %449 : vector<2x2x256xf32>
    %c1_290 = arith.constant 1 : index
    %c3_291 = arith.constant 3 : index
    %c0_292 = arith.constant 0 : index
    %451 = vector.load %arg22[%c1_290, %c3_291, %c0_292] : memref<5x5x256xbf16, #tpu.memory_space<vmem>>, vector<2x2x256xbf16>
    %452 = arith.extf %451 : vector<2x2x256xbf16> to vector<2x2x256xf32>
    %c7 = arith.constant 7 : index
    %c0_293 = arith.constant 0 : index
    %453 = vector.load %arg7[%c7, %c0_293] : memref<16x256xf32, #tpu.memory_space<vmem>>, vector<1x256xf32>
    %454 = vector.shape_cast %453 : vector<1x256xf32> to vector<1x1x256xf32>
    %455 = vector.broadcast %454 : vector<1x1x256xf32> to vector<2x2x256xf32>
    %456 = arith.mulf %452, %455 : vector<2x2x256xf32>
    %457 = arith.addf %450, %456 : vector<2x2x256xf32>
    %c2_294 = arith.constant 2 : index
    %c0_295 = arith.constant 0 : index
    %c0_296 = arith.constant 0 : index
    %458 = vector.load %arg22[%c2_294, %c0_295, %c0_296] : memref<5x5x256xbf16, #tpu.memory_space<vmem>>, vector<2x2x256xbf16>
    %459 = arith.extf %458 : vector<2x2x256xbf16> to vector<2x2x256xf32>
    %c8_297 = arith.constant 8 : index
    %c0_298 = arith.constant 0 : index
    %460 = vector.load %arg7[%c8_297, %c0_298] : memref<16x256xf32, #tpu.memory_space<vmem>>, vector<1x256xf32>
    %461 = vector.shape_cast %460 : vector<1x256xf32> to vector<1x1x256xf32>
    %462 = vector.broadcast %461 : vector<1x1x256xf32> to vector<2x2x256xf32>
    %463 = arith.mulf %459, %462 : vector<2x2x256xf32>
    %464 = arith.addf %457, %463 : vector<2x2x256xf32>
    %c2_299 = arith.constant 2 : index
    %c1_300 = arith.constant 1 : index
    %c0_301 = arith.constant 0 : index
    %465 = vector.load %arg22[%c2_299, %c1_300, %c0_301] : memref<5x5x256xbf16, #tpu.memory_space<vmem>>, vector<2x2x256xbf16>
    %466 = arith.extf %465 : vector<2x2x256xbf16> to vector<2x2x256xf32>
    %c9 = arith.constant 9 : index
    %c0_302 = arith.constant 0 : index
    %467 = vector.load %arg7[%c9, %c0_302] : memref<16x256xf32, #tpu.memory_space<vmem>>, vector<1x256xf32>
    %468 = vector.shape_cast %467 : vector<1x256xf32> to vector<1x1x256xf32>
    %469 = vector.broadcast %468 : vector<1x1x256xf32> to vector<2x2x256xf32>
    %470 = arith.mulf %466, %469 : vector<2x2x256xf32>
    %471 = arith.addf %464, %470 : vector<2x2x256xf32>
    %c2_303 = arith.constant 2 : index
    %c2_304 = arith.constant 2 : index
    %c0_305 = arith.constant 0 : index
    %472 = vector.load %arg22[%c2_303, %c2_304, %c0_305] : memref<5x5x256xbf16, #tpu.memory_space<vmem>>, vector<2x2x256xbf16>
    %473 = arith.extf %472 : vector<2x2x256xbf16> to vector<2x2x256xf32>
    %c10 = arith.constant 10 : index
    %c0_306 = arith.constant 0 : index
    %474 = vector.load %arg7[%c10, %c0_306] : memref<16x256xf32, #tpu.memory_space<vmem>>, vector<1x256xf32>
    %475 = vector.shape_cast %474 : vector<1x256xf32> to vector<1x1x256xf32>
    %476 = vector.broadcast %475 : vector<1x1x256xf32> to vector<2x2x256xf32>
    %477 = arith.mulf %473, %476 : vector<2x2x256xf32>
    %478 = arith.addf %471, %477 : vector<2x2x256xf32>
    %c2_307 = arith.constant 2 : index
    %c3_308 = arith.constant 3 : index
    %c0_309 = arith.constant 0 : index
    %479 = vector.load %arg22[%c2_307, %c3_308, %c0_309] : memref<5x5x256xbf16, #tpu.memory_space<vmem>>, vector<2x2x256xbf16>
    %480 = arith.extf %479 : vector<2x2x256xbf16> to vector<2x2x256xf32>
    %c11 = arith.constant 11 : index
    %c0_310 = arith.constant 0 : index
    %481 = vector.load %arg7[%c11, %c0_310] : memref<16x256xf32, #tpu.memory_space<vmem>>, vector<1x256xf32>
    %482 = vector.shape_cast %481 : vector<1x256xf32> to vector<1x1x256xf32>
    %483 = vector.broadcast %482 : vector<1x1x256xf32> to vector<2x2x256xf32>
    %484 = arith.mulf %480, %483 : vector<2x2x256xf32>
    %485 = arith.addf %478, %484 : vector<2x2x256xf32>
    %c3_311 = arith.constant 3 : index
    %c0_312 = arith.constant 0 : index
    %c0_313 = arith.constant 0 : index
    %486 = vector.load %arg22[%c3_311, %c0_312, %c0_313] : memref<5x5x256xbf16, #tpu.memory_space<vmem>>, vector<2x2x256xbf16>
    %487 = arith.extf %486 : vector<2x2x256xbf16> to vector<2x2x256xf32>
    %c12_314 = arith.constant 12 : index
    %c0_315 = arith.constant 0 : index
    %488 = vector.load %arg7[%c12_314, %c0_315] : memref<16x256xf32, #tpu.memory_space<vmem>>, vector<1x256xf32>
    %489 = vector.shape_cast %488 : vector<1x256xf32> to vector<1x1x256xf32>
    %490 = vector.broadcast %489 : vector<1x1x256xf32> to vector<2x2x256xf32>
    %491 = arith.mulf %487, %490 : vector<2x2x256xf32>
    %492 = arith.addf %485, %491 : vector<2x2x256xf32>
    %c3_316 = arith.constant 3 : index
    %c1_317 = arith.constant 1 : index
    %c0_318 = arith.constant 0 : index
    %493 = vector.load %arg22[%c3_316, %c1_317, %c0_318] : memref<5x5x256xbf16, #tpu.memory_space<vmem>>, vector<2x2x256xbf16>
    %494 = arith.extf %493 : vector<2x2x256xbf16> to vector<2x2x256xf32>
    %c13 = arith.constant 13 : index
    %c0_319 = arith.constant 0 : index
    %495 = vector.load %arg7[%c13, %c0_319] : memref<16x256xf32, #tpu.memory_space<vmem>>, vector<1x256xf32>
    %496 = vector.shape_cast %495 : vector<1x256xf32> to vector<1x1x256xf32>
    %497 = vector.broadcast %496 : vector<1x1x256xf32> to vector<2x2x256xf32>
    %498 = arith.mulf %494, %497 : vector<2x2x256xf32>
    %499 = arith.addf %492, %498 : vector<2x2x256xf32>
    %c3_320 = arith.constant 3 : index
    %c2_321 = arith.constant 2 : index
    %c0_322 = arith.constant 0 : index
    %500 = vector.load %arg22[%c3_320, %c2_321, %c0_322] : memref<5x5x256xbf16, #tpu.memory_space<vmem>>, vector<2x2x256xbf16>
    %501 = arith.extf %500 : vector<2x2x256xbf16> to vector<2x2x256xf32>
    %c14 = arith.constant 14 : index
    %c0_323 = arith.constant 0 : index
    %502 = vector.load %arg7[%c14, %c0_323] : memref<16x256xf32, #tpu.memory_space<vmem>>, vector<1x256xf32>
    %503 = vector.shape_cast %502 : vector<1x256xf32> to vector<1x1x256xf32>
    %504 = vector.broadcast %503 : vector<1x1x256xf32> to vector<2x2x256xf32>
    %505 = arith.mulf %501, %504 : vector<2x2x256xf32>
    %506 = arith.addf %499, %505 : vector<2x2x256xf32>
    %c3_324 = arith.constant 3 : index
    %c3_325 = arith.constant 3 : index
    %c0_326 = arith.constant 0 : index
    %507 = vector.load %arg22[%c3_324, %c3_325, %c0_326] : memref<5x5x256xbf16, #tpu.memory_space<vmem>>, vector<2x2x256xbf16>
    %508 = arith.extf %507 : vector<2x2x256xbf16> to vector<2x2x256xf32>
    %c15 = arith.constant 15 : index
    %c0_327 = arith.constant 0 : index
    %509 = vector.load %arg7[%c15, %c0_327] : memref<16x256xf32, #tpu.memory_space<vmem>>, vector<1x256xf32>
    %510 = vector.shape_cast %509 : vector<1x256xf32> to vector<1x1x256xf32>
    %511 = vector.broadcast %510 : vector<1x1x256xf32> to vector<2x2x256xf32>
    %512 = arith.mulf %508, %511 : vector<2x2x256xf32>
    %513 = arith.addf %506, %512 : vector<2x2x256xf32>
    %cst_328 = arith.constant dense<0.000000e+00> : vector<2x2xf32>
    %514 = vector.multi_reduction <add>, %513, %cst_328 [2] : vector<2x2x256xf32> to vector<2x2xf32>
    %c0_329 = arith.constant 0 : index
    %c0_330 = arith.constant 0 : index
    %c0_331 = arith.constant 0 : index
    %515 = vector.load %arg12[%c0_329, %c0_330, %c0_331] : memref<1x2x2xf32, #tpu.memory_space<vmem>>, vector<1x2x2xf32>
    %516 = vector.shape_cast %515 : vector<1x2x2xf32> to vector<2x2xf32>
    %517 = vector.shape_cast %514 : vector<2x2xf32> to vector<1x2x2xf32>
    tpu.vector_store %arg12[%c0_329, %c0_330, %c0_331], %517 {strides = array<i32>} : memref<1x2x2xf32, #tpu.memory_space<vmem>>, vector<1x2x2xf32>,
    return
  }
  func.func @transform_0(%arg0: i32) -> (i32, i32, i32) {
    %c0_i32 = arith.constant 0 : i32
    %c0_i32_0 = arith.constant 0 : i32
    %c0_i32_1 = arith.constant 0 : i32
    return %arg0, %c0_i32, %c0_i32_0 : i32, i32, i32
  }
  func.func @transform_1(%arg0: i32) -> (i32, i32, i32) {
    %c0_i32 = arith.constant 0 : i32
    %c0_i32_0 = arith.constant 0 : i32
    %c0_i32_1 = arith.constant 0 : i32
    return %arg0, %c0_i32, %c0_i32_0 : i32, i32, i32
  }
  func.func @transform_2(%arg0: i32) -> (i32, i32, i32) {
    %c0_i32 = arith.constant 0 : i32
    %c0_i32_0 = arith.constant 0 : i32
    %c0_i32_1 = arith.constant 0 : i32
    %c0_i32_2 = arith.constant 0 : i32
    return %c0_i32, %c0_i32_0, %c0_i32_1 : i32, i32, i32
  }
  func.func @transform_3(%arg0: i32) -> (i32, i32, i32) {
    %c0_i32 = arith.constant 0 : i32
    %c0_i32_0 = arith.constant 0 : i32
    %c0_i32_1 = arith.constant 0 : i32
    %c0_i32_2 = arith.constant 0 : i32
    return %c0_i32, %c0_i32_0, %c0_i32_1 : i32, i32, i32
  }
  func.func @transform_4(%arg0: i32) -> (i32, i32, i32) {
    %c0_i32 = arith.constant 0 : i32
    %c0_i32_0 = arith.constant 0 : i32
    %c0_i32_1 = arith.constant 0 : i32
    %c0_i32_2 = arith.constant 0 : i32
    return %c0_i32, %c0_i32_0, %c0_i32_1 : i32, i32, i32
  }
  func.func @transform_5(%arg0: i32) -> (i32, i32, i32) {
    %c0_i32 = arith.constant 0 : i32
    %c0_i32_0 = arith.constant 0 : i32
    %c0_i32_1 = arith.constant 0 : i32
    %c0_i32_2 = arith.constant 0 : i32
    return %c0_i32, %c0_i32_0, %c0_i32_1 : i32, i32, i32
  }
  func.func @transform_6(%arg0: i32) -> (i32, i32) {
    %c0_i32 = arith.constant 0 : i32
    %c0_i32_0 = arith.constant 0 : i32
    %c0_i32_1 = arith.constant 0 : i32
    return %c0_i32, %c0_i32_0 : i32, i32
  }
  func.func @transform_7(%arg0: i32) -> (i32, i32) {
    %c0_i32 = arith.constant 0 : i32
    %c0_i32_0 = arith.constant 0 : i32
    %c0_i32_1 = arith.constant 0 : i32
    return %c0_i32, %c0_i32_0 : i32, i32
  }
  func.func @transform_8(%arg0: i32) -> (i32, i32) {
    %c0_i32 = arith.constant 0 : i32
    %c0_i32_0 = arith.constant 0 : i32
    %c0_i32_1 = arith.constant 0 : i32
    return %c0_i32, %c0_i32_0 : i32, i32
  }
  func.func @transform_9(%arg0: i32) -> (i32, i32) {
    %c0_i32 = arith.constant 0 : i32
    %c0_i32_0 = arith.constant 0 : i32
    %c0_i32_1 = arith.constant 0 : i32
    return %c0_i32, %c0_i32_0 : i32, i32
  }
  func.func @transform_10(%arg0: i32) -> (i32, i32) {
    %c0_i32 = arith.constant 0 : i32
    %c0_i32_0 = arith.constant 0 : i32
    %c0_i32_1 = arith.constant 0 : i32
    return %c0_i32, %c0_i32_0 : i32, i32
  }
  func.func @transform_11(%arg0: i32) -> (i32, i32, i32) {
    %c0_i32 = arith.constant 0 : i32
    %c0_i32_0 = arith.constant 0 : i32
    %c0_i32_1 = arith.constant 0 : i32
    return %arg0, %c0_i32, %c0_i32_0 : i32, i32, i32
  }
}

</mosaic_0001>

<bundles_post_ra>
// kernel: cgan_patchgan_discriminator.1
= control target key start
LH: loop header
LB: loop body
LE: loop exit
PB: predicated region body
PF: predicated region fallthrough
CT: control target
= control target key end

     0   :  { %s9746_s17 = smov 0   ;;  %s12591_s0 = inlined_call_operand.vmem [shape: bf16[2,272,64], index: 0, kind: input, shape index: {}]   ;;  %s12592_s1 = inlined_call_operand.vmem [shape: bf16[2,272,64], index: 1, kind: input, shape index: {}]   ;;  %s12593_s2 = inlined_call_operand.vmem [shape: bf16[4,64,32], index: 2, kind: input, shape index: {}]   ;;  %s12594_s3 = inlined_call_operand.vmem [shape: bf16[4,128,64], index: 3, kind: input, shape index: {}]   ;;  %s12595_s4 = inlined_call_operand.vmem [shape: bf16[4,256,128], index: 4, kind: input, shape index: {}]   ;;  %s12596_s5 = inlined_call_operand.vmem [shape: bf16[4,512,256], index: 5, kind: input, shape index: {}]   ;;  %s12597_s6 = inlined_call_operand.vmem [shape: f32[16,256], index: 6, kind: input, shape index: {}]   ;;  %s12598_s7 = inlined_call_operand.vmem [shape: f32[1,32], index: 7, kind: input, shape index: {}]   ;;  %s12599_s8 = inlined_call_operand.vmem [shape: f32[1,64], index: 8, kind: input, shape index: {}]   ;;  %s12600_s9 = inlined_call_operand.vmem [shape: f32[1,128], index: 9, kind: input, shape index: {}]   ;;  %s12601_s10 = inlined_call_operand.vmem [shape: f32[1,256], index: 10, kind: input, shape index: {}]   ;;  %s12602_s11 = inlined_call_operand.vmem [shape: f32[2,2,2], index: 11, kind: output, shape index: {}]  }
   0x1 LB: > { %s7449_s18 = sadd.s32 4294967295, %s9679_s17   ;;  %p7453_p0 = scmp.ge.s32.totalorder %s9679_s17, 1  ;;  %s9679_s17 = sphi %s9746_s17, %s21_s17  }
   0x2   : > { %p347_p1 = scmp.lt.s32.totalorder %s9679_s17, 3 }
   0x4   : > { %p348_p2 = pnand %p7453_p0, %p347_p1 }
   0x6   : > { %351 = sbr.rel (%p348_p2) target bundleno = 1958 (0x7a6), region = 64 }
   0xb   : > { %v9061_v0 = vld [vmem:[%s12593_s2 + $0x38] sm:$0xff]   ;;  %p391_p3 = scmp.lt.s32.totalorder %s7449_s18, 1  ;;  %v9063_v2 = vld [vmem:[%s12593_s2 + $0x30] sm:$0xff]   ;;  %v9065_v4 = vld [vmem:[%s12593_s2 + $0x28] sm:$0xff]   ;;  %vm12611_vm0 = vcmask 523264   ;;  %vm12614_vm1 = vcmask 261120  }
   0xc   : > { %v9062_v1 = vld [vmem:[%s12593_s2 + $0x18] sm:$0xff]   ;;  %8666 = vmatprep.subr.bf16.mxu0 %v9061_v0  ;;  %v9064_v3 = vld [vmem:[%s12593_s2 + $0x10] sm:$0xff]   ;;  %v9066_v5 = vld [vmem:[%s12593_s2 + $0x8] sm:$0xff]   ;;  %vm12615_vm9 = vcmask 1046528   ;;  %s9682_s26 = smov 64   ;;  %s9683_s12 = smov 96  }
   0xd   : > { %s12924_s18 = smov (!%p391_p3, %s7449_s18), 1  ;;  %8706 = vmatprep.subr.bf16.mxu1 %v9062_v1  ;;  %8667 = vmatpush3.bf16.msra.mxu0 %v9061_v0  ;;  %v9067_v6 = vld [vmem:[%s12593_s2 + $0x20] sm:$0xff]   ;;  %v9073_v10 = vld [vmem:[%s12593_s2 + $0x58] sm:$0xff]   ;;  %v9083_v19 = vld [vmem:[%s12593_s2 + $0x50] sm:$0xff]  }
   0xe   : > { %8707 = vmatpush3.bf16.msra.mxu1 %v9062_v1  ;;  %8668 = vmatprep.subr.bf16.mxu0 %v9063_v2  ;;  %s8922_s29 = smul.u32 136, %s12924_s18  ;;  %v9068_v7 = vld [vmem:[%s12593_s2] sm:$0xff]   ;;  %v9074_v11 = vld [vmem:[%s12593_s2 + $0x78] sm:$0xff]   ;;  %v9084_v20 = vld [vmem:[%s12593_s2 + $0x70] sm:$0xff]   ;;  %s7456_s30 = sshll.u32 %s12924_s18, 1 }
   0xf   : > { %8708 = vmatprep.subr.bf16.mxu1 %v9064_v3  ;;  %v9093_v26 = vld [vmem:[%s12593_s2 + $0x48] sm:$0xff]   ;;  %v9103_v32 = vld [vmem:[%s12593_s2 + $0x40] sm:$0xff]  }
  0x10   : > { %s9781_s19 = scalar_lea.vmem %s12592_s1, %s8922_s29  ;;  %s9786_s22 = scalar_lea.vmem %s12591_s0, %s8922_s29  ;;  %v9094_v27 = vld [vmem:[%s12593_s2 + $0x68] sm:$0xff]   ;;  %v9104_v33 = vld [vmem:[%s12593_s2 + $0x60] sm:$0xff]  }
  0x11   : > { %8669 = vmatpush3.bf16.msra.mxu0 %v9063_v2  ;;  %v9069_v8 = vld [vmem:[%s9781_s19] sm:$0xff]   ;;  %v9071_v12 = vld [vmem:[%s9781_s19 + $0x8] sm:$0xff]   ;;  %v9075_v14 = vld [vmem:[%s9781_s19 + $0x10] sm:$0xff]  }
  0x12   : > { %8709 = vmatpush3.bf16.msra.mxu1 %v9064_v3  ;;  %8670 = vmatprep.subr.bf16.mxu0 %v9065_v4  ;;  %v9070_v9 = vld [vmem:[%s9786_s22] sm:$0xff]   ;;  %v9072_v13 = vld [vmem:[%s9786_s22 + $0x8] sm:$0xff]   ;;  %v9076_v15 = vld [vmem:[%s9786_s22 + $0x10] sm:$0xff]  }
  0x13   : > { %8710 = vmatprep.subr.bf16.mxu1 %v9066_v5  ;;  %8674 = vmatprep.mubr.msk.bf16.mxu0 %vm12611_vm0, %v9069_v8  ;;  %v9077_v16 = vld [vmem:[%s9781_s19 + $0x18] sm:$0xff]   ;;  %v9079_v18 = vld [vmem:[%s9781_s19 + $0x20] sm:$0xff]   ;;  %v9081_v22 = vld [vmem:[%s9781_s19 + $0x28] sm:$0xff]  }
  0x14   : > { %8714 = vmatprep.mubr.msk.bf16.mxu1 %vm12611_vm0, %v9070_v9  ;;  %v9078_v17 = vld [vmem:[%s9786_s22 + $0x18] sm:$0xff]   ;;  %v9080_v21 = vld [vmem:[%s9786_s22 + $0x20] sm:$0xff]   ;;  %v9082_v23 = vld [vmem:[%s9786_s22 + $0x28] sm:$0xff]  }
  0x15   : > { %8671 = vmatpush3.bf16.msra.mxu0 %v9065_v4  ;;  %v9085_v24 = vld [vmem:[%s9781_s19 + $0x30] sm:$0xff]   ;;  %v9087_v28 = vld [vmem:[%s9781_s19 + $0x38] sm:$0xff]   ;;  %v9089_v30 = vld [vmem:[%s9781_s19 + $0x40] sm:$0xff]  }
  0x16   : > { %8711 = vmatpush3.bf16.msra.mxu1 %v9066_v5  ;;  %8672 = vmatprep.subr.bf16.mxu0 %v9067_v6  ;;  %v9086_v25 = vld [vmem:[%s9786_s22 + $0x30] sm:$0xff]   ;;  %v9088_v29 = vld [vmem:[%s9786_s22 + $0x38] sm:$0xff]   ;;  %v9090_v31 = vld [vmem:[%s9786_s22 + $0x40] sm:$0xff]  }
  0x17   : > { %8712 = vmatprep.subr.bf16.mxu1 %v9068_v7  ;;  %v9091_v34 = vld [vmem:[%s9781_s19 + $0x48] sm:$0xff]   ;;  %v9095_v36 = vld [vmem:[%s9781_s19 + $0x50] sm:$0xff]   ;;  %v9097_v38 = vld [vmem:[%s9781_s19 + $0x58] sm:$0xff]  }
  0x18   : > { %v9092_v35 = vld [vmem:[%s9786_s22 + $0x48] sm:$0xff]   ;;  %v9096_v37 = vld [vmem:[%s9786_s22 + $0x50] sm:$0xff]   ;;  %v9098_v39 = vld [vmem:[%s9786_s22 + $0x58] sm:$0xff]  }
  0x19   : > { %8673 = vmatpush3.bf16.msra.mxu0 %v9067_v6  ;;  %v9099_v40 = vld [vmem:[%s9781_s19 + $0x60] sm:$0xff]   ;;  %v9101_v42 = vld [vmem:[%s9781_s19 + $0x68] sm:$0xff]   ;;  %v9105_v44 = vld [vmem:[%s9781_s19 + $0x70] sm:$0xff]  }
  0x1a   : > { %8713 = vmatpush3.bf16.msra.mxu1 %v9068_v7  ;;  %8746 = vmatprep.subr.bf16.mxu0 %v9073_v10  ;;  %v9100_v41 = vld [vmem:[%s9786_s22 + $0x60] sm:$0xff]   ;;  %v9102_v43 = vld [vmem:[%s9786_s22 + $0x68] sm:$0xff]   ;;  %v9106_v45 = vld [vmem:[%s9786_s22 + $0x70] sm:$0xff]  }
  0x1b   : > { %8786 = vmatprep.subr.bf16.mxu1 %v9074_v11  ;;  %v9107_v46 = vld [vmem:[%s9781_s19 + $0x78] sm:$0xff]   ;;  %v9109_v48 = vld [vmem:[%s9786_s22 + $0x8] sm:$0xff]   ;;  %v9111_v50 = vld [vmem:[%s9786_s22 + $0x10] sm:$0xff]  }
  0x1c   : > { %8675 = vmatmul.mubr.msk.bf16.vlgmr.msra.gmra.mxu0 %vm12611_vm0, %v9071_v12  ;;  %v9108_v47 = vld [vmem:[%s9786_s22 + $0x78] sm:$0xff]   ;;  %v9110_v49 = vld [vmem:[%s9781_s19 + $0x8] sm:$0xff]   ;;  %v9112_v51 = vld [vmem:[%s9781_s19 + $0x10] sm:$0xff]  }
  0x1d   : > { %8715 = vmatmul.mubr.msk.bf16.vlgmr.msra.gmra.mxu1 %vm12611_vm0, %v9072_v13  ;;  %8747 = vmatpush3.bf16.msra.mxu0 %v9073_v10  ;;  %v9113_v52 = vld [vmem:[%s9786_s22 + $0x18] sm:$0xff]   ;;  %v9115_v54 = vld [vmem:[%s9786_s22 + $0x20] sm:$0xff]   ;;  %v9117_v56 = vld [vmem:[%s9786_s22 + $0x28] sm:$0xff]  }
  0x1e   : > { %8787 = vmatpush3.bf16.msra.mxu1 %v9074_v11  ;;  %8678 = vmatprep.mubr.msk.bf16.mxu0 %vm12611_vm0, %v9075_v14  ;;  %v9114_v53 = vld [vmem:[%s9781_s19 + $0x18] sm:$0xff]   ;;  %v9116_v55 = vld [vmem:[%s9781_s19 + $0x20] sm:$0xff]   ;;  %v9118_v57 = vld [vmem:[%s9781_s19 + $0x28] sm:$0xff]  }
  0x1f   : > { %8718 = vmatprep.mubr.msk.bf16.mxu1 %vm12611_vm0, %v9076_v15  ;;  %8748 = vmatprep.subr.bf16.mxu0 %v9083_v19  ;;  %v9119_v58 = vld [vmem:[%s9786_s22 + $0x30] sm:$0xff]   ;;  %v9121_v60 = vld [vmem:[%s9786_s22 + $0x38] sm:$0xff]   ;;  %v9123_v62 = vld [vmem:[%s9786_s22 + $0x40] sm:$0xff]  }
  0x20   : > { %8788 = vmatprep.subr.bf16.mxu1 %v9084_v20  ;;  %v9120_v59 = vld [vmem:[%s9781_s19 + $0x30] sm:$0xff]   ;;  %v9122_v61 = vld [vmem:[%s9781_s19 + $0x38] sm:$0xff]   ;;  %v9124_v63 = vld [vmem:[%s9781_s19 + $0x40] sm:$0xff]  }
  0x21   : > { %8749 = vmatpush3.bf16.msra.mxu0 %v9083_v19  ;;  %v9125_v0 = vld [vmem:[%s9786_s22 + $0x48] sm:$0xff]   ;;  %v9127_v2 = vld [vmem:[%s9786_s22 + $0x50] sm:$0xff]   ;;  %v9129_v4 = vld [vmem:[%s9786_s22 + $0x58] sm:$0xff]  }
  0x22   : > { %8789 = vmatpush3.bf16.msra.mxu1 %v9084_v20  ;;  %8750 = vmatprep.subr.bf16.mxu0 %v9093_v26  ;;  %v9126_v1 = vld [vmem:[%s9781_s19 + $0x48] sm:$0xff]   ;;  %v9128_v3 = vld [vmem:[%s9781_s19 + $0x50] sm:$0xff]   ;;  %v9130_v5 = vld [vmem:[%s9781_s19 + $0x58] sm:$0xff]  }
  0x23   : > { %8790 = vmatprep.subr.bf16.mxu1 %v9094_v27  ;;  %v9131_v6 = vld [vmem:[%s9786_s22 + $0x60] sm:$0xff]   ;;  %v9133_v8 = vld [vmem:[%s9786_s22 + $0x68] sm:$0xff]   ;;  %v9135_v10 = vld [vmem:[%s9786_s22 + $0x70] sm:$0xff]  }
  0x24   : > { %8679 = vmatmul.mubr.msk.bf16.gmra.mxu0 %vm12611_vm0, %v9077_v16  ;;  %v9132_v7 = vld [vmem:[%s9781_s19 + $0x60] sm:$0xff]   ;;  %v9134_v9 = vld [vmem:[%s9781_s19 + $0x68] sm:$0xff]   ;;  %v9136_v11 = vld [vmem:[%s9781_s19 + $0x70] sm:$0xff]  }
  0x25   : > { %8719 = vmatmul.mubr.msk.bf16.gmra.mxu1 %vm12611_vm0, %v9078_v17  ;;  %8682 = vmatprep.mubr.msk.bf16.mxu0 %vm12611_vm0, %v9079_v18  ;;  %v9137_v12 = vld [vmem:[%s9786_s22 + $0x78] sm:$0xff]   ;;  %v9139_v14 = vld [vmem:[%s9786_s22 + $0x80] sm:$0xff]   ;;  %s9681_s22 = smov 32  }
  0x26   : > { %8722 = vmatprep.mubr.msk.bf16.mxu1 %vm12611_vm0, %v9080_v21  ;;  %8751 = vmatpush3.bf16.msra.mxu0 %v9093_v26  ;;  %v9138_v13 = vld [vmem:[%s9781_s19 + $0x78] sm:$0xff]   ;;  %v9140_v15 = vld [vmem:[%s9781_s19 + $0x80] sm:$0xff]  }
  0x27   : > { %8791 = vmatpush3.bf16.msra.mxu1 %v9094_v27  ;;  %8752 = vmatprep.subr.bf16.mxu0 %v9103_v32 }
  0x28   : > { %8792 = vmatprep.subr.bf16.mxu1 %v9104_v33 }
  0x2a   : > { %8753 = vmatpush3.bf16.msra.mxu0 %v9103_v32 }
  0x2b   : > { %8793 = vmatpush3.bf16.msra.mxu1 %v9104_v33 }
  0x2c   : > { %8683 = vmatmul.mubr.msk.bf16.gmra.mxu0 %vm12611_vm0, %v9081_v22 }
  0x2d   : > { %8723 = vmatmul.mubr.msk.bf16.gmra.mxu1 %vm12611_vm0, %v9082_v23  ;;  %8686 = vmatprep.mubr.msk.bf16.mxu0 %vm12611_vm0, %v9085_v24 }
  0x2e   : > { %8726 = vmatprep.mubr.msk.bf16.mxu1 %vm12611_vm0, %v9086_v25 }
  0x34   : > { %8687 = vmatmul.mubr.msk.bf16.gmra.mxu0 %vm12611_vm0, %v9087_v28 }
  0x35   : > { %8727 = vmatmul.mubr.msk.bf16.gmra.mxu1 %vm12611_vm0, %v9088_v29  ;;  %8690 = vmatprep.mubr.msk.bf16.mxu0 %vm12611_vm0, %v9089_v30 }
  0x36   : > { %8730 = vmatprep.mubr.msk.bf16.mxu1 %vm12611_vm0, %v9090_v31 }
  0x3c   : > { %8691 = vmatmul.mubr.msk.bf16.gmra.mxu0 %vm12611_vm0, %v9091_v34 }
  0x3d   : > { %8731 = vmatmul.mubr.msk.bf16.gmra.mxu1 %vm12611_vm0, %v9092_v35  ;;  %8694 = vmatprep.mubr.msk.bf16.mxu0 %vm12611_vm0, %v9095_v36 }
  0x3e   : > { %8734 = vmatprep.mubr.msk.bf16.mxu1 %vm12611_vm0, %v9096_v37 }
  0x44   : > { %8695 = vmatmul.mubr.msk.bf16.gmra.mxu0 %vm12611_vm0, %v9097_v38 }
  0x45   : > { %8735 = vmatmul.mubr.msk.bf16.gmra.mxu1 %vm12611_vm0, %v9098_v39  ;;  %8698 = vmatprep.mubr.msk.bf16.mxu0 %vm12611_vm0, %v9099_v40 }
  0x46   : > { %8738 = vmatprep.mubr.msk.bf16.mxu1 %vm12611_vm0, %v9100_v41 }
  0x4c   : > { %8699 = vmatmul.mubr.msk.bf16.gmra.mxu0 %vm12611_vm0, %v9101_v42 }
  0x4d   : > { %8739 = vmatmul.mubr.msk.bf16.gmra.mxu1 %vm12611_vm0, %v9102_v43  ;;  %8702 = vmatprep.mubr.msk.bf16.mxu0 %vm12611_vm0, %v9105_v44 }
  0x4e   : > { %8742 = vmatprep.mubr.msk.bf16.mxu1 %vm12611_vm0, %v9106_v45 }
  0x54   : > { %8703 = vmatmul.mubr.msk.bf16.gmra.mxu0 %vm12611_vm0, %v9107_v46 }
  0x55   : > { %8743 = vmatmul.mubr.msk.bf16.gmra.mxu1 %vm12611_vm0, %v9108_v47  ;;  %8754 = vmatprep.mubr.msk.bf16.mxu0 %vm12611_vm0, %v9109_v48 }
  0x56   : > { %8794 = vmatprep.mubr.msk.bf16.mxu1 %vm12611_vm0, %v9110_v49 }
  0x5c   : > { %8755 = vmatmul.mubr.msk.bf16.vlgmr.msra.gmra.mxu0 %vm12611_vm0, %v9111_v50 }
  0x5d   : > { %8795 = vmatmul.mubr.msk.bf16.vlgmr.msra.gmra.mxu1 %vm12611_vm0, %v9112_v51  ;;  %8758 = vmatprep.mubr.msk.bf16.mxu0 %vm12611_vm0, %v9113_v52  ;;  %v9141_v52 = vld [vmem:[%s12594_s3 + $0x78] sm:$0xff]  }
  0x5e   : > { %8798 = vmatprep.mubr.msk.bf16.mxu1 %vm12611_vm0, %v9114_v53  ;;  %v9142_v53 = vld [vmem:[%s12594_s3 + $0x38] sm:$0xff]   ;;  %8826 = vmatprep.subr.bf16.mxu0 %v9141_v52 }
  0x5f   : > { %8850 = vmatprep.subr.bf16.mxu1 %v9142_v53  ;;  %8827 = vmatpush3.bf16.msra.mxu0 %v9141_v52 }
  0x60   : > { %8851 = vmatpush3.bf16.msra.mxu1 %v9142_v53 }
  0x64   : > { %8759 = vmatmul.mubr.msk.bf16.gmra.mxu0 %vm12611_vm0, %v9115_v54  ;;  %v9143_v54 = vld [vmem:[%s12594_s3 + $0x70] sm:$0xff]  }
  0x65   : > { %8799 = vmatmul.mubr.msk.bf16.gmra.mxu1 %vm12611_vm0, %v9116_v55  ;;  %8762 = vmatprep.mubr.msk.bf16.mxu0 %vm12611_vm0, %v9117_v56  ;;  %v9144_v56 = vld [vmem:[%s12594_s3 + $0x30] sm:$0xff]  }
  0x66   : > { %8802 = vmatprep.mubr.msk.bf16.mxu1 %vm12611_vm0, %v9118_v57  ;;  %8828 = vmatprep.subr.bf16.mxu0 %v9143_v54 }
  0x67   : > { %8852 = vmatprep.subr.bf16.mxu1 %v9144_v56  ;;  %8829 = vmatpush3.bf16.msra.mxu0 %v9143_v54 }
  0x68   : > { %8853 = vmatpush3.bf16.msra.mxu1 %v9144_v56 }
  0x6c   : > { %8763 = vmatmul.mubr.msk.bf16.gmra.mxu0 %vm12611_vm0, %v9119_v58 }
  0x6d   : > { %8803 = vmatmul.mubr.msk.bf16.gmra.mxu1 %vm12611_vm0, %v9120_v59  ;;  %8766 = vmatprep.mubr.msk.bf16.mxu0 %vm12611_vm0, %v9121_v60 }
  0x6e   : > { %8806 = vmatprep.mubr.msk.bf16.mxu1 %vm12611_vm0, %v9122_v61 }
  0x74   : > { %8767 = vmatmul.mubr.msk.bf16.gmra.mxu0 %vm12611_vm0, %v9123_v62 }
  0x75   : > { %8807 = vmatmul.mubr.msk.bf16.gmra.mxu1 %vm12611_vm0, %v9124_v63  ;;  %8770 = vmatprep.mubr.msk.bf16.mxu0 %vm12611_vm0, %v9125_v0 }
  0x76   : > { %8810 = vmatprep.mubr.msk.bf16.mxu1 %vm12611_vm0, %v9126_v1 }
  0x7c   : > { %8771 = vmatmul.mubr.msk.bf16.gmra.mxu0 %vm12611_vm0, %v9127_v2 }
  0x7d   : > { %8811 = vmatmul.mubr.msk.bf16.gmra.mxu1 %vm12611_vm0, %v9128_v3  ;;  %8774 = vmatprep.mubr.msk.bf16.mxu0 %vm12611_vm0, %v9129_v4 }
  0x7e   : > { %8814 = vmatprep.mubr.msk.bf16.mxu1 %vm12611_vm0, %v9130_v5 }
  0x84   : > { %8775 = vmatmul.mubr.msk.bf16.gmra.mxu0 %vm12611_vm0, %v9131_v6  ;;  %v12603_v6 = vlaneseq }
  0x85   : > { %8815 = vmatmul.mubr.msk.bf16.gmra.mxu1 %vm12611_vm0, %v9132_v7  ;;  %8778 = vmatprep.mubr.msk.bf16.mxu0 %vm12611_vm0, %v9133_v8 }
  0x86   : > { %8818 = vmatprep.mubr.msk.bf16.mxu1 %vm12611_vm0, %v9134_v9 }
  0x8c   : > { %8779 = vmatmul.mubr.msk.bf16.gmra.mxu0 %vm12611_vm0, %v9135_v10 }
  0x8d   : > { %8819 = vmatmul.mubr.msk.bf16.gmra.mxu1 %vm12611_vm0, %v9136_v11  ;;  %8782 = vmatprep.mubr.msk.bf16.mxu0 %vm12611_vm0, %v9137_v12  ;;  %v10064_v11 = vshrl.u32 %v12603_v6, 7 }
  0x8e   : > { %8822 = vmatprep.mubr.msk.bf16.mxu1 %vm12611_vm0, %v9138_v13 }
  0x8f   : > { %v10075_v52 = vadd.s32 16, %v10064_v11  ;;  %v10078_v53 = vadd.s32 8, %v10064_v11  ;;  %v10081_v54 = vadd.s32 24, %v10064_v11  ;;  %v10086_v6 = vadd.s32 32, %v10064_v11 }
  0x91   : > { %12638 = vst [vmem:[#allocation23_spill] sm:$0xff] %v10075_v52  ;;  %12639 = vst [vmem:[#allocation24_spill] sm:$0xff] %v10081_v54 }
  0x94   : > { %8783 = vmatmul.mubr.msk.bf16.gmra.mxu0 %vm12611_vm0, %v9139_v14 }
  0x95   : > { %8823 = vmatmul.mubr.msk.bf16.gmra.mxu1 %vm12611_vm0, %v9140_v15 }
  0xdc   : > { %v9943_v16 = vpop.f32.mrf.mxu0 }
  0xdd   : > { %v9945_v17 = vpop.f32.mrf.mxu1 }
  0xde   : > { %v9947_v18 = vpop.f32.mrf.mxu0 }
  0xdf   : > { %v9949_v19 = vpop.f32.mrf.mxu1 }
  0xe0   : > { %v9951_v20 = vpop.f32.mrf.mxu0 }
  0xe1   : > { %v9953_v21 = vpop.f32.mrf.mxu1 }
  0xe2   : > { %v9955_v22 = vpop.f32.mrf.mxu0 }
  0xe3   : > { %v9957_v23 = vpop.f32.mrf.mxu1 }
  0xe4   : > { %v9959_v24 = vpop.f32.mrf.mxu0 }
  0xe5   : > { %v9961_v25 = vpop.f32.mrf.mxu1 }
  0xe6   : > { %v9963_v26 = vpop.f32.mrf.mxu0 }
  0xe7   : > { %v9965_v27 = vpop.f32.mrf.mxu1 }
  0xe8   : > { %v9967_v28 = vpop.f32.mrf.mxu0 }
  0xe9   : > { %v9969_v29 = vpop.f32.mrf.mxu1 }
  0xea   : > { %v9971_v30 = vpop.f32.mrf.mxu0 }
  0xeb   : > { %v9973_v31 = vpop.f32.mrf.mxu1 }
  0xec   : > { %v9975_v32 = vpop.f32.mrf.mxu0 }
  0xed   : > { %v9977_v33 = vpop.f32.mrf.mxu1 }
  0xee   : > { %v9979_v34 = vpop.f32.mrf.mxu0 }
  0xef   : > { %v9981_v35 = vpop.f32.mrf.mxu1 }
  0xf0   : > { %v9983_v36 = vpop.f32.mrf.mxu0 }
  0xf1   : > { %v9985_v37 = vpop.f32.mrf.mxu1 }
  0xf2   : > { %v9987_v38 = vpop.f32.mrf.mxu0 }
  0xf3   : > { %v9989_v39 = vpop.f32.mrf.mxu1 }
  0xf4   : > { %v9991_v40 = vpop.f32.mrf.mxu0 }
  0xf5   : > { %v9993_v41 = vpop.f32.mrf.mxu1 }
  0xf6   : > { %v9995_v42 = vpop.f32.mrf.mxu0 }
  0xf7   : > { %v9997_v43 = vpop.f32.mrf.mxu1 }
  0xf8   : > { %v9999_v44 = vpop.f32.mrf.mxu0 }
  0xf9   : > { %v10001_v45 = vpop.f32.mrf.mxu1 }
  0xfa   : > { %v10003_v46 = vpop.f32.mrf.mxu0 }
  0xfb   : > { %v10005_v47 = vpop.f32.mrf.mxu1 }
  0xfc   : > { %v10007_v48 = vpop.f32.mrf.mxu0 }
  0xfd   : > { %v10009_v49 = vpop.f32.mrf.mxu1 }
  0xfe   : > { %v10011_v50 = vpop.f32.mrf.mxu0 }
  0xff   : > { %v10013_v51 = vpop.f32.mrf.mxu1 }
 0x100   : > { %v10024_v55 = vpop.f32.mrf.mxu0 }
 0x101   : > { %v10029_v57 = vpop.f32.mrf.mxu1 }
 0x102   : > { %v10031_v58 = vpop.f32.mrf.mxu0 }
 0x103   : > { %v10033_v59 = vpop.f32.mrf.mxu1 }
 0x104   : > { %v10035_v60 = vpop.f32.mrf.mxu0 }
 0x105   : > { %v10037_v61 = vpop.f32.mrf.mxu1 }
 0x106   : > { %v10039_v62 = vpop.f32.mrf.mxu0 }
 0x107   : > { %v10041_v63 = vpop.f32.mrf.mxu1 }
 0x108   : > { %v10043_v0 = vpop.f32.mrf.mxu0 }
 0x109   : > { %v10045_v1 = vpop.f32.mrf.mxu1 }
 0x10a   : > { %v10047_v2 = vpop.f32.mrf.mxu0 }
 0x10b   : > { %v10049_v3 = vpop.f32.mrf.mxu1 }
 0x10c   : > { %12627 = vst [vmem:[#allocation12_spill] sm:$0xff] %v10049_v3  ;;  %v10051_v4 = vpop.f32.mrf.mxu0 }
 0x10d   : > { %12628 = vst [vmem:[#allocation13_spill] sm:$0xff] %v10051_v4  ;;  %v10053_v5 = vpop.f32.mrf.mxu1  ;;  %v10108_v4 = vadd.s32 56, %v10064_v11 }
 0x10e   : > { %12629 = vst [vmem:[#allocation14_spill] sm:$0xff] %v10053_v5  ;;  %v10055_v7 = vpop.f32.mrf.mxu0  ;;  %v999_v5 = vadd.f32 %v9953_v21, %v9951_v20  ;;  %v1004_v20 = vadd.f32 %v9965_v27, %v9963_v26  ;;  %v10141_v21 = vadd.f32 %v9969_v29, %v9967_v28  ;;  %v10155_v26 = vld [vmem:[%s12598_s7] ss:$0 sm:$0xff]  ;;  %v10158_v28 = vadd.s32 112, %v10064_v11 }
 0x10f   : > { %12630 = vst [vmem:[#allocation15_spill] sm:$0xff] %v10055_v7  ;;  %v10057_v8 = vpop.f32.mrf.mxu1  ;;  %12645 = vst [vmem:[#allocation30_spill] sm:$0xff] %v10108_v4  ;;  %v991_v7 = vadd.f32 %v9957_v23, %v9955_v22  ;;  %v10161_v29 = vadd.s32 88, %v10064_v11 }
 0x110   : > { %12631 = vst [vmem:[#allocation16_spill] sm:$0xff] %v10057_v8  ;;  %v10059_v9 = vpop.f32.mrf.mxu0 }
 0x111   : > { %12632 = vst [vmem:[#allocation17_spill] sm:$0xff] %v10059_v9  ;;  %v10061_v10 = vpop.f32.mrf.mxu1  ;;  %v10100_v9 = vadd.s32 64, %v10064_v11 }
 0x112   : > { %12633 = vst [vmem:[#allocation18_spill] sm:$0xff] %v10061_v10  ;;  %v10066_v12 = vpop.f32.mrf.mxu0 }
 0x113   : > { %12634 = vst [vmem:[#allocation19_spill] sm:$0xff] %v10066_v12  ;;  %v10068_v13 = vpop.f32.mrf.mxu1  ;;  %12643 = vst [vmem:[#allocation28_spill] sm:$0xff] %v10100_v9  ;;  %v10175_v9 = vadd.s32 104, %v10064_v11 }
 0x114   : > { %12635 = vst [vmem:[#allocation20_spill] sm:$0xff] %v10068_v13  ;;  %v10070_v14 = vpop.f32.mrf.mxu0  ;;  %v10089_v13 = vadd.s32 48, %v10064_v11 }
 0x115   : > { %12636 = vst [vmem:[#allocation21_spill] sm:$0xff] %v10070_v14  ;;  %v10072_v15 = vpop.f32.mrf.mxu1  ;;  %v10092_v14 = vadd.s32 40, %v10064_v11 }
 0x116   : > { %12637 = vst [vmem:[#allocation22_spill] sm:$0xff] %v10072_v15  ;;  %v10083_v56 = vpop.f32.mrf.mxu0 }
 0x117   : > { %12640 = vst [vmem:[#allocation25_spill] sm:$0xff] %v10083_v56  ;;  %v10094_v15 = vpop.f32.mrf.mxu1  ;;  %v988_v56 = vadd.f32 %v9949_v19, %v9947_v18  ;;  %v10132_v18 = vadd.s32 80, %v10064_v11  ;;  %v10135_v19 = vadd.s32 96, %v10064_v11 }
 0x118   : > { %12641 = vst [vmem:[#allocation26_spill] sm:$0xff] %v10094_v15  ;;  %v10096_v12 = vpop.f32.mrf.mxu0  ;;  %v996_v15 = vadd.f32 %v9945_v17, %v9943_v16  ;;  %v10126_v16 = vadd.s32 72, %v10064_v11  ;;  %v1012_v17 = vadd.f32 %v9961_v25, %v9959_v24  ;;  %v10146_v25 = vadd.f32 %v9973_v31, %v9971_v30 }
 0x119   : > { %12642 = vst [vmem:[#allocation27_spill] sm:$0xff] %v10096_v12  ;;  %v10102_v8 = vpop.f32.mrf.mxu1  ;;  %v10165_v30 = vadd.f32 %v9981_v35, %v9979_v34  ;;  %v12613_v4 = vand.u32 7, %v10135_v19  ;;  %v10179_v34 = vadd.f32 %v9989_v39, %v9987_v38 }
 0x11a   : > { %12644 = vst [vmem:[#allocation29_spill] sm:$0xff] %v10102_v8  ;;  %v10112_v12 = vpop.f32.mrf.mxu0  ;;  %v10150_v8 = vadd.f32 %v9977_v33, %v9975_v32 }
 0x11b   : > { %v10123_v54 = vpop.f32.mrf.mxu1 }
 0x11c   : > { %v8756_v3 = vpop.f32.mrf.mxu0 }
 0x11d   : > { %v1470_v22 = vadd.f32 %v8756_v3, %v996_v15  ;;  %v8796_v23 = vpop.f32.mrf.mxu1  ;;  %v10170_v15 = vadd.f32 %v9985_v37, %v9983_v36  ;;  %v10184_v36 = vadd.f32 %v9993_v41, %v9991_v40  ;;  %v10188_v37 = vadd.f32 %v9997_v43, %v9995_v42 }
 0x11e   : > { %v1341_v27 = vpop.f32.mrf.mxu0  ;;  %v10199_v43 = vadd.s32 120, %v10064_v11 }
 0x11f   : > { %v1856_v31 = vadd.f32 %v8796_v23, %v1470_v22  ;;  %v1468_v3 = vadd.f32 %v1341_v27, %v988_v56  ;;  %v1727_v32 = vpop.f32.mrf.mxu1 }
 0x120   : > { %v8757_v24 = vpop.f32.mrf.mxu0 }
 0x121   : > { %v1895_v35 = vadd.f32 %v10155_v26, %v1856_v31  ;;  %v1854_v56 = vadd.f32 %v1727_v32, %v1468_v3  ;;  %v1471_v22 = vadd.f32 %v8757_v24, %v999_v5  ;;  %v8797_v23 = vpop.f32.mrf.mxu1  ;;  %v10195_v24 = vadd.f32 %v10001_v45, %v9999_v44 }
 0x122   : > { %v1344_v27 = vpop.f32.mrf.mxu0  ;;  %v10208_v44 = vadd.f32 %v10009_v49, %v10007_v48 }
 0x123   : > { %vm1927_vm2 = vcmp.gt.f32.partialorder %v1895_v35, 0.0  ;;  %v1959_v38 = vmul.f32 0.2, %v1895_v35  ;;  %v1893_v39 = vadd.f32 %v10155_v26, %v1854_v56  ;;  %v1857_v31 = vadd.f32 %v8797_v23, %v1471_v22  ;;  %v1730_v5 = vpop.f32.mrf.mxu1 }
 0x124   : > { %v1469_v40 = vadd.f32 %v1344_v27, %v991_v7  ;;  %v8760_v41 = vpop.f32.mrf.mxu0  ;;  %v10204_v56 = vadd.f32 %v10005_v47, %v10003_v46 }
 0x125   : > { %v1991_v3 = vsel %vm1927_vm2, %v1895_v35, %v1959_v38  ;;  %vm1925_vm3 = vcmp.gt.f32.partialorder %v1893_v39, 0.0  ;;  %v1957_v32 = vmul.f32 0.2, %v1893_v39  ;;  %v1896_v33 = vadd.f32 %v10155_v26, %v1857_v31  ;;  %v8800_v10 = vpop.f32.mrf.mxu1 }
 0x126   : > { %2024 = vst.msk [vmem:[#allocation2 + $0x10] sm:$0xff] %vm12614_vm1, %v1991_v3  ;;  %v1855_v45 = vadd.f32 %v1730_v5, %v1469_v40  ;;  %v1474_v7 = vadd.f32 %v8760_v41, %v1012_v17  ;;  %v1357_v22 = vpop.f32.mrf.mxu0  ;;  %v10213_v31 = vadd.f32 %v10013_v51, %v10011_v50  ;;  %v10220_v17 = vadd.f32 %v10029_v57, %v10024_v55 }
 0x127   : > { %v1989_v23 = vsel %vm1925_vm3, %v1893_v39, %v1957_v32  ;;  %vm1928_vm4 = vcmp.gt.f32.partialorder %v1896_v33, 0.0  ;;  %v1960_v35 = vmul.f32 0.2, %v1896_v33  ;;  %v1472_v27 = vadd.f32 %v1357_v22, %v1004_v20  ;;  %v1743_v38 = vpop.f32.mrf.mxu1 }
 0x128   : > { %2022 = vst.msk [vmem:[#allocation2] sm:$0xff] %vm12614_vm1, %v1989_v23  ;;  %v1894_v46 = vadd.f32 %v10155_v26, %v1855_v45  ;;  %v1860_v47 = vadd.f32 %v8800_v10, %v1474_v7  ;;  %v8761_v48 = vpop.f32.mrf.mxu0  ;;  %v10225_v50 = vadd.f32 %v10033_v59, %v10031_v58  ;;  %v10231_v55 = vadd.f32 %v10037_v61, %v10035_v60  ;;  %v12646_v23 = vld [vmem:[#allocation12_spill] sm:$0xff] }
 0x129   : > { %v1992_v39 = vsel %vm1928_vm4, %v1896_v33, %v1960_v35  ;;  %v1858_v5 = vadd.f32 %v1743_v38, %v1472_v27  ;;  %v1475_v20 = vadd.f32 %v8761_v48, %v10141_v21  ;;  %v8801_v40 = vpop.f32.mrf.mxu1  ;;  %v10237_v58 = vadd.f32 %v10041_v63, %v10039_v62 }
 0x12a   : > { %2025 = vst.msk [vmem:[#allocation2 + $0x18] sm:$0xff] %vm12614_vm1, %v1992_v39  ;;  %vm1926_vm5 = vcmp.gt.f32.partialorder %v1894_v46, 0.0  ;;  %v1958_v51 = vmul.f32 0.2, %v1894_v46  ;;  %v1899_v10 = vadd.f32 %v10155_v26, %v1860_v47  ;;  %v1360_v41 = vpop.f32.mrf.mxu0  ;;  %v10247_v62 = vadd.f32 %v12646_v23, %v10047_v2  ;;  %v12647_v39 = vld [vmem:[#allocation13_spill] sm:$0xff]  ;;  %v12650_v2 = vld [vmem:[#allocation16_spill] sm:$0xff] }
 0x12b   : > { %v1897_v57 = vadd.f32 %v10155_v26, %v1858_v5  ;;  %v1861_v33 = vadd.f32 %v8801_v40, %v1475_v20  ;;  %v1473_v21 = vadd.f32 %v1360_v41, %v10146_v25  ;;  %v1746_v3 = vpop.f32.mrf.mxu1  ;;  %v10243_v25 = vadd.f32 %v10045_v1, %v10043_v0  ;;  %v12648_v0 = vld [vmem:[#allocation14_spill] sm:$0xff]  ;;  %v12649_v5 = vld [vmem:[#allocation15_spill] sm:$0xff] }
 0x12c   : > { %v1990_v59 = vsel %vm1926_vm5, %v1894_v46, %v1958_v51  ;;  %vm1931_vm6 = vcmp.gt.f32.partialorder %v1899_v10, 0.0  ;;  %v1963_v32 = vmul.f32 0.2, %v1899_v10  ;;  %v8764_v45 = vpop.f32.mrf.mxu0  ;;  %v10254_v1 = vadd.f32 %v12648_v0, %v12647_v39  ;;  %v12656_v23 = vld [vmem:[#allocation22_spill] sm:$0xff]  ;;  %v9146_v39 = vld [vmem:[%s12594_s3 + $0x28] sm:$0xff]   ;;  %v12657_v0 = vld [vmem:[#allocation25_spill] sm:$0xff] }
 0x12d   : > { %2023 = vst.msk [vmem:[#allocation2 + $0x8] sm:$0xff] %vm12614_vm1, %v1990_v59  ;;  %vm1929_vm7 = vcmp.gt.f32.partialorder %v1897_v57, 0.0  ;;  %v1961_v7 = vmul.f32 0.2, %v1897_v57  ;;  %v1900_v60 = vadd.f32 %v10155_v26, %v1861_v33  ;;  %v1859_v61 = vadd.f32 %v1746_v3, %v1473_v21  ;;  %v8804_v22 = vpop.f32.mrf.mxu1  ;;  %v9145_v21 = vld [vmem:[%s12594_s3 + $0x68] sm:$0xff]   ;;  %v12651_v3 = vld [vmem:[#allocation17_spill] sm:$0xff]  ;;  %8854 = vmatprep.subr.bf16.mxu1 %v9146_v39 }
 0x12e   : > { %v1995_v63 = vsel %vm1931_vm6, %v1899_v10, %v1963_v32  ;;  %v1478_v35 = vadd.f32 %v8764_v45, %v10150_v8  ;;  %v1373_v27 = vpop.f32.mrf.mxu0  ;;  %v10258_v20 = vadd.f32 %v12650_v2, %v12649_v5  ;;  %v12652_v59 = vld [vmem:[#allocation18_spill] sm:$0xff]  ;;  %v12653_v45 = vld [vmem:[#allocation19_spill] sm:$0xff]  ;;  %8830 = vmatprep.subr.bf16.mxu0 %v9145_v21  ;;  %8855 = vmatpush3.bf16.msra.mxu1 %v9146_v39 }
 0x12f   : > { %2028 = vst.msk [vmem:[#allocation2 + $0x30] sm:$0xff] %vm12614_vm1, %v1995_v63  ;;  %v1993_v38 = vsel %vm1929_vm7, %v1897_v57, %v1961_v7  ;;  %vm1932_vm8 = vcmp.gt.f32.partialorder %v1900_v60, 0.0  ;;  %v1964_v46 = vmul.f32 0.2, %v1900_v60  ;;  %v1898_v47 = vadd.f32 %v10155_v26, %v1859_v61  ;;  %v1759_v48 = vpop.f32.mrf.mxu1  ;;  %v12654_v7 = vld [vmem:[#allocation20_spill] sm:$0xff]  ;;  %v12658_v5 = vld [vmem:[#allocation26_spill] sm:$0xff]  ;;  %8831 = vmatpush3.bf16.msra.mxu0 %v9145_v21 }
 0x130   : > { %2026 = vst.msk [vmem:[#allocation2 + $0x20] sm:$0xff] %vm12614_vm1, %v1993_v38  ;;  %v1864_v8 = vadd.f32 %v8804_v22, %v1478_v35  ;;  %v1476_v40 = vadd.f32 %v1373_v27, %v10165_v30  ;;  %v8765_v51 = vpop.f32.mrf.mxu0  ;;  %v10268_v32 = vadd.f32 %v12652_v59, %v12651_v3  ;;  %v10272_v61 = vadd.f32 %v12654_v7, %v12653_v45 }
 0x131   : > { %v1996_v10 = vsel %vm1932_vm8, %v1900_v60, %v1964_v46  ;;  %vm1930_vm10 = vcmp.gt.f32.partialorder %v1898_v47, 0.0  ;;  %v1962_v41 = vmul.f32 0.2, %v1898_v47  ;;  %v1479_v57 = vadd.f32 %v8765_v51, %v10170_v15  ;;  %v8805_v33 = vpop.f32.mrf.mxu1  ;;  %v12655_v15 = vld [vmem:[#allocation21_spill] sm:$0xff] }
 0x132   : > { %2029 = vst.msk [vmem:[#allocation2 + $0x38] sm:$0xff] %vm12614_vm1, %v1996_v10  ;;  %v1903_v30 = vadd.f32 %v10155_v26, %v1864_v8  ;;  %v1862_v60 = vadd.f32 %v1759_v48, %v1476_v40  ;;  %v1376_v22 = vpop.f32.mrf.mxu0  ;;  %v10278_v63 = vadd.f32 %v12656_v23, %v12655_v15  ;;  %v10286_v2 = vadd.f32 %v12658_v5, %v12657_v0  ;;  %v12660_v51 = vld [vmem:[#allocation29_spill] sm:$0xff] }
 0x133   : > { %v1994_v35 = vsel %vm1930_vm10, %v1898_v47, %v1962_v41  ;;  %v1865_v27 = vadd.f32 %v8805_v33, %v1479_v57  ;;  %v1477_v38 = vadd.f32 %v1376_v22, %v10179_v34  ;;  %v1762_v46 = vpop.f32.mrf.mxu1  ;;  %v12659_v34 = vld [vmem:[#allocation27_spill] sm:$0xff]  ;;  %v10298_v59 = vld [vmem:[#allocation2 + $0x10] ss:$2 sm:$0xff] }
 0x134   : > { %2027 = vst.msk [vmem:[#allocation2 + $0x28] sm:$0xff] %vm12614_vm1, %v1994_v35  ;;  %vm1935_vm11 = vcmp.gt.f32.partialorder %v1903_v30, 0.0  ;;  %v1967_v48 = vmul.f32 0.2, %v1903_v30  ;;  %v1901_v8 = vadd.f32 %v10155_v26, %v1862_v60  ;;  %v8768_v47 = vpop.f32.mrf.mxu0  ;;  %v10290_v40 = vld [vmem:[#allocation2] ss:$2 sm:$0xff]  ;;  %v10294_v10 = vadd.f32 %v12660_v51, %v12659_v34 }
 0x135   : > { %v1904_v41 = vadd.f32 %v10155_v26, %v1865_v27  ;;  %v1863_v57 = vadd.f32 %v1762_v46, %v1477_v38  ;;  %v1482_v33 = vadd.f32 %v8768_v47, %v10184_v36  ;;  %v8808_v3 = vpop.f32.mrf.mxu1  ;;  %v2472_v22 = vrot.slane %v10290_v40, 1  ;;  %v10315_v5 = vld [vmem:[#allocation2 + $0x1] ss:$2 sm:$0xff] }
 0x136   : > { %v1999_v45 = vsel %vm1935_vm11, %v1903_v30, %v1967_v48  ;;  %vm1933_vm12 = vcmp.gt.f32.partialorder %v1901_v8, 0.0  ;;  %v1965_v7 = vmul.f32 0.2, %v1901_v8  ;;  %v1389_v60 = vpop.f32.mrf.mxu0  ;;  %v12661_v36 = vand.u32 7, %v10064_v11 }
 0x137   : > { %2032 = vst.msk [vmem:[#allocation2 + $0x50] sm:$0xff] %vm12614_vm1, %v1999_v45  ;;  %vm1936_vm13 = vcmp.gt.f32.partialorder %v1904_v41, 0.0  ;;  %v1968_v21 = vmul.f32 0.2, %v1904_v41  ;;  %v1902_v15 = vadd.f32 %v10155_v26, %v1863_v57  ;;  %v1868_v23 = vadd.f32 %v8808_v3, %v1482_v33  ;;  %v1775_v35 = vpop.f32.mrf.mxu1 }
 0x138   : > { %vm10305_vm14 = vcmp.eq.s32.totalorder %v12661_v36, 7  ;;  %v10311_v30 = vadd.f32 %v10123_v54, %v10112_v12  ;;  %v1997_v38 = vsel %vm1933_vm12, %v1901_v8, %v1965_v7  ;;  %v1480_v46 = vadd.f32 %v1389_v60, %v10188_v37  ;;  %v8769_v39 = vpop.f32.mrf.mxu0  ;;  %v9147_v37 = vld [vmem:[%s12594_s3 + $0x60] sm:$0xff]  }
 0x139   : > { %v2473_v0 = vrot.slane %v10298_v59, 1  ;;  %2030 = vst.msk [vmem:[#allocation2 + $0x40] sm:$0xff] %vm12614_vm1, %v1997_v38  ;;  %v2000_v48 = vsel %vm1936_vm13, %v1904_v41, %v1968_v21  ;;  %vm1934_vm15 = vcmp.gt.f32.partialorder %v1902_v15, 0.0  ;;  %v1966_v47 = vmul.f32 0.2, %v1902_v15  ;;  %v8809_v51 = vpop.f32.mrf.mxu1  ;;  %v9148_v60 = vld [vmem:[%s12594_s3 + $0x20] sm:$0xff]   ;;  %8832 = vmatprep.subr.bf16.mxu0 %v9147_v37 }
 0x13a   : > { %v1907_v34 = vadd.f32 %v10155_v26, %v1868_v23  ;;  %v10319_v57 = vld [vmem:[#allocation2 + $0x30] ss:$2 sm:$0xff]  ;;  %v12664_v12 = vand.u32 7, %v10075_v52  ;;  %2033 = vst.msk [vmem:[#allocation2 + $0x58] sm:$0xff] %vm12614_vm1, %v2000_v48  ;;  %v1866_v8 = vadd.f32 %v1775_v35, %v1480_v46  ;;  %v1483_v41 = vadd.f32 %v8769_v39, %v10195_v24  ;;  %v1392_v33 = vpop.f32.mrf.mxu0  ;;  %v10334_v45 = vld [vmem:[#allocation2 + $0x31] ss:$2 sm:$0xff]  ;;  %8833 = vmatpush3.bf16.msra.mxu0 %v9147_v37 }
 0x13b   : > { %v8936_v3 = vpack.i.bf16 %v10319_v57, %v10298_v59  ;;  %v10339_v7 = vsel %vm12615_vm9, %v2472_v22, %v2473_v0  ;;  %v1998_v21 = vsel %vm1934_vm15, %v1902_v15, %v1966_v47  ;;  %v1481_v24 = vadd.f32 %v1392_v33, %v10204_v56  ;;  %v1778_v35 = vpop.f32.mrf.mxu1  ;;  %v10345_v36 = vld [vmem:[#allocation2 + $0x20] ss:$2 sm:$0xff]  ;;  %v10362_v33 = vld [vmem:[#allocation2 + $0x11] ss:$2 sm:$0xff]  ;;  %8856 = vmatprep.subr.bf16.mxu1 %v9148_v60 }
 0x13c   : > { %vm10323_vm2 = vcmp.eq.s32.totalorder %v12664_v12, 7  ;;  %vm1939_vm3 = vcmp.gt.f32.partialorder %v1907_v34, 0.0  ;;  %v1971_v23 = vmul.f32 0.2, %v1907_v34  ;;  %2031 = vst.msk [vmem:[#allocation2 + $0x48] sm:$0xff] %vm12614_vm1, %v1998_v21  ;;  %v1905_v38 = vadd.f32 %v10155_v26, %v1866_v8  ;;  %v8772_v22 = vpop.f32.mrf.mxu0  ;;  %8857 = vmatpush3.bf16.msra.mxu1 %v9148_v60 }
 0x13d   : > { %v1869_v46 = vadd.f32 %v8809_v51, %v1483_v41  ;;  %8937 = vrot.lane.b32.xlu1 %v8936_v3, %s9681_s22  ;;  %v8946_v15 = vpack.i.bf16 %v10345_v36, %v10290_v40  ;;  %v2151_v39 = vrot.slane %v10315_v5, 7  ;;  %v12667_v56 = vand.u32 7, %v10078_v53  ;;  %v8812_v8 = vpop.f32.mrf.mxu1  ;;  %v10364_v40 = vld [vmem:[#allocation2 + $0x21] ss:$2 sm:$0xff] }
 0x13e   : > { %v2003_v47 = vsel %vm1939_vm3, %v1907_v34, %v1971_v23  ;;  %v1867_v12 = vadd.f32 %v1778_v35, %v1481_v24  ;;  %v1486_v51 = vadd.f32 %v8772_v22, %v10208_v44  ;;  %v2475_v41 = vrot.slane %v10345_v36, 1  ;;  %v1405_v37 = vpop.f32.mrf.mxu0  ;;  %v12670_v34 = vld [vmem:[#allocation24_spill] sm:$0xff] }
 0x13f   : > { %vm10355_vm4 = vcmp.eq.s32.totalorder %v12667_v56, 7  ;;  %2036 = vst.msk [vmem:[#allocation2 + $0x70] sm:$0xff] %vm12614_vm1, %v2003_v47  ;;  %vm1937_vm5 = vcmp.gt.f32.partialorder %v1905_v38, 0.0  ;;  %v1969_v3 = vmul.f32 0.2, %v1905_v38  ;;  %v1908_v21 = vadd.f32 %v10155_v26, %v1869_v46  ;;  %8947 = vrot.lane.b32.xlu0 %v8946_v15, %s9681_s22  ;;  %v1791_v56 = vpop.f32.mrf.mxu1 }
 0x140   : > { %v8941_v44 = vpack.i.bf16 %v10334_v45, %v10362_v33  ;;  %v12671_v23 = vand.u32 7, %v12670_v34  ;;  %v1906_v35 = vadd.f32 %v10155_v26, %v1867_v12  ;;  %v2477_v36 = vrot.slane %v10319_v57, 1  ;;  %v8773_v49 = vpop.f32.mrf.mxu0 }
 0x141   : > { %v1872_v22 = vadd.f32 %v8812_v8, %v1486_v51  ;;  %v1484_v46 = vadd.f32 %v1405_v37, %v10213_v31  ;;  %v2001_v47 = vsel %vm1937_vm5, %v1905_v38, %v1969_v3  ;;  %vm1940_vm7 = vcmp.gt.f32.partialorder %v1908_v21, 0.0  ;;  %v8813_v8 = vpop.f32.mrf.mxu1 }
 0x142   : > { %vm10373_vm6 = vcmp.eq.s32.totalorder %v12671_v23, 7  ;;  %v1972_v15 = vmul.f32 0.2, %v1908_v21  ;;  %8942 = vrot.lane.b32.xlu1 %v8941_v44, %s9682_s26  ;;  %v8951_v23 = vpack.i.bf16 %v10364_v40, %v10315_v5  ;;  %2034 = vst.msk [vmem:[#allocation2 + $0x60] sm:$0xff] %vm12614_vm1, %v2001_v47  ;;  %vm1938_vm8 = vcmp.gt.f32.partialorder %v1906_v35, 0.0  ;;  %v1408_v3 = vpop.f32.mrf.mxu0 }
 0x143   : > { %v1970_v60 = vmul.f32 0.2, %v1906_v35  ;;  %v1911_v12 = vadd.f32 %v10155_v26, %v1872_v22  ;;  %v1870_v51 = vadd.f32 %v1791_v56, %v1484_v46  ;;  %v1487_v38 = vadd.f32 %v8773_v49, %v10220_v17  ;;  %v1794_v46 = vpop.f32.mrf.mxu1 }
 0x144   : > { %v2004_v31 = vsel %vm1940_vm7, %v1908_v21, %v1972_v15  ;;  %v2478_v37 = vsel %vm12615_vm9, %v2475_v41, %v2477_v36  ;;  %v2568_v44 = vsel %vm10305_vm14, 0.0, %v10339_v7  ;;  %vm12612_vm11 = vcmask 1040384   ;;  %v10394_v21 = vld [vmem:[#allocation2 + $0x40] ss:$2 sm:$0xff]  ;;  %v8776_v56 = vpop.f32.mrf.mxu0 }
 0x145   : > { %2037 = vst.msk [vmem:[#allocation2 + $0x78] sm:$0xff] %vm12614_vm1, %v2004_v31  ;;  %v2002_v47 = vsel %vm1938_vm8, %v1906_v35, %v1970_v60  ;;  %vm1943_vm10 = vcmp.gt.f32.partialorder %v1911_v12, 0.0  ;;  %v1975_v42 = vmul.f32 0.2, %v1911_v12  ;;  %v1909_v22 = vadd.f32 %v10155_v26, %v1870_v51  ;;  %v9149_v35 = vld [vmem:[%s12594_s3 + $0x58] sm:$0xff]  }
 0x146   : > { %2035 = vst.msk [vmem:[#allocation2 + $0x68] sm:$0xff] %vm12614_vm1, %v2002_v47  ;;  %v1873_v49 = vadd.f32 %v8813_v8, %v1487_v38  ;;  %v1485_v17 = vadd.f32 %v1408_v3, %v10225_v50  ;;  %8952 = vrot.lane.b32.xlu1 %v8951_v23, %s9682_s26  ;;  %v2570_v27 = vsel %vm10323_vm2, 0.0, %v2478_v37  ;;  %v2476_v7 = vsel %vm12615_vm9, %v2473_v0, %v2475_v41  ;;  %v8816_v50 = vpop.f32.mrf.mxu1  ;;  %v9150_v23 = vld [vmem:[%s12594_s3 + $0x18] sm:$0xff]   ;;  %v1421_v0 = vpop.f32.mrf.mxu0 }
 0x147   : > { %v2007_v15 = vsel %vm1943_vm10, %v1911_v12, %v1975_v42  ;;  %vm1941_vm12 = vcmp.gt.f32.partialorder %v1909_v22, 0.0  ;;  %v1973_v60 = vmul.f32 0.2, %v1909_v22  ;;  %v1490_v51 = vadd.f32 %v8776_v56, %v10231_v55  ;;  %8834 = vmatprep.subr.bf16.mxu0 %v9149_v35  ;;  %8858 = vmatprep.subr.bf16.mxu1 %v9150_v23 }
 0x148   : > { %2040 = vst.msk [vmem:[#allocation2 + $0x90] sm:$0xff] %vm12614_vm1, %v2007_v15  ;;  %v1912_v59 = vadd.f32 %v10155_v26, %v1873_v49  ;;  %v1871_v54 = vadd.f32 %v1794_v46, %v1485_v17  ;;  %v8956_v41 = vpack.i.bf16 %v2570_v27, %v2568_v44  ;;  %v2479_v8 = vrot.slane %v10394_v21, 1  ;;  %v1807_v55 = vpop.f32.mrf.mxu1  ;;  %8835 = vmatpush3.bf16.msra.mxu0 %v9149_v35  ;;  %v8777_v44 = vpop.f32.mrf.mxu0  ;;  %v9151_v17 = vld [vmem:[%s12594_s3 + $0x50] sm:$0xff]  }
 0x149   : > { %v2005_v42 = vsel %vm1941_vm12, %v1909_v22, %v1973_v60  ;;  %v1876_v12 = vadd.f32 %v8816_v50, %v1490_v51  ;;  %v1488_v31 = vadd.f32 %v1421_v0, %v10237_v58  ;;  %v2569_v38 = vsel %vm10355_vm4, 0.0, %v2476_v7  ;;  %8859 = vmatpush3.bf16.msra.mxu1 %v9150_v23  ;;  %8836 = vmatprep.subr.bf16.mxu0 %v9151_v17 }
 0x14a   : > { %2038 = vst.msk [vmem:[#allocation2 + $0x80] sm:$0xff] %vm12614_vm1, %v2005_v42  ;;  %vm1944_vm13 = vcmp.gt.f32.partialorder %v1912_v59, 0.0  ;;  %v1976_v3 = vmul.f32 0.2, %v1912_v59  ;;  %v1910_v37 = vadd.f32 %v10155_v26, %v1871_v54  ;;  %8957 = vrot.lane.b32.xlu1 %v8956_v41, %s9683_s12  ;;  %v2480_v58 = vsel %vm12615_vm9, %v2477_v36, %v2479_v8  ;;  %v8817_v46 = vpop.f32.mrf.mxu1  ;;  %v1424_v57 = vpop.f32.mrf.mxu0 }
 0x14b   : > { %v1915_v48 = vadd.f32 %v10155_v26, %v1876_v12  ;;  %v1874_v47 = vadd.f32 %v1807_v55, %v1488_v31  ;;  %v1491_v22 = vadd.f32 %v8777_v44, %v10243_v25  ;;  %v2571_v49 = vsel %vm10373_vm6, 0.0, %v2480_v58  ;;  %v10453_v12 = vld [vmem:[#allocation2 + $0x50] ss:$2 sm:$0xff] }
 0x14c   : > { %v2008_v56 = vsel %vm1944_vm13, %v1912_v59, %v1976_v3  ;;  %vm1942_vm14 = vcmp.gt.f32.partialorder %v1910_v37, 0.0  ;;  %v1974_v27 = vmul.f32 0.2, %v1910_v37  ;;  %v8961_v7 = vpack.i.bf16 %v2571_v49, %v2569_v38  ;;  %v1810_v15 = vpop.f32.mrf.mxu1  ;;  %v8780_v41 = vpop.f32.mrf.mxu0  ;;  %8837 = vmatpush3.bf16.msra.mxu0 %v9151_v17 }
 0x14d   : > { %2041 = vst.msk [vmem:[#allocation2 + $0x98] sm:$0xff] %vm12614_vm1, %v2008_v56  ;;  %vm1947_vm15 = vcmp.gt.f32.partialorder %v1915_v48, 0.0  ;;  %v1979_v36 = vmul.f32 0.2, %v1915_v48  ;;  %v1913_v35 = vadd.f32 %v10155_v26, %v1874_v47  ;;  %v1877_v25 = vadd.f32 %v8817_v46, %v1491_v22  ;;  %v10434_v60 = vld [vmem:[#allocation2 + $0x60] ss:$2 sm:$0xff] }
 0x14e   : > { %v12674_v24 = vand.u32 7, %v10086_v6  ;;  %v12677_v50 = vand.u32 7, %v10089_v13  ;;  %v2152_v59 = vrot.slane %v10362_v33, 7  ;;  %v2006_v54 = vsel %vm1942_vm14, %v1910_v37, %v1974_v27  ;;  %8962 = vrot.lane.b32.xlu0 %v8961_v7, %s9683_s12  ;;  %v8820_v3 = vpop.f32.mrf.mxu1  ;;  %v10458_v37 = vld [vmem:[#allocation2 + $0x61] ss:$2 sm:$0xff]  ;;  %v1437_v47 = vpop.f32.mrf.mxu0 }
 0x14f   : > { %v1489_v0 = vadd.f32 %v1424_v57, %v10247_v62  ;;  %v8966_v42 = vpack.i.bf16 %v10434_v60, %v10394_v21  ;;  %2039 = vst.msk [vmem:[#allocation2 + $0x88] sm:$0xff] %vm12614_vm1, %v2006_v54  ;;  %v2011_v31 = vsel %vm1947_vm15, %v1915_v48, %v1979_v36  ;;  %vm1945_vm4 = vcmp.gt.f32.partialorder %v1913_v35, 0.0  ;;  %v10468_v22 = vld [vmem:[#allocation2 + $0x70] ss:$2 sm:$0xff]  ;;  %v10471_v27 = vld [vmem:[#allocation2 + $0x41] ss:$2 sm:$0xff] }
 0x150   : > { %vm10438_vm2 = vcmp.eq.s32.totalorder %v12674_v24, 7  ;;  %vm10444_vm3 = vcmp.eq.s32.totalorder %v12677_v50, 7  ;;  %v1977_v55 = vmul.f32 0.2, %v1913_v35  ;;  %v1916_v38 = vadd.f32 %v10155_v26, %v1877_v25  ;;  %2044 = vst.msk [vmem:[#allocation2 + $0xb0] sm:$0xff] %vm12614_vm1, %v2011_v31  ;;  %v1823_v56 = vpop.f32.mrf.mxu1 }
 0x151   : > { %v10464_v62 = vsel %vm12612_vm11, 0.0, %v2151_v39  ;;  %v1875_v44 = vadd.f32 %v1810_v15, %v1489_v0  ;;  %v1494_v58 = vadd.f32 %v8780_v41, %v10254_v1  ;;  %v2483_v48 = vrot.slane %v10434_v60, 1  ;;  %v8781_v1 = vpop.f32.mrf.mxu0  ;;  %v9156_v60 = vld [vmem:[%s12594_s3 + $0x8] sm:$0xff]  }
 0x152   : > { %v2009_v46 = vsel %vm1945_vm4, %v1913_v35, %v1977_v55  ;;  %vm1948_vm5 = vcmp.gt.f32.partialorder %v1916_v38, 0.0  ;;  %v1980_v49 = vmul.f32 0.2, %v1916_v38  ;;  %v1492_v17 = vadd.f32 %v1437_v47, %v10258_v20  ;;  %8967 = vrot.lane.b32.xlu0 %v8966_v42, %s9681_s22  ;;  %v8821_v24 = vpop.f32.mrf.mxu1 }
 0x153   : > { %2042 = vst.msk [vmem:[#allocation2 + $0xa0] sm:$0xff] %vm12614_vm1, %v2009_v46  ;;  %v1914_v57 = vadd.f32 %v10155_v26, %v1875_v44  ;;  %v1880_v7 = vadd.f32 %v8820_v3, %v1494_v58  ;;  %v8971_v36 = vpack.i.bf16 %v10458_v37, %v10471_v27  ;;  %v2481_v35 = vrot.slane %v10453_v12, 1  ;;  %v1440_v41 = vpop.f32.mrf.mxu0 }
 0x154   : > { %v2012_v25 = vsel %vm1948_vm5, %v1916_v38, %v1980_v49  ;;  %v1878_v15 = vadd.f32 %v1823_v56, %v1492_v17  ;;  %v1495_v20 = vadd.f32 %v8781_v1, %v10268_v32  ;;  %v2485_v50 = vrot.slane %v10468_v22, 1  ;;  %v9153_v32 = vld [vmem:[%s12594_s3 + $0x10] sm:$0xff]   ;;  %v1826_v3 = vpop.f32.mrf.mxu1 }
 0x155   : > { %2045 = vst.msk [vmem:[#allocation2 + $0xb8] sm:$0xff] %vm12614_vm1, %v2012_v25  ;;  %vm1946_vm6 = vcmp.gt.f32.partialorder %v1914_v57, 0.0  ;;  %v1978_v54 = vmul.f32 0.2, %v1914_v57  ;;  %v1919_v0 = vadd.f32 %v10155_v26, %v1880_v7  ;;  %v2482_v42 = vsel %vm12615_vm9, %v2479_v8, %v2481_v35  ;;  %v8784_v47 = vpop.f32.mrf.mxu0  ;;  %8860 = vmatprep.subr.bf16.mxu1 %v9153_v32  ;;  %v12683_v1 = vld [vmem:[#allocation28_spill] sm:$0xff] }
 0x156   : > { %v1917_v31 = vadd.f32 %v10155_v26, %v1878_v15  ;;  %v1881_v55 = vadd.f32 %v8821_v24, %v1495_v20  ;;  %v1493_v38 = vadd.f32 %v1440_v41, %v10272_v61  ;;  %v2486_v44 = vsel %vm12615_vm9, %v2483_v48, %v2485_v50  ;;  %8972 = vrot.lane.b32.xlu0 %v8971_v36, %s9682_s26  ;;  %v10508_v7 = vld [vmem:[#allocation2 + $0x81] ss:$2 sm:$0xff] }
 0x157   : > { %v2010_v58 = vsel %vm1946_vm6, %v1914_v57, %v1978_v54  ;;  %vm1951_vm7 = vcmp.gt.f32.partialorder %v1919_v0, 0.0  ;;  %v1983_v8 = vmul.f32 0.2, %v1919_v0  ;;  %v12680_v46 = vand.u32 7, %v10092_v14  ;;  %v8824_v57 = vpop.f32.mrf.mxu1  ;;  %8861 = vmatpush3.bf16.msra.mxu1 %v9153_v32  ;;  %v1453_v24 = vpop.f32.mrf.mxu0 }
 0x158   : > { %2043 = vst.msk [vmem:[#allocation2 + $0xa8] sm:$0xff] %vm12614_vm1, %v2010_v58  ;;  %vm1949_vm10 = vcmp.gt.f32.partialorder %v1917_v31, 0.0  ;;  %v1981_v61 = vmul.f32 0.2, %v1917_v31  ;;  %v1920_v17 = vadd.f32 %v10155_v26, %v1881_v55  ;;  %v1879_v56 = vadd.f32 %v1826_v3, %v1493_v38  ;;  %v10521_v55 = vld [vmem:[#allocation2 + $0x51] ss:$2 sm:$0xff]  ;;  %8862 = vmatprep.subr.bf16.mxu1 %v9156_v60 }
 0x159   : > { %vm10502_vm8 = vcmp.eq.s32.totalorder %v12680_v46, 7  ;;  %v12684_v36 = vand.u32 7, %v12683_v1  ;;  %v2015_v15 = vsel %vm1951_vm7, %v1919_v0, %v1983_v8  ;;  %v1498_v20 = vadd.f32 %v8784_v47, %v10278_v63  ;;  %v1839_v32 = vpop.f32.mrf.mxu1  ;;  %v10525_v0 = vld [vmem:[#allocation2 + $0x80] ss:$2 sm:$0xff] }
 0x15a   : > { %v2572_v54 = vsel %vm10438_vm2, 0.0, %v2482_v42  ;;  %v2574_v41 = vsel %vm10444_vm3, 0.0, %v2486_v44  ;;  %2048 = vst.msk [vmem:[#allocation2 + $0xd0] sm:$0xff] %vm12614_vm1, %v2015_v15  ;;  %v2013_v38 = vsel %vm1949_vm10, %v1917_v31, %v1981_v61  ;;  %vm1952_vm13 = vcmp.gt.f32.partialorder %v1920_v17, 0.0  ;;  %v8785_v44 = vpop.f32.mrf.mxu0  ;;  %v10538_v15 = vld [vmem:[#allocation2 + $0x90] ss:$2 sm:$0xff] }
 0x15b   : > { %vm10512_vm12 = vcmp.eq.s32.totalorder %v12684_v36, 7  ;;  %v1984_v3 = vmul.f32 0.2, %v1920_v17  ;;  %v1918_v58 = vadd.f32 %v10155_v26, %v1879_v56  ;;  %2046 = vst.msk [vmem:[#allocation2 + $0xc0] sm:$0xff] %vm12614_vm1, %v2013_v38  ;;  %v1884_v63 = vadd.f32 %v8824_v57, %v1498_v20  ;;  %v8825_v46 = vpop.f32.mrf.mxu1  ;;  %8863 = vmatpush3.bf16.msra.mxu1 %v9156_v60 }
 0x15c   : > { %v1496_v51 = vadd.f32 %v1453_v24, %v10286_v2  ;;  %v8976_v42 = vpack.i.bf16 %v2574_v41, %v2572_v54  ;;  %v8986_v23 = vpack.i.bf16 %v10508_v7, %v10521_v55  ;;  %v1499_v2 = vadd.f32 %v8785_v44, %v10294_v10  ;;  %v1456_v57 = vpop.f32.mrf.mxu0  ;;  %v9155_v10 = vld [vmem:[%s12594_s3 + $0x48] sm:$0xff]   ;;  %v10637_v60 = vld [vmem:[#allocation2 + $0xb1] ss:$2 sm:$0xff] }
 0x15d   : > { %v2016_v31 = vsel %vm1952_vm13, %v1920_v17, %v1984_v3  ;;  %vm1950_vm14 = vcmp.gt.f32.partialorder %v1918_v58, 0.0  ;;  %v1982_v47 = vmul.f32 0.2, %v1918_v58  ;;  %v1923_v61 = vadd.f32 %v10155_v26, %v1884_v63  ;;  %v1842_v3 = vpop.f32.mrf.mxu1  ;;  %8838 = vmatprep.subr.bf16.mxu0 %v9155_v10 }
 0x15e   : > { %2049 = vst.msk [vmem:[#allocation2 + $0xd8] sm:$0xff] %vm12614_vm1, %v2016_v31  ;;  %v1882_v56 = vadd.f32 %v1839_v32, %v1496_v51  ;;  %8977 = vrot.lane.b32.xlu0 %v8976_v42, %s9683_s12  ;;  %8987 = vrot.lane.b32.xlu1 %v8986_v23, %s9682_s26  ;;  %v2487_v36 = vrot.slane %v10525_v0, 1  ;;  %v1497_v20 = vadd.f32 %v1456_v57, %v10311_v30  ;;  %v12687_v32 = vld [vmem:[#allocation30_spill] sm:$0xff]  ;;  %v12691_v42 = vand.u32 7, %v10078_v53 }
 0x15f   : > { %v2014_v17 = vsel %vm1950_vm14, %v1918_v58, %v1982_v47  ;;  %v8981_v24 = vpack.i.bf16 %v10525_v0, %v10453_v12  ;;  %v2484_v54 = vsel %vm12615_vm9, %v2481_v35, %v2483_v48  ;;  %vm1955_vm15 = vcmp.gt.f32.partialorder %v1923_v61, 0.0  ;;  %v9157_v47 = vld [vmem:[%s12594_s3 + $0x40] sm:$0xff]   ;;  %8839 = vmatpush3.bf16.msra.mxu0 %v9155_v10 }
 0x160   : > { %2047 = vst.msk [vmem:[#allocation2 + $0xc8] sm:$0xff] %vm12614_vm1, %v2014_v17  ;;  %v1987_v41 = vmul.f32 0.2, %v1923_v61  ;;  %v1921_v38 = vadd.f32 %v10155_v26, %v1882_v56  ;;  %v1885_v30 = vadd.f32 %v8825_v46, %v1499_v2  ;;  %v1883_v35 = vadd.f32 %v1842_v3, %v1497_v20  ;;  %8840 = vmatprep.subr.bf16.mxu0 %v9157_v47  ;;  %v9166_v20 = vld [vmem:[%s12594_s3 + $0xa0] sm:$0xff]  }
 0x161   : > { %v12610_v58 = vrot.slane %v10538_v15, 1  ;;  %v12688_v63 = vand.u32 7, %v12687_v32  ;;  %vm10567_vm3 = vcmp.eq.s32.totalorder %v12691_v42, 0  ;;  %v12692_v23 = vmov 0  ;;  %v9178_v51 = vld [vmem:[%s12594_s3 + $0x80] sm:$0xff]  }
 0x162   : > { %v12693_v23 = vsel %vm10567_vm3, 4294967295, %v12692_v23  ;;  %v12694_v44 = vand.u32 7, %v12670_v34  ;;  %v12695_v31 = vmov 0  ;;  %v2019_v46 = vsel %vm1955_vm15, %v1923_v61, %v1987_v41  ;;  %8982 = vrot.lane.b32.xlu0 %v8981_v24, %s9681_s22  ;;  %v10598_v41 = vld [vmem:[#allocation2 + $0x91] ss:$2 sm:$0xff] }
 0x163   : > { %vm10561_vm2 = vcmp.eq.s32.totalorder %v12688_v63, 7  ;;  %vm1953_vm5 = vcmp.gt.f32.partialorder %v1921_v38, 0.0  ;;  %v1985_v56 = vmul.f32 0.2, %v1921_v38  ;;  %v1924_v2 = vadd.f32 %v10155_v26, %v1885_v30  ;;  %2052 = vst.msk [vmem:[#allocation2 + $0xf0] sm:$0xff] %vm12614_vm1, %v2019_v46  ;;  %8841 = vmatpush3.bf16.msra.mxu0 %v9157_v47 }
 0x164   : > { %vm10573_vm4 = vcmp.eq.s32.totalorder %v12694_v44, 0  ;;  %v12697_v57 = vand.u32 7, %v10064_v11  ;;  %v1922_v3 = vadd.f32 %v10155_v26, %v1883_v35  ;;  %v2490_v61 = vsel %vm12615_vm9, %v2487_v36, %v12610_v58  ;;  %v10600_v30 = vld [vmem:[#allocation2 + $0xa0] ss:$2 sm:$0xff]  ;;  %v10617_v44 = vld [vmem:[#allocation2 + $0xb0] ss:$2 sm:$0xff] }
 0x165   : > { %v12696_v31 = vsel %vm10573_vm4, 4294967295, %v12695_v31  ;;  %v2573_v24 = vsel %vm10502_vm8, 0.0, %v2484_v54  ;;  %v12700_v10 = vand.u32 7, %v10075_v52  ;;  %v12703_v26 = vand.u32 7, %v10086_v6 }
 0x166   : > { %vm10584_vm6 = vcmp.eq.s32.totalorder %v12697_v57, 0  ;;  %v2017_v49 = vsel %vm1953_vm5, %v1921_v38, %v1985_v56  ;;  %vm1956_vm8 = vcmp.gt.f32.partialorder %v1924_v2, 0.0  ;;  %v1988_v54 = vmul.f32 0.2, %v1924_v2  ;;  %v10627_v57 = vld [vmem:[#allocation2 + $0xd0] ss:$2 sm:$0xff] }
 0x167   : > { %vm10604_vm7 = vcmp.eq.s32.totalorder %v12700_v10, 0  ;;  %vm10610_vm10 = vcmp.eq.s32.totalorder %v12703_v26, 0  ;;  %v2576_v42 = vsel %vm10512_vm12, 0.0, %v2490_v61  ;;  %vm10621_vm13 = vcmp.eq.s32.totalorder %v12613_v4, 7  ;;  %2050 = vst.msk [vmem:[#allocation2 + $0xe0] sm:$0xff] %vm12614_vm1, %v2017_v49  ;;  %2610 = vrot.lane.b32.xlu0 %v10627_v57, %s9681_s22 }
 0x168   : > { %vm1954_vm14 = vcmp.gt.f32.partialorder %v1922_v3, 0.0  ;;  %v1986_v38 = vmul.f32 0.2, %v1922_v3  ;;  %v8991_v56 = vpack.i.bf16 %v2576_v42, %v2573_v24  ;;  %v12708_v25 = vand.u32 7, %v10132_v18  ;;  %v10640_v49 = vld [vmem:[#allocation2 + $0xa1] ss:$2 sm:$0xff] }
 0x169   : > { %v2020_v10 = vsel %vm1956_vm8, %v1924_v2, %v1988_v54  ;;  %v2491_v26 = vrot.slane %v10600_v30, 1  ;;  %v12711_v24 = vand.u32 7, %v10161_v29  ;;  %v12717_v2 = vand.u32 7, %v10092_v14 }
 0x16a   : > { %vm10631_vm12 = vcmp.eq.s32.totalorder %v12708_v25, 7  ;;  %v12714_v25 = vand.u32 7, %v10089_v13  ;;  %v12720_v58 = vand.u32 7, %v12683_v1  ;;  %v9159_v13 = vld [vmem:[%s12594_s3] sm:$0xff]   ;;  %2053 = vst.msk [vmem:[#allocation2 + $0xf8] sm:$0xff] %vm12614_vm1, %v2020_v10  ;;  %8992 = vrot.lane.b32.xlu1 %v8991_v56, %s9683_s12  ;;  %v8996_v14 = vpack.i.bf16 %v10617_v44, %v10538_v15 }
 0x16b   : > { %vm10644_vm15 = vcmp.eq.s32.totalorder %v12711_v24, 7  ;;  %vm10656_vm8 = vcmp.eq.s32.totalorder %v12717_v2, 0  ;;  %v2018_v24 = vsel %vm1954_vm14, %v1922_v3, %v1986_v38  ;;  %v10674_v1 = vld [vmem:[#allocation2 + $0xd1] ss:$2 sm:$0xff]  ;;  %v2493_v47 = vrot.slane %v10617_v44, 1  ;;  %8864 = vmatprep.subr.bf16.mxu1 %v9159_v13 }
 0x16c   : > { %vm10650_vm5 = vcmp.eq.s32.totalorder %v12714_v25, 0  ;;  %vm10662_vm0 = vcmp.eq.s32.totalorder %v12720_v58, 0  ;;  %v2078_v25 = vld [vmem:[#allocation2 + $0xc0] ss:$2 sm:$0xff]  ;;  %v10676_v58 = vld [vmem:[#allocation2 + $0xc1] ss:$2 sm:$0xff]  ;;  %8865 = vmatpush3.bf16.msra.mxu1 %v9159_v13 }
 0x16d   : > { %2051 = vst.msk [vmem:[#allocation2 + $0xe8] sm:$0xff] %vm12614_vm1, %v2018_v24  ;;  %v2495_v12 = vrot.slane %v2078_v25, 1  ;;  %v9006_v10 = vpack.i.bf16 %v2078_v25, %v10600_v30  ;;  %v10682_v3 = vld [vmem:[#allocation2 + $0x71] ss:$2 sm:$0xff]  ;;  %v12723_v38 = vand.u32 7, %v10158_v28  ;;  %v12724_v56 = vmov 0 }
 0x16e   : > { %v12726_v48 = vand.u32 7, %v10126_v16  ;;  %v12727_v4 = vmov 0  ;;  %v10699_v44 = vld [vmem:[%s12594_s3 + $0xb8] sm:$0xff]   ;;  %v9001_v25 = vpack.i.bf16 %v10637_v60, %v10598_v41  ;;  %v12729_v2 = vand.u32 7, %v10161_v29  ;;  %8997 = vrot.lane.b32.xlu1 %v8996_v14, %s9681_s22 }
 0x16f   : > { %vm10686_vm14 = vcmp.eq.s32.totalorder %v12723_v38, 7  ;;  %v12730_v8 = vmov 0  ;;  %9007 = vrot.lane.b32.xlu0 %v9006_v10, %s9681_s22  ;;  %v9011_v0 = vpack.i.bf16 %v10676_v58, %v10640_v49  ;;  %v12733_v29 = vmov 0  ;;  %8874 = vmatprep.subr.bf16.mxu0 %v10699_v44 }
 0x170   : > { %v12725_v56 = vsel %vm10686_vm14, 4294967295, %v12724_v56  ;;  %vm10692_vm11 = vcmp.eq.s32.totalorder %v12726_v48, 0  ;;  %v10710_v48 = vsel %vm12615_vm9, %v2485_v50, %v2487_v36  ;;  %vm10714_vm1 = vcmp.eq.s32.totalorder %v12729_v2, 0 }
 0x171   : > { %v12728_v4 = vsel %vm10692_vm11, 4294967295, %v12727_v4  ;;  %v12731_v8 = vsel %vm10714_vm1, 4294967295, %v12730_v8  ;;  %v12732_v50 = vand.u32 7, %v10175_v9  ;;  %v12735_v36 = vand.u32 7, %v10132_v18 }
 0x172   : > { %v12736_v13 = vmov 0  ;;  %vm12738_vm11 = vcmask 1046528   ;;  %v12743_v14 = vand.u32 7, %v10135_v19  ;;  %v12746_v21 = vand.u32 7, %v12687_v32  ;;  %9002 = vrot.lane.b32.xlu1 %v9001_v25, %s9682_s26 }
 0x173   : > { %vm10726_vm9 = vcmp.eq.s32.totalorder %v12732_v50, 0  ;;  %vm10732_vm1 = vcmp.eq.s32.totalorder %v12735_v36, 0  ;;  %v2494_v2 = vsel %vm12738_vm11, %v2491_v26, %v2493_v47  ;;  %v12740_v50 = vrot.slane %v10334_v45, 7  ;;  %9012 = vrot.lane.b32.xlu0 %v9011_v0, %s9682_s26 }
 0x174   : > { %v12734_v29 = vsel %vm10726_vm9, 4294967295, %v12733_v29  ;;  %v12737_v13 = vsel %vm10732_vm1, 4294967295, %v12736_v13  ;;  %vm12739_vm9 = vcmask 1040384   ;;  %v12741_v36 = vrot.slane %v10364_v40, 7  ;;  %v2082_v33 = vld [vmem:[#allocation2 + $0xe0] ss:$2 sm:$0xff] }
 0x175   : > { %v10747_v18 = vsel %vm12739_vm9, %v2151_v39, %v2152_v59  ;;  %vm12742_vm1 = vmmov %vm12739_vm9  ;;  %vm10758_vm14 = vcmp.eq.s32.totalorder %v12743_v14, 0  ;;  %vm10764_vm11 = vcmp.eq.s32.totalorder %v12746_v21, 0  ;;  %v12749_v39 = vrot.slane %v10627_v57, 1 }
 0x176   : > { %v10754_v38 = vsel %vm12742_vm1, %v12741_v36, %v12740_v50  ;;  %vm12750_vm9 = vcmask 1046528   ;;  %v2575_v50 = vsel %vm10561_vm2, 0.0, %v10710_v48  ;;  %v12751_v19 = vand.u32 7, %v10126_v16  ;;  %2658 = vrot.lane.b32.xlu1 %v10674_v1, %s9682_s26 }
 0x177   : > { %v2498_v10 = vsel %vm12750_vm9, %v2495_v12, %v12749_v39  ;;  %v12752_v36 = vmov 0  ;;  %v12754_v14 = vand.u32 7, %v10158_v28  ;;  %v12757_v16 = vand.u32 7, %v10199_v43  ;;  %v2114_v28 = vld [vmem:[#allocation2 + $0xe1] ss:$2 sm:$0xff] }
 0x178   : > { %vm10776_vm1 = vcmp.eq.s32.totalorder %v12751_v19, 7  ;;  %v12761_v19 = vrot.slane %v10364_v40, 7  ;;  %vm12762_vm4 = vcmask 1040384   ;;  %v12766_v40 = vrot.slane %v10458_v37, 7  ;;  %v9174_v39 = vld [vmem:[%s12594_s3 + $0x88] sm:$0xff]  }
 0x179   : > { %v12753_v36 = vsel %vm10776_vm1, 4294967295, %v12752_v36  ;;  %vm10788_vm9 = vcmp.eq.s32.totalorder %v12754_v14, 0  ;;  %vm10794_vm2 = vcmp.eq.s32.totalorder %v12757_v16, 0  ;;  %vm12760_vm1 = vcmask 1046528   ;;  %vm12765_vm3 = vmmov %vm12762_vm4 }
 0x17a   : > { %v10799_v48 = vsel %vm12760_vm1, %v2493_v47, %v2495_v12  ;;  %v10806_v32 = vsel %vm12762_vm4, %v2152_v59, %v12761_v19  ;;  %v12763_v14 = vrot.slane %v10471_v27, 7  ;;  %v12764_v16 = vrot.slane %v10334_v45, 7  ;;  %v10819_v12 = vld [vmem:[#allocation2 + $0xf0] ss:$2 sm:$0xff]  ;;  %vm12768_vm4 = vmmov %vm12765_vm3 }
 0x17b   : > { %v12767_v59 = vrot.slane %v10521_v55, 7  ;;  %v12772_v55 = vrot.slane %v10508_v7, 7  ;;  %v12773_v27 = vrot.slane %v10682_v3, 7  ;;  %v12775_v25 = vrot.slane %v10598_v41, 7 }
 0x17c   : > { %v10816_v21 = vsel %vm12765_vm3, %v12764_v16, %v12763_v14  ;;  %v12770_v0 = vmov %v12763_v14  ;;  %v2580_v16 = vsel %vm10621_vm13, 0.0, %v2498_v10  ;;  %vm12777_vm13 = vmmov %vm12765_vm3  ;;  %v2578_v30 = vsel %vm10631_vm12, 0.0, %v2494_v2 }
 0x17d   : > { %v10829_v47 = vsel %vm12768_vm4, %v12767_v59, %v12766_v40  ;;  %v12769_v19 = vmov %v12767_v59  ;;  %v12771_v40 = vrot.slane %v10538_v15, 1  ;;  %vm12774_vm4 = vmmov %vm12765_vm3  ;;  %v12776_v46 = vmov %v12772_v55 }
 0x17e   : > { %v10839_v14 = vsel %vm12765_vm3, %v12770_v0, %v12769_v19  ;;  %v10854_v19 = vsel %vm12774_vm4, %v12773_v27, %v12772_v55  ;;  %v10861_v10 = vsel %vm12777_vm13, %v12776_v46, %v12775_v25  ;;  %v9026_v15 = vpack.i.bf16 %v10682_v3, %v2114_v28  ;;  %v10870_v55 = vld [vmem:[%s12594_s3 + $0xf8] sm:$0xff]   ;;  %vm12778_vm12 = vmmov %vm12760_vm1 }
 0x17f   : > { %v2492_v59 = vsel %vm12760_vm1, %v12771_v40, %v2491_v26  ;;  %v2499_v26 = vrot.slane %v2082_v33, 1  ;;  %v2501_v0 = vrot.slane %v10819_v12, 1  ;;  %v2116_v40 = vld [vmem:[#allocation2 + $0xf1] ss:$2 sm:$0xff]  ;;  %v2579_v7 = vsel %vm10644_vm15, 0.0, %v10799_v48  ;;  %8898 = vmatprep.subr.bf16.mxu1 %v10870_v55  ;;  %vm12786_vm13 = vmmov %vm12765_vm3 }
 0x180   : > { %v9016_v25 = vpack.i.bf16 %v2580_v16, %v2578_v30  ;;  %v2178_v46 = vrot.slane %v2114_v28, 7  ;;  %9027 = vrot.lane.b32.xlu0 %v9026_v15, %s9682_s26  ;;  %vm12779_vm15 = vnez %v12725_v56  ;;  %v2180_v48 = vrot.slane %v2116_v40, 7 }
 0x181   : > { %v2502_v45 = vsel %vm12778_vm12, %v2499_v26, %v2501_v0  ;;  %v9684_v2 = vmov 0   ;;  %v12780_v28 = vrot.slane %v10637_v60, 7  ;;  %v12781_v16 = vrot.slane %v10640_v49, 7  ;;  %vm12789_vm12 = vmmov %vm12765_vm3 }
 0x182   : > { %v2582_v42 = vsel %vm12779_vm15, 0.0, %v2502_v45  ;;  %2801 = vst [vmem:[#allocation3] sm:$0xf] %v9684_v2  ;;  %2802 = vst [vmem:[#allocation4 + $0x20] sm:$0xf] %v9684_v2  ;;  %vm12782_vm1 = vnez %v12728_v4  ;;  %vm12783_vm4 = vnez %v12731_v8  ;;  %v12784_v27 = vrot.slane %v10674_v1, 7  ;;  %9017 = vrot.lane.b32.xlu1 %v9016_v25, %s9683_s12 }
 0x183   : > { %3799 = vst [vmem:[#allocation6 + $0x10] sm:$0x33] %v9684_v2  ;;  %3800 = vst [vmem:[#allocation7] sm:$0x33] %v9684_v2  ;;  %v10896_v30 = vsel %vm12765_vm3, %v12781_v16, %v12780_v28  ;;  %v9031_v45 = vpack.i.bf16 %v2575_v50, %v2582_v42  ;;  %v12787_v52 = vmov %v12781_v16  ;;  %v12788_v28 = vrot.slane %v10598_v41, 7  ;;  %v9171_v4 = vld [vmem:[%s12594_s3 + $0x90] sm:$0xff]  }
 0x184   : > { %4668 = vst [vmem:[#allocation9] sm:$0x11] %v9684_v2  ;;  %4669 = vst [vmem:[#allocation9 + $0x8] sm:$0x11] %v9684_v2  ;;  %vm12790_vm15 = vnez %v12734_v29  ;;  %v12792_v56 = vrot.slane %v10637_v60, 7  ;;  %v12794_v41 = vrot.slane %v10682_v3, 7 }
 0x185   : > { %4670 = vst [vmem:[#allocation10 + $0x8] sm:$0x44] %v9684_v2  ;;  %4671 = vst [vmem:[#allocation10] sm:$0x44] %v9684_v2  ;;  %v12785_v2 = vrot.slane %v10676_v58, 7  ;;  %v10916_v16 = vsel %vm12789_vm12, %v12788_v28, %v12787_v52  ;;  %v12795_v52 = vrot.slane %v10458_v37, 7  ;;  %9032 = vrot.lane.b32.xlu0 %v9031_v45, %s9683_s12  ;;  %v9021_v45 = vpack.i.bf16 %v10468_v22, %v2082_v33 }
 0x186   : > { %vm12796_vm12 = vmmov %vm12765_vm3  ;;  %v12797_v58 = vrot.slane %v10674_v1, 7  ;;  %v12800_v25 = vrot.slane %v10627_v57, 1 }
 0x187   : > { %v10909_v61 = vsel %vm12786_vm13, %v12785_v2, %v12784_v27  ;;  %v12791_v42 = vmov %v12785_v2  ;;  %vm12793_vm13 = vnez %v12737_v13  ;;  %v10936_v27 = vsel %vm12796_vm12, %v12795_v52, %v12794_v41  ;;  %9022 = vrot.lane.b32.xlu1 %v9021_v45, %s9681_s22 }
 0x188   : > { %v2452_v50 = vsel %vm12790_vm15, 0.0, %v10909_v61  ;;  %v10926_v15 = vsel %vm12765_vm3, %v12792_v56, %v12791_v42  ;;  %v2449_v49 = vsel %vm12793_vm13, 0.0, %v10916_v16  ;;  %v10945_v56 = vsel %vm12765_vm3, %v12797_v58, %v2178_v46  ;;  %vm12798_vm15 = vmmov %vm12765_vm3 }
 0x189   : > { %v2451_v60 = vsel %vm10758_vm14, 0.0, %v10926_v15  ;;  %v2446_v3 = vsel %vm10764_vm11, 0.0, %v10936_v27  ;;  %v10951_v37 = vsel %vm12798_vm15, %v2178_v46, %v2180_v48  ;;  %vm12799_vm12 = vnez %v12753_v36 }
 0x18a   : > { %v2577_v2 = vsel %vm12799_vm12, 0.0, %v2492_v59  ;;  %v2453_v1 = vsel %vm10788_vm9, 0.0, %v10945_v56  ;;  %v2454_v28 = vsel %vm10794_vm2, 0.0, %v10951_v37  ;;  %vm12801_vm15 = vcmask 1046528  }
 0x18b   : > { %v9036_v42 = vpack.i.bf16 %v2579_v7, %v2577_v2  ;;  %v2500_v22 = vsel %vm12801_vm15, %v12800_v25, %v2499_v26  ;;  %v12802_v36 = vand.u32 7, %v10175_v9  ;;  %vm12803_vm12 = vmmov %vm12801_vm15  ;;  %v12804_v46 = vand.u32 7, %v10199_v43 }
 0x18c   : > { %v2519_v59 = vsel %vm12803_vm12, %v2501_v0, 0.0  ;;  %v12805_v45 = vsel %vm10604_vm7, 0.0, %v10806_v32  ;;  %v12807_v2 = vsel %vm10584_vm6, 0.0, %v10464_v62  ;;  %vm12809_vm12 = vcmask 523264  }
 0x18d   : > { %9037 = vrot.lane.b32.xlu0 %v9036_v42, %s9683_s12  ;;  %vm2533_vm3 = vcmp.eq.s32.totalorder %v12802_v36, 7  ;;  %vm2535_vm2 = vcmp.eq.s32.totalorder %v12804_v46, 7  ;;  %vm12810_vm15 = vmmov %vm12809_vm12  ;;  %vm12811_vm9 = vcmask 785408   ;;  %vm12813_vm7 = vnez %v12693_v23 }
 0x18e   : > { %v2581_v33 = vsel %vm2533_vm3, 0.0, %v2500_v22  ;;  %v2583_v7 = vsel %vm2535_vm2, 0.0, %v2519_v59  ;;  %vm12806_vm2 = vcmask 261120   ;;  %vm12812_vm11 = vmmov %vm12811_vm9  ;;  %v12814_v62 = vsel %vm12813_vm7, 0.0, %v10747_v18 }
 0x18f   : > { %2722 = vrot.lane.b32.xlu1 %v2581_v33, %s9683_s12  ;;  %vm12808_vm3 = vmmov %vm12806_vm2  ;;  %v12843_v15 = vsel %vm12782_vm1, 0.0, %v10861_v10 }
 0x190   : > { %vm12815_vm6 = vmmov %vm12806_vm2 }
 0x191   : > { %2614 = vrot.lane.b32.xlu0 %v10819_v12, %s9681_s22  ;;  %s404_s22 = scalar_lea.vmem %s12602_s11, %s7456_s30 }
 0x193   : > { %2662 = vrot.lane.b32.xlu1 %v2116_v40, %s9682_s26 }
 0x195   : > { %2726 = vrot.lane.b32.xlu0 %v2583_v7, %s9683_s12 }
 0x1af   : > { %v10978_v57 = vpop.permute.xlu1 %8937 }
 0x1b0   : > { %v8939_v43 = vunpack.i.l.bf16 %v10978_v57  ;;  %v8940_v35 = vunpack.i.h.bf16 %v10978_v57 }
 0x1b1   : > { %v8948_v26 = vpop.permute.xlu0 %8947 }
 0x1b2   : > { %v8950_v41 = vunpack.i.h.bf16 %v8948_v26  ;;  %v8949_v12 = vunpack.i.l.bf16 %v8948_v26  ;;  %v2745_v17 = vsel %vm12815_vm6, %v12814_v62, %v8939_v43  ;;  %v12818_v43 = vsel %vm10650_vm5, 0.0, %v10829_v47 }
 0x1b4   : > { %v10980_v9 = vpop.permute.xlu1 %8942  ;;  %v2746_v40 = vsel %vm12806_vm2, %v12805_v45, %v8950_v41  ;;  %v2744_v42 = vsel %vm12808_vm3, %v12807_v2, %v8949_v12  ;;  %vm12816_vm2 = vmmov %vm12809_vm12 }
 0x1b5   : > { %v8944_v36 = vunpack.i.l.bf16 %v10980_v9  ;;  %vm12817_vm3 = vmmov %vm12811_vm9 }
 0x1b6   : > { %vm12824_vm7 = vmmov %vm12817_vm3 }
 0x1b7   : > { %vm12828_vm5 = vmmov %vm12816_vm2 }
 0x1b8   : > { %v8953_v48 = vpop.permute.xlu1 %8952 }
 0x1b9   : > { %v8955_v52 = vunpack.i.h.bf16 %v8953_v48  ;;  %v8954_v0 = vunpack.i.l.bf16 %v8953_v48  ;;  %v2761_v48 = vsel %vm12816_vm2, %v2745_v17, %v8944_v36 }
 0x1bb   : > { %v2760_v33 = vsel %vm12809_vm12, %v2744_v42, %v8954_v0  ;;  %v2762_v59 = vsel %vm12810_vm15, %v2746_v40, %v8955_v52  ;;  %vm12822_vm15 = vmmov %vm12816_vm2 }
 0x1bc   : > { %v8958_v58 = vpop.permute.xlu1 %8957  ;;  %vm12823_vm12 = vmmov %vm12816_vm2  ;;  %vm12829_vm2 = vnez %v12696_v31 }
 0x1bd   : > { %v8960_v25 = vunpack.i.h.bf16 %v8958_v58  ;;  %v8959_v22 = vunpack.i.l.bf16 %v8958_v58  ;;  %v12830_v57 = vsel %vm12829_vm2, 0.0, %v10754_v38 }
 0x1bf   : > { %v2779_v63 = vsel %vm12811_vm9, %v2762_v59, %v8960_v25  ;;  %v2777_v32 = vsel %vm12812_vm11, %v2760_v33, %v8959_v22  ;;  %vm12819_vm11 = vmmov %vm12815_vm6  ;;  %v12820_v22 = vsel %vm10610_vm10, 0.0, %v10816_v21  ;;  %v8945_v21 = vunpack.i.h.bf16 %v10980_v9 }
 0x1c0   : > { %v8412_v46 = vpack.c.bf16 %v2779_v63, %v2777_v32  ;;  %v8963_v7 = vpop.permute.xlu0 %8962  ;;  %vm12821_vm9 = vmmov %vm12815_vm6 }
 0x1c1   : > { %v8964_v26 = vunpack.i.l.bf16 %v8963_v7  ;;  %vm12825_vm6 = vmmov %vm12817_vm3 }
 0x1c2   : > { %8413 = vst [vmem:[#allocation4] sm:$0xff] %v8412_v46   ;;  %vm12827_vm10 = vmmov %vm12821_vm9 }
 0x1c3   : > { %v2778_v41 = vsel %vm12817_vm3, %v2761_v48, %v8964_v26  ;;  %vm12831_vm3 = vmmov %vm12821_vm9 }
 0x1c4   : > { %v8393_v12 = vpack.c.bf16 %v2778_v41, %v2778_v41  ;;  %v8968_v52 = vpop.permute.xlu0 %8967  ;;  %v12826_v41 = vsel %vm10656_vm8, 0.0, %v10839_v14  ;;  %vm12834_vm8 = vmmov %vm12825_vm6 }
 0x1c5   : > { %v8970_v45 = vunpack.i.h.bf16 %v8968_v52  ;;  %v8969_v40 = vunpack.i.l.bf16 %v8968_v52  ;;  %v8965_v52 = vunpack.i.h.bf16 %v8963_v7  ;;  %v9162_v7 = vld [vmem:[%s12594_s3 + $0xb0] sm:$0xff]   ;;  %vm12840_vm13 = vmmov %vm12831_vm3 }
 0x1c6   : > { %2808 = vst [vmem:[#allocation3 + $0x4] sm:$0xf] %v8393_v12  ;;  %vm12844_vm14 = vmmov %vm12831_vm3 }
 0x1c7   : > { %v2750_v25 = vsel %vm12819_vm11, %v12818_v43, %v8970_v45  ;;  %v2748_v36 = vsel %vm12821_vm9, %v12820_v22, %v8969_v40  ;;  %v2747_v40 = vsel %vm12831_vm3, %v12830_v57, %v8940_v35  ;;  %vm12832_vm11 = vmmov %vm12828_vm5  ;;  %v9164_v22 = vld [vmem:[%s12594_s3 + $0xa8] sm:$0xff]  }
 0x1c8   : > { %v8973_v0 = vpop.permute.xlu0 %8972  ;;  %vm12833_vm9 = vmmov %vm12825_vm6 }
 0x1c9   : > { %v9152_v58 = vld [vmem:[#allocation4] sm:$0xff]   ;;  %v8975_v2 = vunpack.i.h.bf16 %v8973_v0  ;;  %v8974_v23 = vunpack.i.l.bf16 %v8973_v0 }
 0x1ca   : > { %8842 = vmatprep.mubr.bf16.mxu0 %v9152_v58 }
 0x1cb   : > { %v2764_v63 = vsel %vm12822_vm15, %v2748_v36, %v8974_v23  ;;  %v2766_v32 = vsel %vm12823_vm12, %v2750_v25, %v8975_v2  ;;  %v2763_v2 = vsel %vm12832_vm11, %v2747_v40, %v8945_v21  ;;  %v12835_v36 = vsel %vm10662_vm0, 0.0, %v10854_v19  ;;  %vm12836_vm15 = vmmov %vm12831_vm3 }
 0x1cc   : > { %v2780_v54 = vsel %vm12833_vm9, %v2763_v2, %v8965_v52  ;;  %vm12837_vm0 = vmmov %vm12828_vm5  ;;  %v9168_v52 = vld [vmem:[%s12594_s3 + $0x98] sm:$0xff]  }
 0x1cd   : > { %v9154_v42 = vld [vmem:[#allocation3] sm:$0xff]   ;;  %vm12838_vm12 = vmmov %vm12831_vm3 }
 0x1ce   : > { %8866 = vmatprep.mubr.bf16.mxu1 %v9154_v42  ;;  %vm12848_vm2 = vmmov %vm12837_vm0 }
 0x1cf   : > { %vm12850_vm11 = vmmov %vm12837_vm0 }
 0x1d0   : > { %v8978_v18 = vpop.permute.xlu0 %8977  ;;  %v8988_v47 = vpop.permute.xlu1 %8987 }
 0x1d1   : > { %v8980_v33 = vunpack.i.h.bf16 %v8978_v18  ;;  %v8979_v59 = vunpack.i.l.bf16 %v8978_v18  ;;  %v8989_v48 = vunpack.i.l.bf16 %v8988_v47 }
 0x1d3   : > { %v2781_v46 = vsel %vm12824_vm7, %v2764_v63, %v8979_v59  ;;  %v2783_v6 = vsel %vm12825_vm6, %v2766_v32, %v8980_v33  ;;  %v8990_v32 = vunpack.i.h.bf16 %v8988_v47  ;;  %vm12839_vm7 = vmmov %vm12837_vm0 }
 0x1d4   : > { %v8422_v62 = vpack.c.bf16 %v2783_v6, %v2781_v46  ;;  %v8983_v17 = vpop.permute.xlu0 %8982  ;;  %v9165_v6 = vld [vmem:[%s12594_s3 + $0xf0] sm:$0xff]  }
 0x1d5   : > { %v8984_v26 = vunpack.i.l.bf16 %v8983_v17  ;;  %v8985_v31 = vunpack.i.h.bf16 %v8983_v17 }
 0x1d6   : > { %8445 = vst [vmem:[#allocation4 + $0x8] sm:$0xff] %v8422_v62  }
 0x1d7   : > { %v2749_v12 = vsel %vm12827_vm10, %v12826_v41, %v8984_v26  ;;  %v2752_v33 = vsel %vm12836_vm15, %v12835_v36, %v8985_v31  ;;  %vm12842_vm10 = vmmov %vm12831_vm3 }
 0x1d8   : > { %v2765_v45 = vsel %vm12828_vm5, %v2749_v12, %v8989_v48  ;;  %v2768_v17 = vsel %vm12837_vm0, %v2752_v33, %v8990_v32  ;;  %vm12845_vm5 = vmmov %vm12825_vm6 }
 0x1d9   : > { %v11026_v0 = vpop.permute.xlu0 %2610  ;;  %vm12861_vm1 = vmmov %vm12845_vm5 }
 0x1da   : > { %vm12866_vm9 = vmmov %vm12861_vm1 }
 0x1dc   : > { %v8993_v58 = vpop.permute.xlu1 %8992 }
 0x1dd   : > { %v8994_v9 = vunpack.i.l.bf16 %v8993_v58  ;;  %v9158_v43 = vld [vmem:[#allocation4 + $0x8] sm:$0xff]   ;;  %v8995_v35 = vunpack.i.h.bf16 %v8993_v58 }
 0x1de   : > { %8843 = vmatmul.mubr.bf16.vlgmr.msra.gmra.mxu0 %v9158_v43 }
 0x1df   : > { %v2782_v14 = vsel %vm12834_vm8, %v2765_v45, %v8994_v9  ;;  %8875 = vmatpush3.bf16.msra.mxu0 %v10699_v44  ;;  %v2785_v58 = vsel %vm12825_vm6, %v2768_v17, %v8995_v35  ;;  %vm12857_vm6 = vmmov %vm12848_vm2  ;;  %v9176_v35 = vld [vmem:[%s12594_s3 + $0xd0] sm:$0xff]  }
 0x1e0   : > { %v8417_v42 = vpack.c.bf16 %v2782_v14, %v2780_v54  ;;  %v8998_v18 = vpop.permute.xlu1 %8997  ;;  %8876 = vmatprep.subr.bf16.mxu0 %v9162_v7  ;;  %vm12868_vm15 = vmmov %vm12857_vm6 }
 0x1e1   : > { %v9008_v23 = vpop.permute.xlu0 %9007  ;;  %v9000_v26 = vunpack.i.h.bf16 %v8998_v18  ;;  %v8999_v21 = vunpack.i.l.bf16 %v8998_v18 }
 0x1e2   : > { %8444 = vst [vmem:[#allocation3 + $0x8] sm:$0xff] %v8417_v42   ;;  %v9009_v59 = vunpack.i.l.bf16 %v9008_v23  ;;  %v9010_v19 = vunpack.i.h.bf16 %v9008_v23 }
 0x1e3   : > { %8877 = vmatpush3.bf16.msra.mxu0 %v9162_v7 }
 0x1e4   : > { %v9003_v25 = vpop.permute.xlu1 %9002  ;;  %8878 = vmatprep.subr.bf16.mxu0 %v9164_v22  ;;  %v2754_v47 = vsel %vm12838_vm12, %v2449_v49, %v9009_v59  ;;  %v2756_v13 = vsel %vm12840_vm13, %v2451_v60, %v9010_v19  ;;  %v9167_v49 = vld [vmem:[%s12594_s3 + $0xe8] sm:$0xff]   ;;  %v2753_v60 = vsel %vm12844_vm14, %v12843_v15, %v8999_v21  ;;  %vm12855_vm12 = vmmov %vm12845_vm5 }
 0x1e5   : > { %v11040_v38 = vpop.permute.xlu0 %9012  ;;  %v9005_v57 = vunpack.i.h.bf16 %v9003_v25  ;;  %v9004_v40 = vunpack.i.l.bf16 %v9003_v25  ;;  %vm12858_vm13 = vmmov %vm12848_vm2 }
 0x1e6   : > { %v9014_v44 = vunpack.i.l.bf16 %v11040_v38  ;;  %v9015_v24 = vunpack.i.h.bf16 %v11040_v38  ;;  %v9170_v38 = vld [vmem:[%s12594_s3 + $0xe0] sm:$0xff]   ;;  %vm12860_vm14 = vmmov %vm12845_vm5 }
 0x1e7   : > { %8879 = vmatpush3.bf16.msra.mxu0 %v9164_v22  ;;  %v2769_v22 = vsel %vm12848_vm2, %v2753_v60, %v9004_v40 }
 0x1e8   : > { %v2659_v46 = vpop.permute.xlu1 %2658  ;;  %v2770_v41 = vsel %vm12839_vm7, %v2754_v47, %v9014_v44  ;;  %8880 = vmatprep.subr.bf16.mxu0 %v9166_v20  ;;  %v2772_v33 = vsel %vm12850_vm11, %v2756_v13, %v9015_v24  ;;  %vm12856_vm7 = vmmov %vm12845_vm5 }
 0x1e9   : > { %v9161_v62 = vld [vmem:[#allocation3 + $0x8] sm:$0xff]   ;;  %vm12865_vm11 = vmmov %vm12857_vm6 }
 0x1ea   : > { %8867 = vmatmul.mubr.bf16.vlgmr.msra.gmra.mxu1 %v9161_v62 }
 0x1eb   : > { %8899 = vmatpush3.bf16.msra.mxu1 %v10870_v55  ;;  %v12841_v55 = vsel %vm12783_vm4, 0.0, %v10896_v30  ;;  %8881 = vmatpush3.bf16.msra.mxu0 %v9166_v20  ;;  %vm12847_vm4 = vmmov %vm12831_vm3 }
 0x1ec   : > { %8900 = vmatprep.subr.bf16.mxu1 %v9165_v6  ;;  %v2755_v45 = vsel %vm12842_vm10, %v12841_v55, %v9000_v26  ;;  %8882 = vmatprep.subr.bf16.mxu0 %v9168_v52  ;;  %v2757_v25 = vsel %vm12847_vm4, %v2452_v50, %v11026_v0  ;;  %vm12849_vm3 = vmmov %vm12837_vm0 }
 0x1ed   : > { %v2771_v36 = vsel %vm12849_vm3, %v2755_v45, %v9005_v57  ;;  %vm12852_vm8 = vmmov %vm12847_vm4 }
 0x1ee   : > { %vm12854_vm0 = vmmov %vm12847_vm4 }
 0x1ef   : > { %8901 = vmatpush3.bf16.msra.mxu1 %v9165_v6  ;;  %8883 = vmatpush3.bf16.msra.mxu0 %v9168_v52  ;;  %vm12859_vm10 = vmmov %vm12848_vm2  ;;  %v9184_v52 = vld [vmem:[%s12594_s3 + $0xc0] sm:$0xff]  }
 0x1f0   : > { %8902 = vmatprep.subr.bf16.mxu1 %v9167_v49  ;;  %8884 = vmatprep.subr.bf16.mxu0 %v9171_v4  ;;  %vm12862_vm4 = vmmov %vm12861_vm1 }
 0x1f1   : > { %vm12864_vm3 = vmmov %vm12854_vm0 }
 0x1f2   : > { %v11051_v63 = vpop.permute.xlu0 %9027 }
 0x1f3   : > { %v9030_v2 = vunpack.i.h.bf16 %v11051_v63  ;;  %v9029_v8 = vunpack.i.l.bf16 %v11051_v63  ;;  %v2773_v63 = vsel %vm12857_vm6, %v2757_v25, %v2659_v46  ;;  %8903 = vmatpush3.bf16.msra.mxu1 %v9167_v49  ;;  %v9172_v46 = vld [vmem:[%s12594_s3 + $0xd8] sm:$0xff]   ;;  %8885 = vmatpush3.bf16.msra.mxu0 %v9171_v4  ;;  %v9193_v4 = vld [vmem:[%s12595_s4 + $0xf0] sm:$0xff]  }
 0x1f4   : > { %v9018_v12 = vpop.permute.xlu1 %9017  ;;  %8904 = vmatprep.subr.bf16.mxu1 %v9170_v38  ;;  %8886 = vmatprep.subr.bf16.mxu0 %v9174_v39 }
 0x1f5   : > { %v9019_v16 = vunpack.i.l.bf16 %v9018_v12  ;;  %v9020_v10 = vunpack.i.h.bf16 %v9018_v12 }
 0x1f7   : > { %v9033_v48 = vpop.permute.xlu0 %9032  ;;  %v2787_v9 = vsel %vm12845_vm5, %v2770_v41, %v9019_v16  ;;  %v2789_v56 = vsel %vm12860_vm14, %v2772_v33, %v9020_v10  ;;  %8905 = vmatpush3.bf16.msra.mxu1 %v9170_v38  ;;  %8887 = vmatpush3.bf16.msra.mxu0 %v9174_v39  ;;  %v9175_v41 = vld [vmem:[#allocation3 + $0x4] sm:$0xff]   ;;  %v9194_v10 = vld [vmem:[%s12595_s4 + $0x70] sm:$0xff]  }
 0x1f8   : > { %v8432_v30 = vpack.c.bf16 %v2787_v9, %v2785_v58  ;;  %v9035_v23 = vunpack.i.h.bf16 %v9033_v48  ;;  %v9034_v31 = vunpack.i.l.bf16 %v9033_v48  ;;  %8906 = vmatprep.subr.bf16.mxu1 %v9172_v46  ;;  %8888 = vmatprep.subr.bf16.mxu0 %v9178_v51  ;;  %v9180_v48 = vld [vmem:[%s12594_s3 + $0xc8] sm:$0xff]   ;;  %v9196_v38 = vld [vmem:[%s12595_s4 + $0x30] sm:$0xff]  }
 0x1f9   : > { %v9023_v14 = vpop.permute.xlu1 %9022  ;;  %v9181_v16 = vld [vmem:[#allocation4 + $0x4] sm:$0xff]  }
 0x1fa   : > { %v9025_v18 = vunpack.i.h.bf16 %v9023_v14  ;;  %v9024_v43 = vunpack.i.l.bf16 %v9023_v14  ;;  %8447 = vst [vmem:[#allocation4 + $0x10] sm:$0xff] %v8432_v30   ;;  %v9189_v14 = vld [vmem:[%s12595_s4 + $0xf8] sm:$0xff]   ;;  %v9198_v33 = vld [vmem:[%s12595_s4 + $0x68] sm:$0xff]  }
 0x1fb   : > { %8907 = vmatpush3.bf16.msra.mxu1 %v9172_v46  ;;  %8889 = vmatpush3.bf16.msra.mxu0 %v9178_v51 }
 0x1fc   : > { %v2751_v59 = vsel %vm12852_vm8, %v2446_v3, %v9025_v18  ;;  %v2758_v29 = vsel %vm12854_vm0, %v2453_v1, %v9024_v43  ;;  %8908 = vmatprep.subr.bf16.mxu1 %v9176_v35  ;;  %8578 = vmatprep.subr.bf16.mxu0 %v9189_v14  ;;  %vm12867_vm8 = vmmov %vm12857_vm6 }
 0x1fd   : > { %v2767_v5 = vsel %vm12858_vm13, %v2751_v59, %v9030_v2  ;;  %v2774_v27 = vsel %vm12859_vm10, %v2758_v29, %v9029_v8  ;;  %vm12869_vm0 = vmmov %vm12857_vm6 }
 0x1fe   : > { %v2784_v3 = vsel %vm12845_vm5, %v2767_v5, %v9035_v23  ;;  %v2791_v1 = vsel %vm12861_vm1, %v2774_v27, %v9034_v31  ;;  %v9190_v23 = vld [vmem:[%s12595_s4 + $0x78] sm:$0xff]   ;;  %v9195_v31 = vld [vmem:[%s12595_s4 + $0xb0] sm:$0xff]   ;;  %vm12872_vm6 = vmmov %vm12869_vm0 }
 0x1ff   : > { %v9038_v54 = vpop.permute.xlu0 %9037  ;;  %v8442_v6 = vpack.c.bf16 %v2791_v1, %v2789_v56  ;;  %8909 = vmatpush3.bf16.msra.mxu1 %v9176_v35  ;;  %v7730_v35 = vld [vmem:[%s12599_s8] ss:$0 sm:$0xff]  ;;  %vm12873_vm13 = vmmov %vm12869_vm0 }
 0x200   : > { %v9040_v7 = vunpack.i.h.bf16 %v9038_v54  ;;  %v9039_v42 = vunpack.i.l.bf16 %v9038_v54  ;;  %8910 = vmatprep.subr.bf16.mxu1 %v9180_v48  ;;  %vm12874_vm10 = vmmov %vm12869_vm0 }
 0x201   : > { %v2723_v32 = vpop.permute.xlu1 %2722  ;;  %8449 = vst [vmem:[#allocation4 + $0x18] sm:$0xff] %v8442_v6   ;;  %v9169_v21 = vld [vmem:[#allocation4 + $0x10] sm:$0xff]   ;;  %vm12875_vm14 = vmmov %vm12869_vm0 }
 0x202   : > { %v2786_v61 = vsel %vm12855_vm12, %v2769_v22, %v9039_v42  ;;  %v2788_v50 = vsel %vm12856_vm7, %v2771_v36, %v9040_v7  ;;  %v2790_v44 = vsel %vm12862_vm4, %v2773_v63, %v2723_v32  ;;  %8846 = vmatprep.mubr.bf16.mxu0 %v9169_v21  ;;  %v9185_v45 = vld [vmem:[#allocation4 + $0xc] sm:$0xff]   ;;  %v9191_v7 = vld [vmem:[%s12595_s4 + $0xb8] sm:$0xff]   ;;  %v9197_v36 = vld [vmem:[%s12595_s4 + $0xe8] sm:$0xff]  }
 0x203   : > { %v2615_v0 = vpop.permute.xlu0 %2614  ;;  %v8427_v20 = vpack.c.bf16 %v2786_v61, %v2784_v3  ;;  %v8437_v19 = vpack.c.bf16 %v2790_v44, %v2788_v50  ;;  %8911 = vmatpush3.bf16.msra.mxu1 %v9180_v48  ;;  %v9192_v42 = vld [vmem:[%s12595_s4 + $0x38] sm:$0xff]   ;;  %vm12870_vm12 = vmmov %vm12869_vm0 }
 0x204   : > { %v2759_v62 = vsel %vm12864_vm3, %v2454_v28, %v2615_v0  ;;  %8912 = vmatprep.subr.bf16.mxu1 %v9184_v52  ;;  %vm12871_vm7 = vmmov %vm12869_vm0 }
 0x205   : > { %8446 = vst [vmem:[#allocation3 + $0x10] sm:$0xff] %v8427_v20   ;;  %8448 = vst [vmem:[#allocation3 + $0x18] sm:$0xff] %v8437_v19   ;;  %v2663_v26 = vpop.permute.xlu1 %2662 }
 0x206   : > { %v2775_v37 = vsel %vm12865_vm11, %v2759_v62, %v2663_v26  ;;  %vm12876_vm5 = vmmov %vm12869_vm0 }
 0x207   : > { %v2727_v17 = vpop.permute.xlu0 %2726  ;;  %8913 = vmatpush3.bf16.msra.mxu1 %v9184_v52  ;;  %vm12877_vm1 = vmmov %vm12869_vm0 }
 0x208   : > { %v2792_v28 = vsel %vm12866_vm9, %v2775_v37, %v2727_v17  ;;  %v9173_v12 = vld [vmem:[#allocation4 + $0x18] sm:$0xff]   ;;  %8600 = vmatprep.subr.bf16.mxu1 %v9190_v23  ;;  %vm12878_vm4 = vmmov %vm12869_vm0 }
 0x209   : > { %v8400_v47 = vpack.c.bf16 %v2792_v28, %v2792_v28  ;;  %8847 = vmatmul.mubr.bf16.gmra.mxu0 %v9173_v12  ;;  %v9186_v57 = vld [vmem:[#allocation4 + $0x14] sm:$0xff]   ;;  %v9188_v24 = vld [vmem:[#allocation4 + $0x1c] sm:$0xff]   ;;  %vm12879_vm2 = vmmov %vm12869_vm0 }
 0x20a   : > { %8890 = vmatprep.mubr.bf16.mxu0 %v9175_v41  ;;  %vm12880_vm3 = vmmov %vm12869_vm0 }
 0x20b   : > { %2850 = vst [vmem:[#allocation3 + $0x20] sm:$0xf] %v8400_v47  ;;  %vm12881_vm11 = vmmov %vm12869_vm0 }
 0x20c   : > { %v9177_v58 = vld [vmem:[#allocation3 + $0x10] sm:$0xff]   ;;  %v9179_v13 = vld [vmem:[#allocation3 + $0x18] sm:$0xff]   ;;  %vm12882_vm9 = vmmov %vm12869_vm0 }
 0x20d   : > { %8870 = vmatprep.mubr.bf16.mxu1 %v9177_v58  ;;  %v9182_v49 = vld [vmem:[#allocation3 + $0xc] sm:$0xff]   ;;  %v9183_v55 = vld [vmem:[#allocation3 + $0x14] sm:$0xff]  }
 0x20e   : > { %8871 = vmatmul.mubr.bf16.gmra.mxu1 %v9179_v13 }
 0x20f   : > { %8914 = vmatprep.mubr.bf16.mxu1 %v9181_v16 }
 0x211   : > { %8891 = vmatmul.mubr.bf16.vlgmr.msra.gmra.mxu0 %v9182_v49 }
 0x212   : > { %8894 = vmatprep.mubr.bf16.mxu0 %v9183_v55  ;;  %v9187_v40 = vld [vmem:[#allocation3 + $0x1c] sm:$0xff]   ;;  %8579 = vmatpush3.bf16.msra.mxu0 %v9191_v7 }
 0x213   : > { %8580 = vmatprep.subr.bf16.mxu0 %v9193_v4 }
 0x216   : > { %8915 = vmatmul.mubr.bf16.vlgmr.msra.gmra.mxu1 %v9185_v45  ;;  %8581 = vmatpush3.bf16.msra.mxu0 %v9195_v31 }
 0x217   : > { %8918 = vmatprep.mubr.bf16.mxu1 %v9186_v57  ;;  %8601 = vmatpush3.bf16.msra.mxu1 %v9192_v42 }
 0x218   : > { %8602 = vmatprep.subr.bf16.mxu1 %v9194_v10  ;;  %8582 = vmatprep.subr.bf16.mxu0 %v9197_v36 }
 0x219   : > { %8895 = vmatmul.mubr.bf16.gmra.mxu0 %v9187_v40 }
 0x21b   : > { %8603 = vmatpush3.bf16.msra.mxu1 %v9196_v38 }
 0x21c   : > { %8604 = vmatprep.subr.bf16.mxu1 %v9198_v33 }
 0x21e   : > { %8919 = vmatmul.mubr.bf16.gmra.mxu1 %v9188_v24 }
 0x29e   : > { %v8844_v15 = vpop.f32.mrf.mxu0 }
 0x2a0   : > { %v3006_v9 = vpop.f32.mrf.mxu0 }
 0x2a2   : > { %v8845_v8 = vpop.f32.mrf.mxu0 }
 0x2a4   : > { %v3009_v30 = vpop.f32.mrf.mxu0 }
 0x2aa   : > { %v8868_v60 = vpop.f32.mrf.mxu1 }
 0x2ab   : > { %v3152_v27 = vadd.f32 %v8868_v60, %v8844_v15 }
 0x2ac   : > { %v3143_v2 = vpop.f32.mrf.mxu1 }
 0x2ad   : > { %v3144_v5 = vadd.f32 %v3143_v2, %v3006_v9 }
 0x2ae   : > { %v8869_v54 = vpop.f32.mrf.mxu1 }
 0x2af   : > { %v3155_v46 = vadd.f32 %v8869_v54, %v8845_v8 }
 0x2b0   : > { %v3146_v18 = vpop.f32.mrf.mxu1 }
 0x2b1   : > { %v3147_v6 = vadd.f32 %v3146_v18, %v3009_v30 }
 0x2c9   : > { %v8848_v43 = vpop.f32.mrf.mxu0 }
 0x2cb   : > { %v3022_v25 = vpop.f32.mrf.mxu0 }
 0x2cd   : > { %v8849_v59 = vpop.f32.mrf.mxu0 }
 0x2ce   : > { %v8872_v22 = vpop.f32.mrf.mxu1 }
 0x2cf   : > { %v3025_v61 = vpop.f32.mrf.mxu0  ;;  %v3168_v13 = vadd.f32 %v8872_v22, %v8848_v43 }
 0x2d0   : > { %v3159_v29 = vpop.f32.mrf.mxu1 }
 0x2d1   : > { %v8892_v0 = vpop.f32.mrf.mxu0  ;;  %v3160_v47 = vadd.f32 %v3159_v29, %v3022_v25 }
 0x2d2   : > { %v8873_v50 = vpop.f32.mrf.mxu1  ;;  %v3338_v3 = vadd.f32 %v8892_v0, %v3152_v27 }
 0x2d3   : > { %v3305_v32 = vpop.f32.mrf.mxu0  ;;  %v3171_v55 = vadd.f32 %v8873_v50, %v8849_v59 }
 0x2d4   : > { %v3162_v63 = vpop.f32.mrf.mxu1  ;;  %v3336_v56 = vadd.f32 %v3305_v32, %v3144_v5 }
 0x2d5   : > { %v8893_v1 = vpop.f32.mrf.mxu0  ;;  %v3163_v45 = vadd.f32 %v3162_v63, %v3025_v61 }
 0x2d6   : > { %v8916_v39 = vpop.f32.mrf.mxu1  ;;  %v3339_v26 = vadd.f32 %v8893_v1, %v3155_v46 }
 0x2d7   : > { %v3508_v19 = vadd.f32 %v8916_v39, %v3338_v3  ;;  %v3308_v62 = vpop.f32.mrf.mxu0 }
 0x2d8   : > { %v3475_v44 = vpop.f32.mrf.mxu1  ;;  %v3337_v51 = vadd.f32 %v3308_v62, %v3147_v6 }
 0x2d9   : > { %v3506_v20 = vadd.f32 %v3475_v44, %v3336_v56  ;;  %v8896_v37 = vpop.f32.mrf.mxu0  ;;  %v3523_v12 = vadd.f32 %v7730_v35, %v3508_v19 }
 0x2da   : > { %v8917_v17 = vpop.f32.mrf.mxu1  ;;  %v3342_v15 = vadd.f32 %v8896_v37, %v3168_v13 }
 0x2db   : > { %v3521_v21 = vadd.f32 %v7730_v35, %v3506_v20  ;;  %v3509_v48 = vadd.f32 %v8917_v17, %v3339_v26  ;;  %v3321_v52 = vpop.f32.mrf.mxu0  ;;  %v3532_v8 = vsel %vm12869_vm0, %v3523_v12, 0.0 }
 0x2dc   : > { %v3478_v28 = vpop.f32.mrf.mxu1  ;;  %v3340_v16 = vadd.f32 %v3321_v52, %v3160_v47 }
 0x2dd   : > { %v3507_v41 = vadd.f32 %v3478_v28, %v3337_v51  ;;  %v3529_v57 = vsel %vm12867_vm8, %v3521_v21, 0.0  ;;  %v8897_v40 = vpop.f32.mrf.mxu0  ;;  %v3524_v60 = vadd.f32 %v7730_v35, %v3509_v48 }
 0x2de   : > { %v8920_v58 = vpop.f32.mrf.mxu1  ;;  %v3343_v23 = vadd.f32 %v8897_v40, %v3171_v55 }
 0x2df   : > { %v3522_v49 = vadd.f32 %v7730_v35, %v3507_v41  ;;  %v3324_v30 = vpop.f32.mrf.mxu0  ;;  %v3512_v7 = vadd.f32 %v8920_v58, %v3342_v15  ;;  %v3534_v43 = vsel %vm12870_vm12, %v3524_v60, 0.0 }
 0x2e0   : > { %v3491_v24 = vpop.f32.mrf.mxu1  ;;  %v3341_v42 = vadd.f32 %v3324_v30, %v3163_v45 }
 0x2e1   : > { %v3530_v9 = vsel %vm12868_vm15, %v3522_v49, 0.0  ;;  %v3510_v2 = vadd.f32 %v3491_v24, %v3340_v16  ;;  %v3527_v22 = vadd.f32 %v7730_v35, %v3512_v7 }
 0x2e2   : > { %v3531_v54 = vadd.f32 %v3530_v9, %v3529_v57  ;;  %v8921_v14 = vpop.f32.mrf.mxu1 }
 0x2e3   : > { %v3525_v4 = vadd.f32 %v7730_v35, %v3510_v2  ;;  %v3513_v31 = vadd.f32 %v8921_v14, %v3343_v23  ;;  %v3540_v0 = vsel %vm12873_vm13, %v3527_v22, 0.0 }
 0x2e4   : > { %v3533_v10 = vadd.f32 %v3532_v8, %v3531_v54  ;;  %v3494_v18 = vpop.f32.mrf.mxu1 }
 0x2e5   : > { %v3511_v38 = vadd.f32 %v3494_v18, %v3341_v42  ;;  %v3536_v36 = vsel %vm12871_vm7, %v3525_v4, 0.0  ;;  %v3528_v29 = vadd.f32 %v7730_v35, %v3513_v31 }
 0x2e6   : > { %v3535_v25 = vadd.f32 %v3534_v43, %v3533_v10 }
 0x2e7   : > { %v3526_v33 = vadd.f32 %v7730_v35, %v3511_v38  ;;  %v3542_v5 = vsel %vm12874_vm10, %v3528_v29, 0.0 }
 0x2e8   : > { %v3537_v59 = vadd.f32 %v3536_v36, %v3535_v25 }
 0x2e9   : > { %v3538_v61 = vsel %vm12872_vm6, %v3526_v33, 0.0 }
 0x2ea   : > { %v3539_v50 = vadd.f32 %v3538_v61, %v3537_v59 }
 0x2ec   : > { %v3541_v63 = vadd.f32 %v3540_v0, %v3539_v50 }
 0x2ee   : > { %v3543_v27 = vadd.f32 %v3542_v5, %v3541_v63 }
 0x2f0   : > { %v3544_v32 = vrot.slane %v3543_v27, 4 }
 0x2f2   : > { %v3545_v39 = vadd.f32 %v3544_v32, %v3543_v27 }
 0x2f4   : > { %v3546_v56 = vrot.slane %v3545_v39, 2 }
 0x2f6   : > { %v3547_v3 = vadd.f32 %v3546_v56, %v3545_v39 }
 0x2f8   : > { %v3548_v1 = vrot.slane %v3547_v3, 1 }
 0x2fa   : > { %v3549_v44 = vadd.f32 %v3548_v1, %v3547_v3 }
 0x2fc   : > { %v3551_v46 = vmul.f32 0.015625, %v3549_v44 }
 0x2fe   : > { %v3552_v6 = vsub.f32 %v3521_v21, %v3551_v46  ;;  %v3553_v20 = vsub.f32 %v3522_v49, %v3551_v46  ;;  %v3554_v19 = vsub.f32 %v3523_v12, %v3551_v46  ;;  %v3555_v62 = vsub.f32 %v3524_v60, %v3551_v46 }
 0x2ff   : > { %v3556_v17 = vsub.f32 %v3525_v4, %v3551_v46  ;;  %v3557_v37 = vsub.f32 %v3526_v33, %v3551_v46  ;;  %v3558_v52 = vsub.f32 %v3527_v22, %v3551_v46  ;;  %v3559_v21 = vsub.f32 %v3528_v29, %v3551_v46 }
 0x300   : > { %v3560_v26 = vmul.f32 %v3552_v6, %v3552_v6  ;;  %v3561_v35 = vmul.f32 %v3553_v20, %v3553_v20  ;;  %v3562_v51 = vmul.f32 %v3554_v19, %v3554_v19  ;;  %v3563_v28 = vmul.f32 %v3555_v62, %v3555_v62 }
 0x301   : > { %v3564_v58 = vmul.f32 %v3556_v17, %v3556_v17  ;;  %v3565_v49 = vmul.f32 %v3557_v37, %v3557_v37  ;;  %v3566_v45 = vmul.f32 %v3558_v52, %v3558_v52  ;;  %v3567_v24 = vmul.f32 %v3559_v21, %v3559_v21 }
 0x302   : > { %v3568_v47 = vsel %vm12875_vm14, %v3560_v26, 0.0  ;;  %v3569_v48 = vsel %vm12876_vm5, %v3561_v35, 0.0  ;;  %v3571_v13 = vsel %vm12877_vm1, %v3562_v51, 0.0  ;;  %v3573_v12 = vsel %vm12878_vm4, %v3563_v28, 0.0  ;;  %vm12883_vm14 = vmmov %vm12877_vm1  ;;  %v9201_v26 = vld [vmem:[%s12595_s4 + $0xe0] sm:$0xff]  }
 0x303   : > { %v3570_v41 = vadd.f32 %v3569_v48, %v3568_v47  ;;  %v3575_v57 = vsel %vm12879_vm2, %v3564_v58, 0.0  ;;  %v3577_v15 = vsel %vm12880_vm3, %v3565_v49, 0.0  ;;  %v3579_v9 = vsel %vm12881_vm11, %v3566_v45, 0.0  ;;  %vm12884_vm5 = vmmov %vm12877_vm1  ;;  %v9202_v35 = vld [vmem:[%s12595_s4 + $0x60] sm:$0xff]   ;;  %v12890_v48 = vld [vmem:[#allocation23_spill] sm:$0xff] }
 0x304   : > { %v3581_v8 = vsel %vm12882_vm9, %v3567_v24, 0.0  ;;  %vm12885_vm4 = vmmov %vm12877_vm1  ;;  %v3674_v51 = vand.u32 3, %v10078_v53  ;;  %v3667_v47 = vand.u32 3, %v10064_v11  ;;  %v9241_v53 = vld [vmem:[%s12595_s4 + $0x160] sm:$0xff]  }
 0x305   : > { %v3572_v16 = vadd.f32 %v3571_v13, %v3570_v41  ;;  %vm12886_vm2 = vmmov %vm12877_vm1  ;;  %v3681_v41 = vand.u32 3, %v12890_v48 }
 0x306   : > { %vm12887_vm3 = vmmov %vm12877_vm1 }
 0x307   : > { %v3574_v55 = vadd.f32 %v3573_v12, %v3572_v16  ;;  %vm12888_vm11 = vmmov %vm12877_vm1 }
 0x308   : > { %vm12889_vm9 = vmmov %vm12877_vm1 }
 0x309   : > { %v3576_v40 = vadd.f32 %v3575_v57, %v3574_v55 }
 0x30b   : > { %v3578_v60 = vadd.f32 %v3577_v15, %v3576_v40 }
 0x30d   : > { %v3580_v2 = vadd.f32 %v3579_v9, %v3578_v60 }
 0x30f   : > { %v3582_v54 = vadd.f32 %v3581_v8, %v3580_v2  ;;  %v9203_v8 = vld [vmem:[%s12595_s4 + $0xa0] sm:$0xff]  }
 0x311   : > { %v3583_v30 = vrot.slane %v3582_v54, 4 }
 0x313   : > { %v3584_v14 = vadd.f32 %v3583_v30, %v3582_v54  ;;  %v9204_v54 = vld [vmem:[%s12595_s4 + $0x20] sm:$0xff]   ;;  %v9205_v30 = vld [vmem:[%s12595_s4 + $0xd8] sm:$0xff]  }
 0x315   : > { %v3585_v23 = vrot.slane %v3584_v14, 2 }
 0x317   : > { %v3586_v7 = vadd.f32 %v3585_v23, %v3584_v14  ;;  %v9206_v23 = vld [vmem:[%s12595_s4 + $0x58] sm:$0xff]  }
 0x319   : > { %v3587_v42 = vrot.slane %v3586_v7, 1 }
 0x31b   : > { %v3588_v4 = vadd.f32 %v3587_v42, %v3586_v7 }
 0x31d   : > { %v3589_v10 = vmul.f32 0.015625, %v3588_v4  ;;  %v9207_v4 = vld [vmem:[%s12595_s4 + $0x98] sm:$0xff]  }
 0x31f   : > { %v3590_v18 = vadd.f32 1e-05, %v3589_v10  ;;  %v9208_v10 = vld [vmem:[%s12595_s4 + $0x18] sm:$0xff]  }
 0x321   : > { %9665 = vrsqrt.f32 %v3590_v18 }
 0x32e   : > { %v9666_v43 = vpop.eup %9665 }
 0x32f   : > { %v3592_v31 = vmul.f32 %v9666_v43, %v3552_v6  ;;  %v3593_v38 = vmul.f32 %v9666_v43, %v3553_v20  ;;  %v3594_v25 = vmul.f32 %v9666_v43, %v3554_v19  ;;  %v3595_v22 = vmul.f32 %v9666_v43, %v3555_v62  ;;  %v9199_v62 = vld [vmem:[%s12595_s4 + $0xa8] sm:$0xff]  }
 0x330   : > { %v3596_v36 = vmul.f32 %v9666_v43, %v3556_v17  ;;  %v3597_v33 = vmul.f32 %v9666_v43, %v3557_v37  ;;  %v3598_v59 = vmul.f32 %v9666_v43, %v3558_v52  ;;  %v3599_v29 = vmul.f32 %v9666_v43, %v3559_v21  ;;  %v9200_v17 = vld [vmem:[%s12595_s4 + $0x28] sm:$0xff]   ;;  %8583 = vmatpush3.bf16.msra.mxu0 %v9199_v62  ;;  %v9235_v62 = vld [vmem:[%s12595_s4 + $0x130] sm:$0xff]  }
 0x331   : > { %vm3600_vm8 = vcmp.gt.f32.partialorder %v3592_v31, 0.0  ;;  %vm3601_vm15 = vcmp.gt.f32.partialorder %v3593_v38, 0.0  ;;  %vm3602_vm0 = vcmp.gt.f32.partialorder %v3594_v25, 0.0  ;;  %vm3603_vm12 = vcmp.gt.f32.partialorder %v3595_v22, 0.0  ;;  %8605 = vmatpush3.bf16.msra.mxu1 %v9200_v17  ;;  %8584 = vmatprep.subr.bf16.mxu0 %v9201_v26 }
 0x332   : > { %vm3604_vm7 = vcmp.gt.f32.partialorder %v3596_v36, 0.0  ;;  %vm3605_vm6 = vcmp.gt.f32.partialorder %v3597_v33, 0.0  ;;  %vm3606_vm13 = vcmp.gt.f32.partialorder %v3598_v59, 0.0  ;;  %vm3607_vm10 = vcmp.gt.f32.partialorder %v3599_v29, 0.0  ;;  %8606 = vmatprep.subr.bf16.mxu1 %v9202_v35 }
 0x333   : > { %v3608_v61 = vmul.f32 0.2, %v3592_v31  ;;  %v3609_v50 = vmul.f32 0.2, %v3593_v38  ;;  %v3610_v0 = vmul.f32 0.2, %v3594_v25 }
 0x334   : > { %v3611_v63 = vmul.f32 0.2, %v3595_v22  ;;  %v3612_v5 = vmul.f32 0.2, %v3596_v36  ;;  %v3613_v27 = vmul.f32 0.2, %v3597_v33  ;;  %8585 = vmatpush3.bf16.msra.mxu0 %v9203_v8 }
 0x335   : > { %v3614_v32 = vmul.f32 0.2, %v3598_v59  ;;  %v3615_v39 = vmul.f32 0.2, %v3599_v29  ;;  %v3616_v56 = vsel %vm3600_vm8, %v3592_v31, %v3608_v61  ;;  %v3617_v3 = vsel %vm3601_vm15, %v3593_v38, %v3609_v50  ;;  %8607 = vmatpush3.bf16.msra.mxu1 %v9204_v54  ;;  %8586 = vmatprep.subr.bf16.mxu0 %v9205_v30  ;;  %v9209_v31 = vld [vmem:[%s12595_s4 + $0xd0] sm:$0xff]   ;;  %v9216_v61 = vld [vmem:[%s12595_s4 + $0x8] sm:$0xff]  }
 0x336   : > { %v3618_v1 = vsel %vm3602_vm0, %v3594_v25, %v3610_v0  ;;  %v3619_v44 = vsel %vm3603_vm12, %v3595_v22, %v3611_v63  ;;  %v3620_v46 = vsel %vm3604_vm7, %v3596_v36, %v3612_v5  ;;  %v3621_v6 = vsel %vm3605_vm6, %v3597_v33, %v3613_v27  ;;  %3624 = vst.msk [vmem:[#allocation5] sm:$0xff] %vm12883_vm14, %v3616_v56  ;;  %v9210_v38 = vld [vmem:[%s12595_s4 + $0x50] sm:$0xff]   ;;  %v9213_v33 = vld [vmem:[%s12595_s4 + $0xc8] sm:$0xff]   ;;  %v9217_v50 = vld [vmem:[%s12595_s4 + $0xc0] sm:$0xff]  }
 0x337   : > { %3625 = vst.msk [vmem:[#allocation5 + $0x8] sm:$0xff] %vm12884_vm5, %v3617_v3  ;;  %v3622_v20 = vsel %vm3606_vm13, %v3598_v59, %v3614_v32  ;;  %v3623_v19 = vsel %vm3607_vm10, %v3599_v29, %v3615_v39  ;;  %v3688_v37 = vand.u32 3, %v12670_v34  ;;  %vm11236_vm8 = vcmp.eq.s32.totalorder %v3674_v51, 3  ;;  %8608 = vmatprep.subr.bf16.mxu1 %v9206_v23  ;;  %v9211_v22 = vld [vmem:[%s12595_s4 + $0x90] sm:$0xff]   ;;  %v9214_v59 = vld [vmem:[%s12595_s4 + $0x48] sm:$0xff]   ;;  %v9218_v0 = vld [vmem:[%s12595_s4 + $0x40] sm:$0xff]  }
 0x338   : > { %3626 = vst.msk [vmem:[#allocation5 + $0x10] sm:$0xff] %vm12877_vm1, %v3618_v1  ;;  %vm12893_vm0 = vcmask 1046528   ;;  %vm11245_vm12 = vcmp.eq.s32.totalorder %v3667_v47, 3  ;;  %vm11251_vm7 = vcmp.eq.s32.totalorder %v3681_v41, 3  ;;  %8587 = vmatpush3.bf16.msra.mxu0 %v9207_v4  ;;  %v9212_v36 = vld [vmem:[%s12595_s4 + $0x10] sm:$0xff]   ;;  %v9215_v29 = vld [vmem:[%s12595_s4 + $0x88] sm:$0xff]  }
 0x339   : > { %3627 = vst.msk [vmem:[#allocation5 + $0x18] sm:$0xff] %vm12885_vm4, %v3619_v44  ;;  %vm3746_vm15 = vcmp.eq.s32.totalorder %v3688_v37, 3  ;;  %vm12898_vm6 = vmmov %vm12893_vm0  ;;  %8609 = vmatpush3.bf16.msra.mxu1 %v9208_v10  ;;  %8588 = vmatprep.subr.bf16.mxu0 %v9209_v31  ;;  %v9219_v63 = vld [vmem:[%s12595_s4 + $0x80] sm:$0xff]   ;;  %v9225_v27 = vld [vmem:[%s12595_s4 + $0x178] sm:$0xff]   ;;  %vm11330_vm14 = vcmp.eq.s32.totalorder %v3674_v51, 0  ;;  %vm3714_vm5 = vcmp.eq.s32.totalorder %v3688_v37, 0 }
 0x33a   : > { %3628 = vst.msk [vmem:[#allocation5 + $0x20] sm:$0xff] %vm12886_vm2, %v3620_v46  ;;  %vm12899_vm13 = vmmov %vm12893_vm0  ;;  %8610 = vmatprep.subr.bf16.mxu1 %v9210_v38  ;;  %v9220_v5 = vld [vmem:[%s12595_s4] sm:$0xff]   ;;  %v9226_v32 = vld [vmem:[%s12595_s4 + $0x1f8] sm:$0xff]   ;;  %vm12903_vm1 = vcmask 1040384   ;;  %vm11340_vm2 = vcmp.eq.s32.totalorder %v3667_v47, 0 }
 0x33b   : > { %3629 = vst.msk [vmem:[#allocation5 + $0x28] sm:$0xff] %vm12887_vm3, %v3621_v6  ;;  %vm12900_vm10 = vmmov %vm12893_vm0  ;;  %vm11346_vm3 = vcmp.eq.s32.totalorder %v3681_v41, 0  ;;  %v9227_v38 = vld [vmem:[%s12595_s4 + $0x138] sm:$0xff]  }
 0x33c   : > { %3630 = vst.msk [vmem:[#allocation5 + $0x30] sm:$0xff] %vm12888_vm11, %v3622_v20  ;;  %8589 = vmatpush3.bf16.msra.mxu0 %v9211_v22  ;;  %vm12904_vm4 = vmmov %vm12903_vm1 }
 0x33d   : > { %3631 = vst.msk [vmem:[#allocation5 + $0x38] sm:$0xff] %vm12889_vm9, %v3623_v19  ;;  %8611 = vmatpush3.bf16.msra.mxu1 %v9212_v36  ;;  %8590 = vmatprep.subr.bf16.mxu0 %v9213_v33  ;;  %vm12909_vm11 = vmmov %vm12889_vm9 }
 0x33e   : > { %v3632_v28 = vld [vmem:[#allocation5] ss:$2 sm:$0xff]  ;;  %8612 = vmatprep.subr.bf16.mxu1 %v9214_v59  ;;  %v3640_v39 = vld [vmem:[#allocation5 + $0x1] ss:$2 sm:$0xff] }
 0x33f   : > { %v3731_v13 = vrot.slane %v3632_v28, 1  ;;  %v3651_v20 = vrot.slane %v3640_v39, 7 }
 0x340   : > { %v3634_v52 = vld [vmem:[#allocation5 + $0x10] ss:$2 sm:$0xff]  ;;  %8591 = vmatpush3.bf16.msra.mxu0 %v9215_v29  ;;  %v3642_v56 = vld [vmem:[#allocation5 + $0x11] ss:$2 sm:$0xff] }
 0x341   : > { %v3732_v21 = vrot.slane %v3634_v52, 1  ;;  %8613 = vmatpush3.bf16.msra.mxu1 %v9216_v61  ;;  %8592 = vmatprep.subr.bf16.mxu0 %v9217_v50  ;;  %v3652_v44 = vrot.slane %v3642_v56, 7 }
 0x342   : > { %v3636_v58 = vld [vmem:[#allocation5 + $0x20] ss:$2 sm:$0xff]  ;;  %8614 = vmatprep.subr.bf16.mxu1 %v9218_v0  ;;  %v3644_v3 = vld [vmem:[#allocation5 + $0x21] ss:$2 sm:$0xff] }
 0x343   : > { %v3734_v49 = vrot.slane %v3636_v58, 1  ;;  %v3733_v9 = vsel %vm12899_vm13, %v3731_v13, %v3732_v21  ;;  %v9046_v42 = vpack.i.bf16 %v3636_v58, %v3632_v28  ;;  %v3654_v46 = vrot.slane %v3644_v3, 7  ;;  %v9240_v58 = vld [vmem:[%s12595_s4 + $0x1a8] sm:$0xff]  }
 0x344   : > { %v3638_v16 = vld [vmem:[#allocation5 + $0x30] ss:$2 sm:$0xff]  ;;  %v3755_v18 = vsel %vm11245_vm12, 0.0, %v3733_v9  ;;  %8593 = vmatpush3.bf16.msra.mxu0 %v9219_v63  ;;  %v3646_v1 = vld [vmem:[#allocation5 + $0x31] ss:$2 sm:$0xff]  ;;  %v3653_v28 = vsel %vm12904_vm4, %v3651_v20, %v3652_v44 }
 0x345   : > { %v3736_v55 = vrot.slane %v3638_v16, 1  ;;  %v9041_v45 = vpack.i.bf16 %v3638_v16, %v3634_v52  ;;  %v3735_v57 = vsel %vm12893_vm0, %v3732_v21, %v3734_v49  ;;  %8615 = vmatpush3.bf16.msra.mxu1 %v9220_v5  ;;  %8622 = vmatprep.subr.bf16.mxu0 %v9225_v27  ;;  %v3656_v6 = vrot.slane %v3646_v1, 7  ;;  %vm12912_vm0 = vmmov %vm12889_vm9 }
 0x346   : > { %v3756_v60 = vsel %vm11236_vm8, 0.0, %v3735_v57  ;;  %8644 = vmatprep.subr.bf16.mxu1 %v9226_v32  ;;  %v3724_v37 = vsel %vm11330_vm14, 0.0, %v3653_v28  ;;  %vm12910_vm8 = vmmov %vm12903_vm1  ;;  %vm4247_vm14 = vcmask 1045504   ;;  %v9238_v28 = vld [vmem:[%s12595_s4 + $0x1e8] sm:$0xff]  }
 0x347   : > { %9042 = vrot.lane.b32.xlu1 %v9041_v45, %s9682_s26  ;;  %v3742_v15 = vsel %vm12898_vm6, %v3736_v55, 0.0  ;;  %v3737_v2 = vsel %vm12900_vm10, %v3734_v49, %v3736_v55  ;;  %v3657_v17 = vsel %vm12903_vm1, %v3654_v46, %v3656_v6  ;;  %v3655_v49 = vsel %vm12910_vm8, %v3652_v44, %v3654_v46  ;;  %vm12913_vm12 = vmmov %vm12912_vm0  ;;  %v9233_v44 = vld [vmem:[%s12595_s4 + $0x170] sm:$0xff]  }
 0x348   : > { %v3758_v14 = vsel %vm3746_vm15, 0.0, %v3742_v15  ;;  %v3757_v43 = vsel %vm11251_vm7, 0.0, %v3737_v2  ;;  %v3726_v51 = vsel %vm3714_vm5, 0.0, %v3657_v17  ;;  %vm12911_vm15 = vmmov %vm12903_vm1  ;;  %v3725_v54 = vsel %vm11346_vm3, 0.0, %v3655_v49  ;;  %v9249_v49 = vld [vmem:[%s12595_s4 + $0x150] sm:$0xff]  }
 0x349   : > { %v9051_v7 = vpack.i.bf16 %v3758_v14, %v3756_v60  ;;  %v9056_v25 = vpack.i.bf16 %v3757_v43, %v3755_v18  ;;  %v3662_v12 = vsel %vm12911_vm15, 0.0, %v3651_v20  ;;  %vm12914_vm7 = vmmov %vm12912_vm0  ;;  %v11366_v43 = vld [vmem:[#allocation7] sm:$0x33]  ;;  %v9234_v20 = vld [vmem:[%s12595_s4 + $0x1f0] sm:$0xff]   ;;  %vm6708_vm15 = vcmask 1046532  }
 0x34a   : > { %v3723_v8 = vsel %vm11340_vm2, 0.0, %v3662_v12  ;;  %vm12915_vm6 = vmmov %vm12912_vm0  ;;  %v7890_v31 = vcombine.high %v11366_v43, %v11366_v43  ;;  %v9250_v12 = vld [vmem:[%s12595_s4 + $0x1d0] sm:$0xff]  }
 0x34b   : > { %9052 = vrot.lane.b32.xlu0 %v9051_v7, %s9682_s26  ;;  %9047 = vrot.lane.b32.xlu1 %v9046_v42, %s9682_s26  ;;  %vm12916_vm13 = vmmov %vm12912_vm0 }
 0x34c   : > { %vm12917_vm10 = vmmov %vm12912_vm0  ;;  %v4448_v5 = vrot.slane %v7890_v31, 2  ;;  %v9265_v31 = vld [vmem:[%s12596_s5 + $0x270] ss:$8 sps:$4 sm:$0xff]  }
 0x34d   : > { %vm12918_vm3 = vmmov %vm12910_vm8  ;;  %vm6706_vm8 = vsmask.f32 2304 }
 0x34f   : > { %9057 = vrot.lane.b32.xlu0 %v9056_v25, %s9682_s26 }
 0x3b9   : > { %v9043_v19 = vpop.permute.xlu1 %9042 }
 0x3ba   : > { %v9045_v26 = vunpack.i.h.bf16 %v9043_v19  ;;  %v9044_v35 = vunpack.i.l.bf16 %v9043_v19 }
 0x3bc   : > { %v3790_v21 = vsel %vm12909_vm11, %v3726_v51, %v9045_v26  ;;  %v3788_v47 = vsel %vm12889_vm9, %v3724_v37, %v9044_v35  ;;  %v9236_v26 = vld [vmem:[%s12595_s4 + $0x1b0] sm:$0xff]   ;;  %v9237_v35 = vld [vmem:[%s12595_s4 + $0x168] sm:$0xff]   ;;  %v9243_v51 = vld [vmem:[%s12595_s4 + $0x120] sm:$0xff]   ;;  %vm12919_vm11 = vcmask 1046528   ;;  %vm6705_vm9 = vcmask 1042432  }
 0x3bd   : > { %v9053_v52 = vpop.permute.xlu0 %9052  ;;  %v9048_v34 = vpop.permute.xlu1 %9047  ;;  %v9244_v37 = vld [vmem:[%s12595_s4 + $0x1a0] sm:$0xff]  }
 0x3be   : > { %v9055_v13 = vunpack.i.h.bf16 %v9053_v52  ;;  %v9054_v16 = vunpack.i.l.bf16 %v9053_v52  ;;  %v9050_v55 = vunpack.i.h.bf16 %v9048_v34  ;;  %v9049_v45 = vunpack.i.l.bf16 %v9048_v34  ;;  %v9239_v52 = vld [vmem:[%s12595_s4 + $0x128] sm:$0xff]   ;;  %v9242_v34 = vld [vmem:[%s12595_s4 + $0x1e0] sm:$0xff]  }
 0x3c0   : > { %v3794_v48 = vsel %vm12912_vm0, %v3646_v1, %v9055_v13  ;;  %v3792_v41 = vsel %vm12913_vm12, %v3642_v56, %v9054_v16  ;;  %v3789_v30 = vsel %vm12914_vm7, %v3725_v54, %v9050_v55  ;;  %v3787_v14 = vsel %vm12915_vm6, %v3723_v8, %v9049_v45  ;;  %v9245_v13 = vld [vmem:[%s12595_s4 + $0x158] sm:$0xff]   ;;  %v9253_v55 = vld [vmem:[%s12595_s4 + $0x148] sm:$0xff]   ;;  %v9259_v54 = vld [vmem:[%s12595_s4 + $0x100] sm:$0xff]  }
 0x3c1   : > { %v8404_v57 = vpack.c.bf16 %v3794_v48, %v3790_v21  ;;  %v8402_v40 = vpack.c.bf16 %v3792_v41, %v3788_v47  ;;  %v9058_v24 = vpop.permute.xlu0 %9057  ;;  %v9246_v16 = vld [vmem:[%s12595_s4 + $0x1d8] sm:$0xff]   ;;  %v9251_v48 = vld [vmem:[%s12595_s4 + $0x110] sm:$0xff]   ;;  %v9254_v45 = vld [vmem:[%s12595_s4 + $0x1c8] sm:$0xff]   ;;  %v7889_v8 = vcombine.low %v11366_v43, %v11366_v43  ;;  %vm6709_vm0 = vsmask.f32 6400 }
 0x3c2   : > { %v9060_v15 = vunpack.i.h.bf16 %v9058_v24  ;;  %v9059_v60 = vunpack.i.l.bf16 %v9058_v24  ;;  %v9247_v21 = vld [vmem:[%s12595_s4 + $0x118] sm:$0xff]   ;;  %v9252_v41 = vld [vmem:[%s12595_s4 + $0x190] sm:$0xff]   ;;  %v9257_v24 = vld [vmem:[%s12595_s4 + $0x140] sm:$0xff]  }
 0x3c3   : > { %v3829_v9 = vrot.slane %v8404_v57, 6  ;;  %v3812_v2 = vrot.slane %v8402_v40, 6  ;;  %v9248_v47 = vld [vmem:[%s12595_s4 + $0x198] sm:$0xff]   ;;  %v9255_v57 = vld [vmem:[%s12595_s4 + $0x108] sm:$0xff]   ;;  %vm6707_vm12 = vmand %vm6705_vm9, %vm6706_vm8 }
 0x3c4   : > { %v3793_v23 = vsel %vm12916_vm13, %v3644_v3, %v9060_v15  ;;  %v3791_v7 = vsel %vm12917_vm10, %v3640_v39, %v9059_v60  ;;  %v9228_v39 = vld [vmem:[%s12595_s4 + $0x1b8] sm:$0xff]   ;;  %v9256_v40 = vld [vmem:[%s12595_s4 + $0x188] sm:$0xff]   ;;  %v9258_v15 = vld [vmem:[%s12595_s4 + $0x1c0] sm:$0xff]   ;;  %vm6655_vm13 = vcmask 1043456  }
 0x3c5   : > { %3831 = vst [vmem:[#allocation7 + $0x8] sm:$0xcc] %v3829_v9  ;;  %v3832_v42 = vrot.slane %v3829_v9, 4  ;;  %3814 = vst [vmem:[#allocation7 + $0x10] sm:$0xcc] %v3812_v2  ;;  %v3815_v4 = vrot.slane %v3812_v2, 4  ;;  %v8403_v10 = vpack.c.bf16 %v3793_v23, %v3789_v30  ;;  %v8401_v18 = vpack.c.bf16 %v3791_v7, %v3787_v14 }
 0x3c6   : > { %v9260_v30 = vld [vmem:[%s12595_s4 + $0x180] sm:$0xff]   ;;  %v9270_v43 = vld [vmem:[%s12596_s5 + $0x374] ss:$8 sps:$4 sm:$0xff]   ;;  %vm6710_vm7 = vmand %vm6708_vm15, %vm6709_vm0 }
 0x3c7   : > { %3834 = vst [vmem:[#allocation6 + $0x8] sm:$0x33] %v3832_v42  ;;  %3817 = vst [vmem:[#allocation6] sm:$0x33] %v3815_v4  ;;  %v4445_v42 = vrot.slane %v7889_v8, 2 }
 0x3c8   : > { %3824 = vst [vmem:[#allocation7 + $0x8] sm:$0x33] %v8403_v10  ;;  %3825 = vst [vmem:[#allocation6] sm:$0xcc] %v8403_v10 }
 0x3c9   : > { %3807 = vst [vmem:[#allocation7 + $0x10] sm:$0x33] %v8401_v18  ;;  %3808 = vst [vmem:[#allocation6 + $0x10] sm:$0xcc] %v8401_v18  ;;  %v9267_v18 = vld [vmem:[%s12596_s5 + $0x274] ss:$8 sps:$4 sm:$0xff]  }
 0x3ca   : > { %vm6711_vm6 = vmor %vm6710_vm7, %vm6707_vm12 }
 0x3cc   : > { %v11373_v25 = vld [vmem:[#allocation7 + $0x10] sm:$0xcc] }
 0x3ce   : > { %v11383_v0 = vld [vmem:[#allocation6 + $0x8] sm:$0x33] }
 0x3cf   : > { %v11375_v36 = vld [vmem:[#allocation7 + $0x8] sm:$0xff]  ;;  %v7838_v3 = vcombine.high %v11383_v0, %v11383_v0  ;;  %v7837_v9 = vcombine.low %v11383_v0, %v11383_v0 }
 0x3d0   : > { %v3869_v22 = vld [vmem:[#allocation7 + $0x10] sm:$0xff]  ;;  %v3835_v33 = vld [vmem:[#allocation6 + $0x10] sm:$0xff]  ;;  %v11379_v61 = vld [vmem:[#allocation6] sm:$0xff]  ;;  %v7888_v63 = vcombine.high %v11373_v25, %v11375_v36  ;;  %v7887_v2 = vcombine.low %v11373_v25, %v11375_v36 }
 0x3d1   : > { %v7767_v59 = vcombine.low %v3869_v22, %v11375_v36  ;;  %v7768_v29 = vcombine.high %v3869_v22, %v11375_v36  ;;  %v11381_v50 = vld [vmem:[#allocation6 + $0x10] sm:$0xcc]  ;;  %v7785_v27 = vcombine.low %v3835_v33, %v11379_v61  ;;  %v7786_v32 = vcombine.high %v3835_v33, %v11379_v61  ;;  %v9271_v25 = vld [vmem:[%s12596_s5 + $0x260] ss:$8 sps:$4 sm:$0xff]   ;;  %v9273_v22 = vld [vmem:[%s12596_s5 + $0x264] ss:$8 sps:$4 sm:$0xff]  }
 0x3d2   : > { %v7836_v56 = vcombine.high %v11381_v50, %v11379_v61  ;;  %v4447_v1 = vrot.slane %v7888_v63, 2  ;;  %v4252_v6 = vrot.slane %v7838_v3, 2  ;;  %v7835_v60 = vcombine.low %v11381_v50, %v11379_v61  ;;  %v9274_v36 = vld [vmem:[%s12596_s5 + $0x360] ss:$8 sps:$4 sm:$0xff]   ;;  %v9276_v33 = vld [vmem:[%s12596_s5 + $0x364] ss:$8 sps:$4 sm:$0xff]  }
 0x3d3   : > { %4042 = vmatprep.mubr.bf16.mxu0 %v7768_v29  ;;  %4189 = vmatprep.mubr.bf16.mxu1 %v7786_v32  ;;  %v4249_v23 = vrot.slane %v7837_v9, 2  ;;  %v4444_v7 = vrot.slane %v7887_v2, 2  ;;  %v9282_v29 = vld [vmem:[%s12596_s5 + $0x354] ss:$8 sps:$4 sm:$0xff]   ;;  %v9277_v61 = vld [vmem:[%s12596_s5 + $0x250] ss:$8 sps:$4 sm:$0xff]  }
 0x3d4   : > { %4043 = vmatmul.mubr.bf16.vlgmr.msra.gmra.mxu0 %v7767_v59  ;;  %v4251_v46 = vrot.slane %v7836_v56, 2  ;;  %4190 = vmatmul.mubr.bf16.vlgmr.msra.gmra.mxu1 %v7785_v27  ;;  %v4449_v19 = vsel %vm4247_vm14, %v4447_v1, %v4448_v5  ;;  %v4248_v14 = vrot.slane %v7835_v60, 2  ;;  %v9279_v59 = vld [vmem:[%s12596_s5 + $0x254] ss:$8 sps:$4 sm:$0xff]   ;;  %v9280_v50 = vld [vmem:[%s12596_s5 + $0x350] ss:$8 sps:$4 sm:$0xff]  }
 0x3d5   : > { %8623 = vmatpush3.bf16.msra.mxu0 %v9227_v38  ;;  %8645 = vmatpush3.bf16.msra.mxu1 %v9228_v39  ;;  %v4446_v10 = vsel %vm4247_vm14, %v4444_v7, %v4445_v42  ;;  %v9268_v38 = vld [vmem:[%s12596_s5 + $0x370] ss:$8 sps:$4 sm:$0xff]   ;;  %v9285_v0 = vld [vmem:[%s12596_s5 + $0x244] ss:$8 sps:$4 sm:$0xff]   ;;  %v9283_v5 = vld [vmem:[%s12596_s5 + $0x240] ss:$8 sps:$4 sm:$0xff]  }
 0x3d6   : > { %v4253_v17 = vsel %vm4247_vm14, %v4251_v46, %v4252_v6  ;;  %4580 = vmatprep.mubr.bf16.mxu1 %v4449_v19  ;;  %8624 = vmatprep.subr.bf16.mxu0 %v9233_v44  ;;  %v4250_v4 = vsel %vm4247_vm14, %v4248_v14, %v4249_v23  ;;  %v9288_v63 = vld [vmem:[%s12596_s5 + $0x344] ss:$8 sps:$4 sm:$0xff]   ;;  %v9286_v27 = vld [vmem:[%s12596_s5 + $0x340] ss:$8 sps:$4 sm:$0xff]   ;;  %v9291_v32 = vld [vmem:[%s12596_s5 + $0x234] ss:$8 sps:$4 sm:$0xff]  }
 0x3d7   : > { %4384 = vmatprep.mubr.bf16.mxu0 %v4253_v17  ;;  %8646 = vmatprep.subr.bf16.mxu1 %v9234_v20  ;;  %v9294_v39 = vld [vmem:[%s12596_s5 + $0x334] ss:$8 sps:$4 sm:$0xff]   ;;  %v9289_v56 = vld [vmem:[%s12596_s5 + $0x230] ss:$8 sps:$4 sm:$0xff]   ;;  %v9297_v1 = vld [vmem:[%s12596_s5 + $0x224] ss:$8 sps:$4 sm:$0xff]  }
 0x3d8   : > { %v9292_v3 = vld [vmem:[%s12596_s5 + $0x330] ss:$8 sps:$4 sm:$0xff]   ;;  %v9300_v44 = vld [vmem:[%s12596_s5 + $0x324] ss:$8 sps:$4 sm:$0xff]   ;;  %v9295_v46 = vld [vmem:[%s12596_s5 + $0x220] ss:$8 sps:$4 sm:$0xff]  }
 0x3d9   : > { %8625 = vmatpush3.bf16.msra.mxu0 %v9235_v62  ;;  %8647 = vmatpush3.bf16.msra.mxu1 %v9236_v26  ;;  %v9298_v6 = vld [vmem:[%s12596_s5 + $0x320] ss:$8 sps:$4 sm:$0xff]   ;;  %v9303_v20 = vld [vmem:[%s12596_s5 + $0x214] ss:$8 sps:$4 sm:$0xff]   ;;  %v9301_v62 = vld [vmem:[%s12596_s5 + $0x210] ss:$8 sps:$4 sm:$0xff]  }
 0x3da   : > { %8626 = vmatprep.subr.bf16.mxu0 %v9237_v35  ;;  %8648 = vmatprep.subr.bf16.mxu1 %v9238_v28  ;;  %v9306_v19 = vld [vmem:[%s12596_s5 + $0x314] ss:$8 sps:$4 sm:$0xff]   ;;  %v9304_v17 = vld [vmem:[%s12596_s5 + $0x310] ss:$8 sps:$4 sm:$0xff]   ;;  %v9309_v26 = vld [vmem:[%s12596_s5 + $0x204] ss:$8 sps:$4 sm:$0xff]  }
 0x3db   : > { %v9312_v35 = vld [vmem:[%s12596_s5 + $0x304] ss:$8 sps:$4 sm:$0xff]   ;;  %v9307_v28 = vld [vmem:[%s12596_s5 + $0x200] ss:$8 sps:$4 sm:$0xff]   ;;  %v9339_v9 = vld [vmem:[%s12596_s5 + $0x2b4] ss:$8 sps:$4 sm:$0xff]  }
 0x3dc   : > { %v9334_v60 = vld [vmem:[%s12596_s5 + $0x3c0] ss:$8 sps:$4 sm:$0xff]   ;;  %v9342_v2 = vld [vmem:[%s12596_s5 + $0x3b4] ss:$8 sps:$4 sm:$0xff]   ;;  %v9340_v14 = vld [vmem:[%s12596_s5 + $0x3b0] ss:$8 sps:$4 sm:$0xff]  }
 0x3dd   : > { %8627 = vmatpush3.bf16.msra.mxu0 %v9239_v52  ;;  %8649 = vmatpush3.bf16.msra.mxu1 %v9240_v58  ;;  %v9310_v52 = vld [vmem:[%s12596_s5 + $0x300] ss:$8 sps:$4 sm:$0xff]   ;;  %v9315_v58 = vld [vmem:[%s12596_s5 + $0x2f4] ss:$8 sps:$4 sm:$0xff]   ;;  %v9345_v23 = vld [vmem:[%s12596_s5 + $0x2a4] ss:$8 sps:$4 sm:$0xff]  }
 0x3de   : > { %8628 = vmatprep.subr.bf16.mxu0 %v9241_v53  ;;  %8650 = vmatprep.subr.bf16.mxu1 %v9242_v34  ;;  %v9318_v53 = vld [vmem:[%s12596_s5 + $0x3f4] ss:$8 sps:$4 sm:$0xff]   ;;  %v9313_v34 = vld [vmem:[%s12596_s5 + $0x2f0] ss:$8 sps:$4 sm:$0xff]   ;;  %v9348_v7 = vld [vmem:[%s12596_s5 + $0x3a4] ss:$8 sps:$4 sm:$0xff]  }
 0x3e1   : > { %8629 = vmatpush3.bf16.msra.mxu0 %v9243_v51  ;;  %8651 = vmatpush3.bf16.msra.mxu1 %v9244_v37  ;;  %v9316_v51 = vld [vmem:[%s12596_s5 + $0x3f0] ss:$8 sps:$4 sm:$0xff]   ;;  %v9321_v37 = vld [vmem:[%s12596_s5 + $0x2e4] ss:$8 sps:$4 sm:$0xff]  }
 0x3e2   : > { %8630 = vmatprep.subr.bf16.mxu0 %v9245_v13  ;;  %8652 = vmatprep.subr.bf16.mxu1 %v9246_v16  ;;  %v9324_v13 = vld [vmem:[%s12596_s5 + $0x3e4] ss:$8 sps:$4 sm:$0xff]   ;;  %v9319_v16 = vld [vmem:[%s12596_s5 + $0x2e0] ss:$8 sps:$4 sm:$0xff]  }
 0x3e5   : > { %8631 = vmatpush3.bf16.msra.mxu0 %v9247_v21  ;;  %8653 = vmatpush3.bf16.msra.mxu1 %v9248_v47  ;;  %v9322_v21 = vld [vmem:[%s12596_s5 + $0x3e0] ss:$8 sps:$4 sm:$0xff]   ;;  %v9327_v47 = vld [vmem:[%s12596_s5 + $0x2d4] ss:$8 sps:$4 sm:$0xff]  }
 0x3e6   : > { %8632 = vmatprep.subr.bf16.mxu0 %v9249_v49  ;;  %8654 = vmatprep.subr.bf16.mxu1 %v9250_v12  ;;  %v9330_v49 = vld [vmem:[%s12596_s5 + $0x3d4] ss:$8 sps:$4 sm:$0xff]  }
 0x3e9   : > { %8633 = vmatpush3.bf16.msra.mxu0 %v9251_v48  ;;  %8655 = vmatpush3.bf16.msra.mxu1 %v9252_v41  ;;  %v9325_v48 = vld [vmem:[%s12596_s5 + $0x2d0] ss:$8 sps:$4 sm:$0xff]  }
 0x3ea   : > { %8634 = vmatprep.subr.bf16.mxu0 %v9253_v55  ;;  %8656 = vmatprep.subr.bf16.mxu1 %v9254_v45  ;;  %v9328_v55 = vld [vmem:[%s12596_s5 + $0x3d0] ss:$8 sps:$4 sm:$0xff]   ;;  %v9333_v45 = vld [vmem:[%s12596_s5 + $0x2c4] ss:$8 sps:$4 sm:$0xff]  }
 0x3ed   : > { %8635 = vmatpush3.bf16.msra.mxu0 %v9255_v57  ;;  %8657 = vmatpush3.bf16.msra.mxu1 %v9256_v40  ;;  %v9336_v57 = vld [vmem:[%s12596_s5 + $0x3c4] ss:$8 sps:$4 sm:$0xff]  }
 0x3ee   : > { %8636 = vmatprep.subr.bf16.mxu0 %v9257_v24  ;;  %8658 = vmatprep.subr.bf16.mxu1 %v9258_v15  ;;  %v9331_v24 = vld [vmem:[%s12596_s5 + $0x2c0] ss:$8 sps:$4 sm:$0xff]  }
 0x3f1   : > { %8637 = vmatpush3.bf16.msra.mxu0 %v9259_v54  ;;  %8659 = vmatpush3.bf16.msra.mxu1 %v9260_v30  ;;  %v9337_v54 = vld [vmem:[%s12596_s5 + $0x2b0] ss:$8 sps:$4 sm:$0xff]  }
 0x3f2   : > { %5165 = vmatprep.subr.bf16.mxu0 %v9267_v18  ;;  %5206 = vmatprep.subr.bf16.mxu1 %v9270_v43  ;;  %v9343_v18 = vld [vmem:[%s12596_s5 + $0x2a0] ss:$8 sps:$4 sm:$0xff]  }
 0x3f4   : > { %4385 = vmatmul.mubr.bf16.vlgmr.msra.gmra.mxu0 %v4250_v4  ;;  %4581 = vmatmul.mubr.bf16.vlgmr.msra.gmra.mxu1 %v4446_v10 }
 0x3f5   : > { %5166 = vmatpush1.bf16.msra.mxu0 %v9265_v31  ;;  %5207 = vmatpush1.bf16.msra.mxu1 %v9268_v38  ;;  %v9346_v31 = vld [vmem:[%s12596_s5 + $0x3a0] ss:$8 sps:$4 sm:$0xff]   ;;  %v9351_v38 = vld [vmem:[%s12596_s5 + $0x294] ss:$8 sps:$4 sm:$0xff]  }
 0x3f6   : > { %5167 = vmatprep.subr.bf16.mxu0 %v9273_v22  ;;  %5208 = vmatprep.subr.bf16.mxu1 %v9276_v33  ;;  %v9354_v22 = vld [vmem:[%s12596_s5 + $0x394] ss:$8 sps:$4 sm:$0xff]  }
 0x3f9   : > { %5168 = vmatpush1.bf16.msra.mxu0 %v9271_v25  ;;  %5209 = vmatpush1.bf16.msra.mxu1 %v9274_v36 }
 0x3fa   : > { %5169 = vmatprep.subr.bf16.mxu0 %v9279_v59  ;;  %5210 = vmatprep.subr.bf16.mxu1 %v9282_v29  ;;  %v9349_v29 = vld [vmem:[%s12596_s5 + $0x290] ss:$8 sps:$4 sm:$0xff]  }
 0x3fd   : > { %5170 = vmatpush1.bf16.msra.mxu0 %v9277_v61  ;;  %5211 = vmatpush1.bf16.msra.mxu1 %v9280_v50 }
 0x3fe   : > { %5171 = vmatprep.subr.bf16.mxu0 %v9285_v0  ;;  %5212 = vmatprep.subr.bf16.mxu1 %v9288_v63 }
 0x401   : > { %5172 = vmatpush1.bf16.msra.mxu0 %v9283_v5  ;;  %5213 = vmatpush1.bf16.msra.mxu1 %v9286_v27  ;;  %v9352_v5 = vld [vmem:[%s12596_s5 + $0x390] ss:$8 sps:$4 sm:$0xff]   ;;  %v9357_v27 = vld [vmem:[%s12596_s5 + $0x284] ss:$8 sps:$4 sm:$0xff]  }
 0x402   : > { %5173 = vmatprep.subr.bf16.mxu0 %v9291_v32  ;;  %5214 = vmatprep.subr.bf16.mxu1 %v9294_v39  ;;  %v9360_v39 = vld [vmem:[%s12596_s5 + $0x384] ss:$8 sps:$4 sm:$0xff]  }
 0x405   : > { %5174 = vmatpush1.bf16.msra.mxu0 %v9289_v56  ;;  %5215 = vmatpush1.bf16.msra.mxu1 %v9292_v3 }
 0x406   : > { %5175 = vmatprep.subr.bf16.mxu0 %v9297_v1  ;;  %5216 = vmatprep.subr.bf16.mxu1 %v9300_v44  ;;  %v9355_v44 = vld [vmem:[%s12596_s5 + $0x280] ss:$8 sps:$4 sm:$0xff]  }
 0x409   : > { %5176 = vmatpush1.bf16.msra.mxu0 %v9295_v46  ;;  %5217 = vmatpush1.bf16.msra.mxu1 %v9298_v6 }
 0x40a   : > { %5177 = vmatprep.subr.bf16.mxu0 %v9303_v20  ;;  %5218 = vmatprep.subr.bf16.mxu1 %v9306_v19 }
 0x40d   : > { %5178 = vmatpush1.bf16.msra.mxu0 %v9301_v62  ;;  %5219 = vmatpush1.bf16.msra.mxu1 %v9304_v17  ;;  %v9358_v62 = vld [vmem:[%s12596_s5 + $0x380] ss:$8 sps:$4 sm:$0xff]   ;;  %v9367_v17 = vld [vmem:[%s12596_s5 + $0x74] ss:$8 sps:$4 sm:$0xff]  }
 0x40e   : > { %5179 = vmatprep.subr.bf16.mxu0 %v9309_v26  ;;  %5220 = vmatprep.subr.bf16.mxu1 %v9312_v35  ;;  %v9370_v26 = vld [vmem:[%s12596_s5 + $0x174] ss:$8 sps:$4 sm:$0xff]  }
 0x411   : > { %5180 = vmatpush1.bf16.msra.mxu0 %v9307_v28  ;;  %5221 = vmatpush1.bf16.msra.mxu1 %v9310_v52 }
 0x412   : > { %5181 = vmatprep.subr.bf16.mxu0 %v9315_v58  ;;  %5222 = vmatprep.subr.bf16.mxu1 %v9318_v53  ;;  %v7907_v58 = vld [vmem:[%s12600_s9] ss:$0 sm:$0xff] }
 0x415   : > { %5182 = vmatpush2.bf16.msra.mxu0 %v9313_v34  ;;  %5223 = vmatpush2.bf16.msra.mxu1 %v9316_v51 }
 0x416   : > { %5183 = vmatprep.subr.bf16.mxu0 %v9321_v37  ;;  %5224 = vmatprep.subr.bf16.mxu1 %v9324_v13 }
 0x419   : > { %5184 = vmatpush2.bf16.msra.mxu0 %v9319_v16  ;;  %5225 = vmatpush2.bf16.msra.mxu1 %v9322_v21 }
 0x41a   : > { %5185 = vmatprep.subr.bf16.mxu0 %v9327_v47  ;;  %5226 = vmatprep.subr.bf16.mxu1 %v9330_v49 }
 0x41d   : > { %5186 = vmatpush2.bf16.msra.mxu0 %v9325_v48  ;;  %5227 = vmatpush2.bf16.msra.mxu1 %v9328_v55 }
 0x41e   : > { %5187 = vmatprep.subr.bf16.mxu0 %v9333_v45  ;;  %5228 = vmatprep.subr.bf16.mxu1 %v9336_v57 }
 0x421   : > { %5188 = vmatpush2.bf16.msra.mxu0 %v9331_v24  ;;  %5229 = vmatpush2.bf16.msra.mxu1 %v9334_v60 }
 0x422   : > { %5189 = vmatprep.subr.bf16.mxu0 %v9339_v9  ;;  %5230 = vmatprep.subr.bf16.mxu1 %v9342_v2 }
 0x425   : > { %5190 = vmatpush2.bf16.msra.mxu0 %v9337_v54  ;;  %5231 = vmatpush2.bf16.msra.mxu1 %v9340_v14 }
 0x426   : > { %5191 = vmatprep.subr.bf16.mxu0 %v9345_v23  ;;  %5232 = vmatprep.subr.bf16.mxu1 %v9348_v7 }
 0x429   : > { %5192 = vmatpush2.bf16.msra.mxu0 %v9343_v18  ;;  %5233 = vmatpush2.bf16.msra.mxu1 %v9346_v31 }
 0x42a   : > { %5193 = vmatprep.subr.bf16.mxu0 %v9351_v38  ;;  %5234 = vmatprep.subr.bf16.mxu1 %v9354_v22 }
 0x42d   : > { %5194 = vmatpush2.bf16.msra.mxu0 %v9349_v29  ;;  %5235 = vmatpush2.bf16.msra.mxu1 %v9352_v5 }
 0x42e   : > { %5195 = vmatprep.subr.bf16.mxu0 %v9357_v27  ;;  %5236 = vmatprep.subr.bf16.mxu1 %v9360_v39 }
 0x431   : > { %5196 = vmatpush2.bf16.msra.mxu0 %v9355_v44  ;;  %5237 = vmatpush2.bf16.msra.mxu1 %v9358_v62  ;;  %v9377_v62 = vld [vmem:[%s12596_s5 + $0x64] ss:$8 sps:$4 sm:$0xff]  }
 0x432   : > { %5581 = vmatprep.subr.bf16.mxu0 %v9367_v17  ;;  %5622 = vmatprep.subr.bf16.mxu1 %v9370_v26  ;;  %v9380_v17 = vld [vmem:[%s12596_s5 + $0x164] ss:$8 sps:$4 sm:$0xff]  }
 0x494   : > { %v8594_v12 = vpop.f32.mrf.mxu0  ;;  %v8616_v41 = vpop.f32.mrf.mxu1 }
 0x496   : > { %v8595_v40 = vpop.f32.mrf.mxu0  ;;  %v8617_v15 = vpop.f32.mrf.mxu1 }
 0x497   : > { %v8596_v42 = vadd.f32 %v8595_v40, %v8594_v12  ;;  %v8618_v4 = vadd.f32 %v8617_v15, %v8616_v41 }
 0x498   : > { %v8597_v8 = vpop.f32.mrf.mxu0  ;;  %v8619_v30 = vpop.f32.mrf.mxu1 }
 0x499   : > { %v4192_v33 = vadd.f32 %v8618_v4, %v8596_v42 }
 0x49a   : > { %v8598_v10 = vpop.f32.mrf.mxu0  ;;  %v8620_v43 = vpop.f32.mrf.mxu1 }
 0x49b   : > { %v8599_v61 = vadd.f32 %v8598_v10, %v8597_v8  ;;  %v8621_v50 = vadd.f32 %v8620_v43, %v8619_v30  ;;  %v4644_v43 = vand.u32 1, %v10064_v11 }
 0x49d   : > { %v4195_v46 = vadd.f32 %v8621_v50, %v8599_v61  ;;  %vm4652_vm4 = vcmp.eq.s32.totalorder %v4644_v43, 0  ;;  %vm4660_vm2 = vcmp.eq.s32.totalorder %v4644_v43, 1  ;;  %v9431_v43 = vld [vmem:[%s12596_s5 + $0xd4] ss:$8 sps:$4 sm:$0xff]  }
 0x4b4   : > { %v8638_v25 = vpop.f32.mrf.mxu0  ;;  %v8660_v36 = vpop.f32.mrf.mxu1 }
 0x4b6   : > { %v8639_v59 = vpop.f32.mrf.mxu0  ;;  %v8661_v63 = vpop.f32.mrf.mxu1 }
 0x4b7   : > { %v8640_v0 = vadd.f32 %v8639_v59, %v8638_v25  ;;  %v8662_v6 = vadd.f32 %v8661_v63, %v8660_v36 }
 0x4b8   : > { %v8641_v32 = vpop.f32.mrf.mxu0  ;;  %v8663_v3 = vpop.f32.mrf.mxu1 }
 0x4b9   : > { %v4393_v56 = vadd.f32 %v8640_v0, %v4192_v33 }
 0x4ba   : > { %v8642_v1 = vpop.f32.mrf.mxu0  ;;  %v8664_v19 = vpop.f32.mrf.mxu1 }
 0x4bb   : > { %v8643_v20 = vadd.f32 %v8642_v1, %v8641_v32  ;;  %v4589_v35 = vadd.f32 %v8662_v6, %v4393_v56  ;;  %v8665_v52 = vadd.f32 %v8664_v19, %v8663_v3  ;;  %v9365_v56 = vld [vmem:[%s12596_s5 + $0x70] ss:$8 sps:$4 sm:$0xff]  }
 0x4bc   : > { %v9368_v6 = vld [vmem:[%s12596_s5 + $0x170] ss:$8 sps:$4 sm:$0xff]  }
 0x4bd   : > { %v4394_v28 = vadd.f32 %v8643_v20, %v4195_v46  ;;  %v4598_v34 = vadd.f32 %v7907_v58, %v4589_v35 }
 0x4bf   : > { %v4590_v53 = vadd.f32 %v8665_v52, %v4394_v28  ;;  %v9375_v28 = vld [vmem:[%s12596_s5 + $0x60] ss:$8 sps:$4 sm:$0xff]  }
 0x4c0   : > { %v9378_v52 = vld [vmem:[%s12596_s5 + $0x160] ss:$8 sps:$4 sm:$0xff]  }
 0x4c1   : > { %v4599_v51 = vadd.f32 %v7907_v58, %v4590_v53  ;;  %v9383_v58 = vld [vmem:[%s12596_s5 + $0x54] ss:$8 sps:$4 sm:$0xff]  }
 0x4c2   : > { %v9386_v53 = vld [vmem:[%s12596_s5 + $0x154] ss:$8 sps:$4 sm:$0xff]  }
 0x4c3   : > { %v4600_v37 = vadd.f32 %v4599_v51, %v4598_v34 }
 0x4c5   : > { %v4601_v13 = vrot.slane %v4600_v37, 4 }
 0x4c7   : > { %v4602_v16 = vadd.f32 %v4601_v13, %v4600_v37  ;;  %v9389_v37 = vld [vmem:[%s12596_s5 + $0x44] ss:$8 sps:$4 sm:$0xff]  }
 0x4c8   : > { %v9392_v13 = vld [vmem:[%s12596_s5 + $0x144] ss:$8 sps:$4 sm:$0xff]  }
 0x4c9   : > { %v4603_v21 = vrot.slane %v4602_v16, 2 }
 0x4cb   : > { %v4604_v47 = vadd.f32 %v4603_v21, %v4602_v16  ;;  %v9387_v16 = vld [vmem:[%s12596_s5 + $0x40] ss:$8 sps:$4 sm:$0xff]  }
 0x4cc   : > { %v9390_v21 = vld [vmem:[%s12596_s5 + $0x140] ss:$8 sps:$4 sm:$0xff]  }
 0x4cd   : > { %v4605_v49 = vrot.slane %v4604_v47, 1 }
 0x4cf   : > { %v4606_v12 = vadd.f32 %v4605_v49, %v4604_v47  ;;  %v9395_v47 = vld [vmem:[%s12596_s5 + $0x34] ss:$8 sps:$4 sm:$0xff]  }
 0x4d0   : > { %v9398_v49 = vld [vmem:[%s12596_s5 + $0x134] ss:$8 sps:$4 sm:$0xff]  }
 0x4d1   : > { %v4608_v48 = vmul.f32 0.0625, %v4606_v12  ;;  %v9393_v12 = vld [vmem:[%s12596_s5 + $0x30] ss:$8 sps:$4 sm:$0xff]  }
 0x4d3   : > { %v4609_v41 = vsub.f32 %v4598_v34, %v4608_v48  ;;  %v4610_v55 = vsub.f32 %v4599_v51, %v4608_v48  ;;  %v9381_v34 = vld [vmem:[%s12596_s5 + $0x50] ss:$8 sps:$4 sm:$0xff]  }
 0x4d4   : > { %v9384_v51 = vld [vmem:[%s12596_s5 + $0x150] ss:$8 sps:$4 sm:$0xff]  }
 0x4d5   : > { %v4611_v45 = vmul.f32 %v4609_v41, %v4609_v41  ;;  %v4612_v57 = vmul.f32 %v4610_v55, %v4610_v55  ;;  %v9396_v48 = vld [vmem:[%s12596_s5 + $0x130] ss:$8 sps:$4 sm:$0xff]  }
 0x4d7   : > { %v4613_v40 = vadd.f32 %v4612_v57, %v4611_v45  ;;  %v9399_v45 = vld [vmem:[%s12596_s5 + $0x20] ss:$8 sps:$4 sm:$0xff]  }
 0x4d8   : > { %v9402_v57 = vld [vmem:[%s12596_s5 + $0x120] ss:$8 sps:$4 sm:$0xff]  }
 0x4d9   : > { %v4614_v24 = vrot.slane %v4613_v40, 4 }
 0x4db   : > { %v4615_v15 = vadd.f32 %v4614_v24, %v4613_v40  ;;  %v9407_v40 = vld [vmem:[%s12596_s5 + $0x14] ss:$8 sps:$4 sm:$0xff]  }
 0x4dc   : > { %v9410_v24 = vld [vmem:[%s12596_s5 + $0x114] ss:$8 sps:$4 sm:$0xff]  }
 0x4dd   : > { %v4616_v60 = vrot.slane %v4615_v15, 2 }
 0x4df   : > { %v4617_v9 = vadd.f32 %v4616_v60, %v4615_v15  ;;  %v9405_v15 = vld [vmem:[%s12596_s5 + $0x10] ss:$8 sps:$4 sm:$0xff]  }
 0x4e0   : > { %v9408_v60 = vld [vmem:[%s12596_s5 + $0x110] ss:$8 sps:$4 sm:$0xff]  }
 0x4e1   : > { %v4618_v2 = vrot.slane %v4617_v9, 1 }
 0x4e3   : > { %v4619_v8 = vadd.f32 %v4618_v2, %v4617_v9  ;;  %v9413_v9 = vld [vmem:[%s12596_s5 + $0x4] ss:$8 sps:$4 sm:$0xff]  }
 0x4e4   : > { %v9416_v2 = vld [vmem:[%s12596_s5 + $0x104] ss:$8 sps:$4 sm:$0xff]  }
 0x4e5   : > { %v4620_v54 = vmul.f32 0.0625, %v4619_v8  ;;  %v9411_v8 = vld [vmem:[%s12596_s5] ss:$8 sps:$4 sm:$0xff]  }
 0x4e7   : > { %v4621_v30 = vadd.f32 1e-05, %v4620_v54  ;;  %v9414_v54 = vld [vmem:[%s12596_s5 + $0x100] ss:$8 sps:$4 sm:$0xff]  }
 0x4e9   : > { %9667 = vrsqrt.f32 %v4621_v30  ;;  %v9419_v30 = vld [vmem:[%s12596_s5 + $0xf4] ss:$8 sps:$4 sm:$0xff]  }
 0x4f6   : > { %v9668_v14 = vpop.eup %9667 }
 0x4f7   : > { %v4623_v23 = vmul.f32 %v9668_v14, %v4609_v41  ;;  %v4624_v7 = vmul.f32 %v9668_v14, %v4610_v55  ;;  %v9401_v41 = vld [vmem:[%s12596_s5 + $0x24] ss:$8 sps:$4 sm:$0xff]   ;;  %v9422_v14 = vld [vmem:[%s12596_s5 + $0x1f4] ss:$8 sps:$4 sm:$0xff]  }
 0x4f8   : > { %v9404_v55 = vld [vmem:[%s12596_s5 + $0x124] ss:$8 sps:$4 sm:$0xff]  }
 0x4f9   : > { %vm4625_vm5 = vcmp.gt.f32.partialorder %v4623_v23, 0.0  ;;  %vm4626_vm1 = vcmp.gt.f32.partialorder %v4624_v7, 0.0  ;;  %v4627_v42 = vmul.f32 0.2, %v4623_v23  ;;  %v4628_v4 = vmul.f32 0.2, %v4624_v7 }
 0x4fb   : > { %v4629_v10 = vsel %vm4625_vm5, %v4623_v23, %v4627_v42  ;;  %v4630_v18 = vsel %vm4626_vm1, %v4624_v7, %v4628_v4  ;;  %v9417_v23 = vld [vmem:[%s12596_s5 + $0xf0] ss:$8 sps:$4 sm:$0xff]   ;;  %v9425_v42 = vld [vmem:[%s12596_s5 + $0xe4] ss:$8 sps:$4 sm:$0xff]   ;;  %vm7356_vm5 = vcmask 1041408   ;;  %vm7379_vm1 = vcmask 1041409  }
 0x4fc   : > { %4631 = vst [vmem:[#allocation8] sm:$0xff] %v4629_v10  ;;  %4632 = vst [vmem:[#allocation8 + $0x8] sm:$0xff] %v4630_v18  ;;  %v9420_v7 = vld [vmem:[%s12596_s5 + $0x1f0] ss:$8 sps:$4 sm:$0xff]   ;;  %v9428_v4 = vld [vmem:[%s12596_s5 + $0x1e4] ss:$8 sps:$4 sm:$0xff]  }
 0x4fd   : > { %v9423_v10 = vld [vmem:[%s12596_s5 + $0xe0] ss:$8 sps:$4 sm:$0xff]  }
 0x4fe   : > { %v9426_v18 = vld [vmem:[%s12596_s5 + $0x1e0] ss:$8 sps:$4 sm:$0xff]  }
 0x503   : > { %v4635_v31 = vld [vmem:[#allocation8 + $0x1] ss:$2 sm:$0xff]  ;;  %v4633_v38 = vld [vmem:[#allocation8] ss:$2 sm:$0xff] }
 0x504   : > { %v4637_v25 = vrot.slane %v4635_v31, 7  ;;  %v4657_v22 = vrot.slane %v4633_v38, 1 }
 0x506   : > { %v4639_v36 = vsel %vm12918_vm3, 0.0, %v4637_v25  ;;  %v4659_v33 = vsel %vm12919_vm11, %v4657_v22, 0.0  ;;  %v9432_v25 = vld [vmem:[%s12596_s5 + $0x1d0] ss:$8 sps:$4 sm:$0xff]   ;;  %v9437_v22 = vld [vmem:[%s12596_s5 + $0xc4] ss:$8 sps:$4 sm:$0xff]  }
 0x507   : > { %v4655_v59 = vsel %vm4652_vm4, 0.0, %v4639_v36  ;;  %v4663_v29 = vsel %vm4660_vm2, 0.0, %v4659_v33  ;;  %v9440_v36 = vld [vmem:[%s12596_s5 + $0x1c4] ss:$8 sps:$4 sm:$0xff]   ;;  %v9435_v33 = vld [vmem:[%s12596_s5 + $0xc0] ss:$8 sps:$4 sm:$0xff]  }
 0x508   : > { %v8405_v61 = vpack.c.bf16 %v4633_v38, %v4655_v59  ;;  %v8406_v50 = vpack.c.bf16 %v4663_v29, %v4635_v31  ;;  %v9434_v31 = vld [vmem:[%s12596_s5 + $0x1d4] ss:$8 sps:$4 sm:$0xff]   ;;  %v9429_v38 = vld [vmem:[%s12596_s5 + $0xd0] ss:$8 sps:$4 sm:$0xff]   ;;  %v9438_v59 = vld [vmem:[%s12596_s5 + $0x1c0] ss:$8 sps:$4 sm:$0xff]  }
 0x509   : > { %v9443_v29 = vld [vmem:[%s12596_s5 + $0xb4] ss:$8 sps:$4 sm:$0xff]   ;;  %vm7382_vm4 = vcmask 9216  }
 0x50a   : > { %4684 = vst [vmem:[#allocation10 + $0x8] sm:$0x11] %v8405_v61  ;;  %v4688_v0 = vrot.slane %v8405_v61, 5  ;;  %4686 = vst [vmem:[#allocation9] sm:$0x22] %v8405_v61  ;;  %v4690_v63 = vrot.slane %v8406_v50, 5 }
 0x50b   : > { %4685 = vst [vmem:[#allocation10] sm:$0x11] %v8406_v50  ;;  %4687 = vst [vmem:[#allocation9 + $0x8] sm:$0x22] %v8406_v50  ;;  %v9446_v61 = vld [vmem:[%s12596_s5 + $0x1b4] ss:$8 sps:$4 sm:$0xff]  }
 0x50c   : > { %v4689_v5 = vrot.slane %v4688_v0, 4  ;;  %v4691_v27 = vrot.slane %v4690_v63, 4  ;;  %v9441_v50 = vld [vmem:[%s12596_s5 + $0xb0] ss:$8 sps:$4 sm:$0xff]   ;;  %v9449_v63 = vld [vmem:[%s12596_s5 + $0xa4] ss:$8 sps:$4 sm:$0xff]  }
 0x50d   : > { %v9444_v0 = vld [vmem:[%s12596_s5 + $0x1b0] ss:$8 sps:$4 sm:$0xff]  }
 0x50e   : > { %4694 = vst [vmem:[#allocation10 + $0x8] sm:$0x22] %v4689_v5  ;;  %4696 = vst [vmem:[#allocation9] sm:$0x44] %v4689_v5  ;;  %v9452_v5 = vld [vmem:[%s12596_s5 + $0x1a4] ss:$8 sps:$4 sm:$0xff]  }
 0x50f   : > { %4695 = vst [vmem:[#allocation10] sm:$0x22] %v4691_v27  ;;  %4697 = vst [vmem:[#allocation9 + $0x8] sm:$0x44] %v4691_v27  ;;  %v9447_v27 = vld [vmem:[%s12596_s5 + $0xa0] ss:$8 sps:$4 sm:$0xff]  }
 0x511   : > { %v11702_v20 = vld [vmem:[#allocation9] sm:$0x33] }
 0x512   : > { %v11704_v19 = vld [vmem:[#allocation9 + $0x8] sm:$0x33]  ;;  %v8043_v26 = vcombine.high %v11702_v20, %v11702_v20 }
 0x513   : > { %v8045_v35 = vcombine.high %v11704_v19, %v11704_v19 }
 0x515   : > { %v4764_v32 = vld [vmem:[#allocation10 + $0x8] sm:$0x33] }
 0x516   : > { %v4765_v39 = vld [vmem:[#allocation10] sm:$0x33]  ;;  %v7974_v3 = vcombine.low %v4764_v32, %v4764_v32  ;;  %v7975_v1 = vcombine.high %v4764_v32, %v4764_v32  ;;  %v9450_v32 = vld [vmem:[%s12596_s5 + $0x1a0] ss:$8 sps:$4 sm:$0xff]  }
 0x517   : > { %v7976_v44 = vcombine.low %v4765_v39, %v4765_v39  ;;  %v7977_v46 = vcombine.high %v4765_v39, %v4765_v39  ;;  %v9455_v39 = vld [vmem:[%s12596_s5 + $0x94] ss:$8 sps:$4 sm:$0xff]  }
 0x518   : > { %5197 = vmatprep.mubr.bf16.mxu0 %v7975_v1  ;;  %v9456_v1 = vld [vmem:[%s12596_s5 + $0x190] ss:$8 sps:$4 sm:$0xff]  }
 0x519   : > { %5238 = vmatprep.mubr.bf16.mxu1 %v7977_v46  ;;  %5198 = vmatmul.mubr.bf16.vlgmr.msra.gmra.mxu0 %v7974_v3  ;;  %v9453_v3 = vld [vmem:[%s12596_s5 + $0x90] ss:$8 sps:$4 sm:$0xff]   ;;  %v9464_v46 = vld [vmem:[%s12596_s5 + $0x184] ss:$8 sps:$4 sm:$0xff]  }
 0x51a   : > { %5239 = vmatmul.mubr.bf16.vlgmr.msra.gmra.mxu1 %v7976_v44  ;;  %5582 = vmatpush1.bf16.msra.mxu0 %v9365_v56  ;;  %v9458_v56 = vld [vmem:[%s12596_s5 + $0x194] ss:$8 sps:$4 sm:$0xff]   ;;  %v9461_v44 = vld [vmem:[%s12596_s5 + $0x84] ss:$8 sps:$4 sm:$0xff]  }
 0x51b   : > { %5623 = vmatpush1.bf16.msra.mxu1 %v9368_v6  ;;  %5613 = vmatprep.mubr.bf16.mxu0 %v8043_v26  ;;  %v11884_v6 = vld [vmem:[#allocation9] sm:$0x66]  ;;  %v11892_v26 = vld [vmem:[#allocation9 + $0x8] sm:$0x66] }
 0x51c   : > { %5654 = vmatprep.mubr.bf16.mxu1 %v8045_v35  ;;  %5583 = vmatprep.subr.bf16.mxu0 %v9377_v62  ;;  %v9459_v62 = vld [vmem:[%s12596_s5 + $0x80] ss:$8 sps:$4 sm:$0xff]   ;;  %v9467_v35 = vld [vmem:[%s12596_s5 + $0x474] ss:$8 sps:$4 sm:$0xff]  }
 0x51d   : > { %5624 = vmatprep.subr.bf16.mxu1 %v9380_v17  ;;  %v9462_v17 = vld [vmem:[%s12596_s5 + $0x180] ss:$8 sps:$4 sm:$0xff]  }
 0x51e   : > { %5584 = vmatpush1.bf16.msra.mxu0 %v9375_v28  ;;  %v9470_v28 = vld [vmem:[%s12596_s5 + $0x574] ss:$8 sps:$4 sm:$0xff]  }
 0x51f   : > { %5625 = vmatpush1.bf16.msra.mxu1 %v9378_v52  ;;  %5585 = vmatprep.subr.bf16.mxu0 %v9383_v58  ;;  %v8175_v52 = vcombine.high %v11884_v6, %v11884_v6  ;;  %v8177_v58 = vcombine.high %v11892_v26, %v11892_v26 }
 0x520   : > { %5626 = vmatprep.subr.bf16.mxu1 %v9386_v53  ;;  %v9465_v53 = vld [vmem:[%s12596_s5 + $0x470] ss:$8 sps:$4 sm:$0xff]  }
 0x522   : > { %5586 = vmatpush1.bf16.msra.mxu0 %v9381_v34  ;;  %v8042_v34 = vcombine.low %v11702_v20, %v11702_v20  ;;  %v5743_v20 = vrot.slane %v8177_v58, 1  ;;  %v9553_v58 = vld [vmem:[%s12596_s5 + $0x490] ss:$8 sps:$4 sm:$0xff]  }
 0x523   : > { %5627 = vmatpush1.bf16.msra.mxu1 %v9384_v51  ;;  %5587 = vmatprep.subr.bf16.mxu0 %v9389_v37  ;;  %v8044_v51 = vcombine.low %v11704_v19, %v11704_v19  ;;  %v9468_v37 = vld [vmem:[%s12596_s5 + $0x570] ss:$8 sps:$4 sm:$0xff]   ;;  %v9475_v19 = vld [vmem:[%s12596_s5 + $0x460] ss:$8 sps:$4 sm:$0xff]  }
 0x524   : > { %5628 = vmatprep.subr.bf16.mxu1 %v9392_v13  ;;  %v5741_v13 = vrot.slane %v8175_v52, 1  ;;  %v9558_v52 = vld [vmem:[%s12596_s5 + $0x594] ss:$8 sps:$4 sm:$0xff]  }
 0x526   : > { %5588 = vmatpush1.bf16.msra.mxu0 %v9387_v16  ;;  %v9477_v16 = vld [vmem:[%s12596_s5 + $0x464] ss:$8 sps:$4 sm:$0xff]  }
 0x527   : > { %5629 = vmatpush1.bf16.msra.mxu1 %v9390_v21  ;;  %5589 = vmatprep.subr.bf16.mxu0 %v9395_v47  ;;  %v9480_v21 = vld [vmem:[%s12596_s5 + $0x564] ss:$8 sps:$4 sm:$0xff]   ;;  %v9478_v47 = vld [vmem:[%s12596_s5 + $0x560] ss:$8 sps:$4 sm:$0xff]  }
 0x528   : > { %5630 = vmatprep.subr.bf16.mxu1 %v9398_v49  ;;  %v9483_v49 = vld [vmem:[%s12596_s5 + $0x454] ss:$8 sps:$4 sm:$0xff]  }
 0x52a   : > { %5590 = vmatpush1.bf16.msra.mxu0 %v9393_v12  ;;  %v9486_v12 = vld [vmem:[%s12596_s5 + $0x554] ss:$8 sps:$4 sm:$0xff]  }
 0x52b   : > { %5631 = vmatpush1.bf16.msra.mxu1 %v9396_v48  ;;  %5591 = vmatprep.subr.bf16.mxu0 %v9401_v41  ;;  %v9481_v48 = vld [vmem:[%s12596_s5 + $0x450] ss:$8 sps:$4 sm:$0xff]  }
 0x52c   : > { %5632 = vmatprep.subr.bf16.mxu1 %v9404_v55  ;;  %v9484_v41 = vld [vmem:[%s12596_s5 + $0x550] ss:$8 sps:$4 sm:$0xff]   ;;  %v9489_v55 = vld [vmem:[%s12596_s5 + $0x444] ss:$8 sps:$4 sm:$0xff]  }
 0x52e   : > { %5592 = vmatpush1.bf16.msra.mxu0 %v9399_v45  ;;  %v9492_v45 = vld [vmem:[%s12596_s5 + $0x544] ss:$8 sps:$4 sm:$0xff]  }
 0x52f   : > { %5633 = vmatpush1.bf16.msra.mxu1 %v9402_v57  ;;  %5593 = vmatprep.subr.bf16.mxu0 %v9407_v40  ;;  %v9487_v57 = vld [vmem:[%s12596_s5 + $0x440] ss:$8 sps:$4 sm:$0xff]  }
 0x530   : > { %5634 = vmatprep.subr.bf16.mxu1 %v9410_v24  ;;  %v9490_v40 = vld [vmem:[%s12596_s5 + $0x540] ss:$8 sps:$4 sm:$0xff]   ;;  %v9495_v24 = vld [vmem:[%s12596_s5 + $0x434] ss:$8 sps:$4 sm:$0xff]  }
 0x532   : > { %5594 = vmatpush1.bf16.msra.mxu0 %v9405_v15  ;;  %v9498_v15 = vld [vmem:[%s12596_s5 + $0x534] ss:$8 sps:$4 sm:$0xff]  }
 0x533   : > { %5635 = vmatpush1.bf16.msra.mxu1 %v9408_v60  ;;  %5595 = vmatprep.subr.bf16.mxu0 %v9413_v9  ;;  %v9493_v60 = vld [vmem:[%s12596_s5 + $0x430] ss:$8 sps:$4 sm:$0xff]  }
 0x534   : > { %5636 = vmatprep.subr.bf16.mxu1 %v9416_v2  ;;  %v9496_v9 = vld [vmem:[%s12596_s5 + $0x530] ss:$8 sps:$4 sm:$0xff]   ;;  %v9501_v2 = vld [vmem:[%s12596_s5 + $0x424] ss:$8 sps:$4 sm:$0xff]  }
 0x536   : > { %5596 = vmatpush1.bf16.msra.mxu0 %v9411_v8  ;;  %v9504_v8 = vld [vmem:[%s12596_s5 + $0x524] ss:$8 sps:$4 sm:$0xff]  }
 0x537   : > { %5637 = vmatpush1.bf16.msra.mxu1 %v9414_v54  ;;  %5597 = vmatprep.subr.bf16.mxu0 %v9419_v30  ;;  %v9499_v54 = vld [vmem:[%s12596_s5 + $0x420] ss:$8 sps:$4 sm:$0xff]  }
 0x538   : > { %5638 = vmatprep.subr.bf16.mxu1 %v9422_v14  ;;  %v9502_v30 = vld [vmem:[%s12596_s5 + $0x520] ss:$8 sps:$4 sm:$0xff]   ;;  %v9507_v14 = vld [vmem:[%s12596_s5 + $0x414] ss:$8 sps:$4 sm:$0xff]  }
 0x53a   : > { %5598 = vmatpush2.bf16.msra.mxu0 %v9417_v23  ;;  %v9510_v23 = vld [vmem:[%s12596_s5 + $0x514] ss:$8 sps:$4 sm:$0xff]  }
 0x53b   : > { %5639 = vmatpush2.bf16.msra.mxu1 %v9420_v7  ;;  %5599 = vmatprep.subr.bf16.mxu0 %v9425_v42  ;;  %v9505_v7 = vld [vmem:[%s12596_s5 + $0x410] ss:$8 sps:$4 sm:$0xff]  }
 0x53c   : > { %5640 = vmatprep.subr.bf16.mxu1 %v9428_v4  ;;  %v9508_v42 = vld [vmem:[%s12596_s5 + $0x510] ss:$8 sps:$4 sm:$0xff]   ;;  %v9513_v4 = vld [vmem:[%s12596_s5 + $0x404] ss:$8 sps:$4 sm:$0xff]  }
 0x53e   : > { %5600 = vmatpush2.bf16.msra.mxu0 %v9423_v10  ;;  %v9516_v10 = vld [vmem:[%s12596_s5 + $0x504] ss:$8 sps:$4 sm:$0xff]  }
 0x53f   : > { %5641 = vmatpush2.bf16.msra.mxu1 %v9426_v18  ;;  %5601 = vmatprep.subr.bf16.mxu0 %v9431_v43  ;;  %v9511_v18 = vld [vmem:[%s12596_s5 + $0x400] ss:$8 sps:$4 sm:$0xff]  }
 0x540   : > { %5642 = vmatprep.subr.bf16.mxu1 %v9434_v31  ;;  %v9514_v43 = vld [vmem:[%s12596_s5 + $0x500] ss:$8 sps:$4 sm:$0xff]   ;;  %v9519_v31 = vld [vmem:[%s12596_s5 + $0x4f4] ss:$8 sps:$4 sm:$0xff]  }
 0x542   : > { %5602 = vmatpush2.bf16.msra.mxu0 %v9429_v38  ;;  %v9522_v38 = vld [vmem:[%s12596_s5 + $0x5f4] ss:$8 sps:$4 sm:$0xff]  }
 0x543   : > { %5643 = vmatpush2.bf16.msra.mxu1 %v9432_v25  ;;  %5603 = vmatprep.subr.bf16.mxu0 %v9437_v22  ;;  %v9517_v25 = vld [vmem:[%s12596_s5 + $0x4f0] ss:$8 sps:$4 sm:$0xff]  }
 0x544   : > { %5644 = vmatprep.subr.bf16.mxu1 %v9440_v36  ;;  %v9520_v22 = vld [vmem:[%s12596_s5 + $0x5f0] ss:$8 sps:$4 sm:$0xff]   ;;  %v9525_v36 = vld [vmem:[%s12596_s5 + $0x4e4] ss:$8 sps:$4 sm:$0xff]  }
 0x546   : > { %5604 = vmatpush2.bf16.msra.mxu0 %v9435_v33  ;;  %v9528_v33 = vld [vmem:[%s12596_s5 + $0x5e4] ss:$8 sps:$4 sm:$0xff]  }
 0x547   : > { %5645 = vmatpush2.bf16.msra.mxu1 %v9438_v59  ;;  %5605 = vmatprep.subr.bf16.mxu0 %v9443_v29  ;;  %v9523_v59 = vld [vmem:[%s12596_s5 + $0x4e0] ss:$8 sps:$4 sm:$0xff]  }
 0x548   : > { %5646 = vmatprep.subr.bf16.mxu1 %v9446_v61  ;;  %v9526_v29 = vld [vmem:[%s12596_s5 + $0x5e0] ss:$8 sps:$4 sm:$0xff]   ;;  %v9531_v61 = vld [vmem:[%s12596_s5 + $0x4d4] ss:$8 sps:$4 sm:$0xff]  }
 0x54a   : > { %5606 = vmatpush2.bf16.msra.mxu0 %v9441_v50  ;;  %v9534_v50 = vld [vmem:[%s12596_s5 + $0x5d4] ss:$8 sps:$4 sm:$0xff]  }
 0x54b   : > { %5647 = vmatpush2.bf16.msra.mxu1 %v9444_v0  ;;  %5607 = vmatprep.subr.bf16.mxu0 %v9449_v63  ;;  %v9529_v0 = vld [vmem:[%s12596_s5 + $0x4d0] ss:$8 sps:$4 sm:$0xff]  }
 0x54c   : > { %5648 = vmatprep.subr.bf16.mxu1 %v9452_v5  ;;  %v9532_v63 = vld [vmem:[%s12596_s5 + $0x5d0] ss:$8 sps:$4 sm:$0xff]   ;;  %v9537_v5 = vld [vmem:[%s12596_s5 + $0x4c4] ss:$8 sps:$4 sm:$0xff]  }
 0x54e   : > { %5608 = vmatpush2.bf16.msra.mxu0 %v9447_v27  ;;  %v9540_v27 = vld [vmem:[%s12596_s5 + $0x5c4] ss:$8 sps:$4 sm:$0xff]  }
 0x54f   : > { %5649 = vmatpush2.bf16.msra.mxu1 %v9450_v32  ;;  %5609 = vmatprep.subr.bf16.mxu0 %v9455_v39  ;;  %v9535_v32 = vld [vmem:[%s12596_s5 + $0x4c0] ss:$8 sps:$4 sm:$0xff]  }
 0x550   : > { %5650 = vmatprep.subr.bf16.mxu1 %v9458_v56  ;;  %v9538_v39 = vld [vmem:[%s12596_s5 + $0x5c0] ss:$8 sps:$4 sm:$0xff]   ;;  %v9543_v56 = vld [vmem:[%s12596_s5 + $0x4b4] ss:$8 sps:$4 sm:$0xff]  }
 0x552   : > { %5610 = vmatpush2.bf16.msra.mxu0 %v9453_v3  ;;  %v9546_v3 = vld [vmem:[%s12596_s5 + $0x5b4] ss:$8 sps:$4 sm:$0xff]  }
 0x553   : > { %5651 = vmatpush2.bf16.msra.mxu1 %v9456_v1  ;;  %5611 = vmatprep.subr.bf16.mxu0 %v9461_v44  ;;  %v9541_v1 = vld [vmem:[%s12596_s5 + $0x4b0] ss:$8 sps:$4 sm:$0xff]  }
 0x554   : > { %5652 = vmatprep.subr.bf16.mxu1 %v9464_v46  ;;  %v9544_v44 = vld [vmem:[%s12596_s5 + $0x5b0] ss:$8 sps:$4 sm:$0xff]   ;;  %v9549_v46 = vld [vmem:[%s12596_s5 + $0x4a4] ss:$8 sps:$4 sm:$0xff]  }
 0x556   : > { %5612 = vmatpush2.bf16.msra.mxu0 %v9459_v62  ;;  %v9552_v62 = vld [vmem:[%s12596_s5 + $0x5a4] ss:$8 sps:$4 sm:$0xff]  }
 0x557   : > { %5653 = vmatpush2.bf16.msra.mxu1 %v9462_v17  ;;  %6068 = vmatprep.subr.bf16.mxu0 %v9467_v35  ;;  %v9547_v17 = vld [vmem:[%s12596_s5 + $0x4a0] ss:$8 sps:$4 sm:$0xff]  }
 0x558   : > { %6109 = vmatprep.subr.bf16.mxu1 %v9470_v28  ;;  %v9550_v35 = vld [vmem:[%s12596_s5 + $0x5a0] ss:$8 sps:$4 sm:$0xff]   ;;  %v9555_v28 = vld [vmem:[%s12596_s5 + $0x494] ss:$8 sps:$4 sm:$0xff]  }
 0x559   : > { %5614 = vmatmul.mubr.bf16.vlgmr.msra.gmra.mxu0 %v8042_v34  ;;  %v9561_v34 = vld [vmem:[%s12596_s5 + $0x484] ss:$8 sps:$4 sm:$0xff]  }
 0x55a   : > { %5655 = vmatmul.mubr.bf16.vlgmr.msra.gmra.mxu1 %v8044_v51  ;;  %6069 = vmatpush1.bf16.msra.mxu0 %v9465_v53  ;;  %v9556_v53 = vld [vmem:[%s12596_s5 + $0x590] ss:$8 sps:$4 sm:$0xff]   ;;  %v9564_v51 = vld [vmem:[%s12596_s5 + $0x584] ss:$8 sps:$4 sm:$0xff]  }
 0x55b   : > { %6100 = vmatprep.mubr.bf16.mxu0 %v5741_v13  ;;  %6110 = vmatpush1.bf16.msra.mxu1 %v9468_v37  ;;  %v9559_v37 = vld [vmem:[%s12596_s5 + $0x480] ss:$8 sps:$4 sm:$0xff]  }
 0x55c   : > { %6141 = vmatprep.mubr.bf16.mxu1 %v5743_v20  ;;  %6070 = vmatprep.subr.bf16.mxu0 %v9477_v16  ;;  %v12091_v13 = vld [vmem:[#allocation10 + $0x8] sm:$0x66]  ;;  %v8174_v16 = vcombine.low %v11884_v6, %v11884_v6  ;;  %v9567_v20 = vld [vmem:[%s12596_s5 + $0x674] ss:$8 sps:$4 sm:$0xff]  }
 0x55d   : > { %6111 = vmatprep.subr.bf16.mxu1 %v9480_v21  ;;  %v9562_v21 = vld [vmem:[%s12596_s5 + $0x580] ss:$8 sps:$4 sm:$0xff]   ;;  %v9570_v6 = vld [vmem:[%s12596_s5 + $0x774] ss:$8 sps:$4 sm:$0xff]  }
 0x55e   : > { %6071 = vmatpush1.bf16.msra.mxu0 %v9475_v19  ;;  %v12101_v19 = vld [vmem:[#allocation10] sm:$0x66] }
 0x55f   : > { %6112 = vmatpush1.bf16.msra.mxu1 %v9478_v47  ;;  %6072 = vmatprep.subr.bf16.mxu0 %v9483_v49  ;;  %v8176_v47 = vcombine.low %v11892_v26, %v11892_v26  ;;  %v8307_v49 = vcombine.high %v12091_v13, %v12091_v13  ;;  %v9568_v26 = vld [vmem:[%s12596_s5 + $0x770] ss:$8 sps:$4 sm:$0xff]  }
 0x560   : > { %6113 = vmatprep.subr.bf16.mxu1 %v9486_v12  ;;  %v9565_v12 = vld [vmem:[%s12596_s5 + $0x670] ss:$8 sps:$4 sm:$0xff]  }
 0x562   : > { %6073 = vmatpush1.bf16.msra.mxu0 %v9481_v48  ;;  %v8309_v48 = vcombine.high %v12101_v19, %v12101_v19 }
 0x563   : > { %6114 = vmatpush1.bf16.msra.mxu1 %v9484_v41  ;;  %6074 = vmatprep.subr.bf16.mxu0 %v9489_v55  ;;  %v5740_v41 = vrot.slane %v8174_v16, 1  ;;  %v5742_v55 = vrot.slane %v8176_v47, 1  ;;  %v9649_v16 = vld [vmem:[%s12596_s5 + $0x6a4] ss:$8 sps:$4 sm:$0xff]   ;;  %v9650_v47 = vld [vmem:[%s12596_s5 + $0x7a0] ss:$8 sps:$4 sm:$0xff]  }
 0x564   : > { %6115 = vmatprep.subr.bf16.mxu1 %v9492_v45  ;;  %v9577_v45 = vld [vmem:[%s12596_s5 + $0x664] ss:$8 sps:$4 sm:$0xff]  }
 0x566   : > { %6075 = vmatpush1.bf16.msra.mxu0 %v9487_v57  ;;  %v6230_v57 = vrot.slane %v8307_v49, 1  ;;  %v9658_v49 = vld [vmem:[%s12596_s5 + $0x794] ss:$8 sps:$4 sm:$0xff]  }
 0x567   : > { %6116 = vmatpush1.bf16.msra.mxu1 %v9490_v40  ;;  %6076 = vmatprep.subr.bf16.mxu0 %v9495_v24  ;;  %v9580_v40 = vld [vmem:[%s12596_s5 + $0x764] ss:$8 sps:$4 sm:$0xff]   ;;  %v6232_v24 = vrot.slane %v8309_v48, 1  ;;  %v9656_v48 = vld [vmem:[%s12596_s5 + $0x790] ss:$8 sps:$4 sm:$0xff]  }
 0x568   : > { %6117 = vmatprep.subr.bf16.mxu1 %v9498_v15  ;;  %v9575_v15 = vld [vmem:[%s12596_s5 + $0x660] ss:$8 sps:$4 sm:$0xff]  }
 0x56a   : > { %6077 = vmatpush1.bf16.msra.mxu0 %v9493_v60  ;;  %v9578_v60 = vld [vmem:[%s12596_s5 + $0x760] ss:$8 sps:$4 sm:$0xff]  }
 0x56b   : > { %6118 = vmatpush1.bf16.msra.mxu1 %v9496_v9  ;;  %6078 = vmatprep.subr.bf16.mxu0 %v9501_v2  ;;  %v9583_v9 = vld [vmem:[%s12596_s5 + $0x654] ss:$8 sps:$4 sm:$0xff]  }
 0x56c   : > { %6119 = vmatprep.subr.bf16.mxu1 %v9504_v8  ;;  %v9586_v2 = vld [vmem:[%s12596_s5 + $0x754] ss:$8 sps:$4 sm:$0xff]   ;;  %v9581_v8 = vld [vmem:[%s12596_s5 + $0x650] ss:$8 sps:$4 sm:$0xff]  }
 0x56e   : > { %6079 = vmatpush1.bf16.msra.mxu0 %v9499_v54  ;;  %v9584_v54 = vld [vmem:[%s12596_s5 + $0x750] ss:$8 sps:$4 sm:$0xff]  }
 0x56f   : > { %6120 = vmatpush1.bf16.msra.mxu1 %v9502_v30  ;;  %6080 = vmatprep.subr.bf16.mxu0 %v9507_v14  ;;  %v9589_v30 = vld [vmem:[%s12596_s5 + $0x644] ss:$8 sps:$4 sm:$0xff]  }
 0x570   : > { %6121 = vmatprep.subr.bf16.mxu1 %v9510_v23  ;;  %v9592_v14 = vld [vmem:[%s12596_s5 + $0x744] ss:$8 sps:$4 sm:$0xff]   ;;  %v9587_v23 = vld [vmem:[%s12596_s5 + $0x640] ss:$8 sps:$4 sm:$0xff]  }
 0x572   : > { %6081 = vmatpush1.bf16.msra.mxu0 %v9505_v7  ;;  %v9590_v7 = vld [vmem:[%s12596_s5 + $0x740] ss:$8 sps:$4 sm:$0xff]  }
 0x573   : > { %6122 = vmatpush1.bf16.msra.mxu1 %v9508_v42  ;;  %6082 = vmatprep.subr.bf16.mxu0 %v9513_v4  ;;  %v9595_v42 = vld [vmem:[%s12596_s5 + $0x634] ss:$8 sps:$4 sm:$0xff]  }
 0x574   : > { %6123 = vmatprep.subr.bf16.mxu1 %v9516_v10  ;;  %v9598_v4 = vld [vmem:[%s12596_s5 + $0x734] ss:$8 sps:$4 sm:$0xff]   ;;  %v9593_v10 = vld [vmem:[%s12596_s5 + $0x630] ss:$8 sps:$4 sm:$0xff]  }
 0x576   : > { %6083 = vmatpush1.bf16.msra.mxu0 %v9511_v18  ;;  %v9596_v18 = vld [vmem:[%s12596_s5 + $0x730] ss:$8 sps:$4 sm:$0xff]  }
 0x577   : > { %6124 = vmatpush1.bf16.msra.mxu1 %v9514_v43  ;;  %6084 = vmatprep.subr.bf16.mxu0 %v9519_v31  ;;  %v9601_v43 = vld [vmem:[%s12596_s5 + $0x624] ss:$8 sps:$4 sm:$0xff]  }
 0x578   : > { %6125 = vmatprep.subr.bf16.mxu1 %v9522_v38  ;;  %v9604_v31 = vld [vmem:[%s12596_s5 + $0x724] ss:$8 sps:$4 sm:$0xff]   ;;  %v9599_v38 = vld [vmem:[%s12596_s5 + $0x620] ss:$8 sps:$4 sm:$0xff]  }
 0x57a   : > { %6085 = vmatpush2.bf16.msra.mxu0 %v9517_v25  ;;  %v9602_v25 = vld [vmem:[%s12596_s5 + $0x720] ss:$8 sps:$4 sm:$0xff]  }
 0x57b   : > { %6126 = vmatpush2.bf16.msra.mxu1 %v9520_v22  ;;  %6086 = vmatprep.subr.bf16.mxu0 %v9525_v36  ;;  %v9607_v22 = vld [vmem:[%s12596_s5 + $0x614] ss:$8 sps:$4 sm:$0xff]  }
 0x57c   : > { %6127 = vmatprep.subr.bf16.mxu1 %v9528_v33  ;;  %v9610_v36 = vld [vmem:[%s12596_s5 + $0x714] ss:$8 sps:$4 sm:$0xff]   ;;  %v9605_v33 = vld [vmem:[%s12596_s5 + $0x610] ss:$8 sps:$4 sm:$0xff]  }
 0x57e   : > { %6087 = vmatpush2.bf16.msra.mxu0 %v9523_v59  ;;  %v9608_v59 = vld [vmem:[%s12596_s5 + $0x710] ss:$8 sps:$4 sm:$0xff]  }
 0x57f   : > { %6128 = vmatpush2.bf16.msra.mxu1 %v9526_v29  ;;  %6088 = vmatprep.subr.bf16.mxu0 %v9531_v61  ;;  %v9613_v29 = vld [vmem:[%s12596_s5 + $0x604] ss:$8 sps:$4 sm:$0xff]  }
 0x580   : > { %6129 = vmatprep.subr.bf16.mxu1 %v9534_v50  ;;  %v9616_v61 = vld [vmem:[%s12596_s5 + $0x704] ss:$8 sps:$4 sm:$0xff]   ;;  %v9611_v50 = vld [vmem:[%s12596_s5 + $0x600] ss:$8 sps:$4 sm:$0xff]  }
 0x582   : > { %6089 = vmatpush2.bf16.msra.mxu0 %v9529_v0  ;;  %v9614_v0 = vld [vmem:[%s12596_s5 + $0x700] ss:$8 sps:$4 sm:$0xff]  }
 0x583   : > { %6130 = vmatpush2.bf16.msra.mxu1 %v9532_v63  ;;  %6090 = vmatprep.subr.bf16.mxu0 %v9537_v5  ;;  %v9619_v63 = vld [vmem:[%s12596_s5 + $0x6f4] ss:$8 sps:$4 sm:$0xff]  }
 0x584   : > { %6131 = vmatprep.subr.bf16.mxu1 %v9540_v27  ;;  %v9622_v5 = vld [vmem:[%s12596_s5 + $0x7f4] ss:$8 sps:$4 sm:$0xff]   ;;  %v9617_v27 = vld [vmem:[%s12596_s5 + $0x6f0] ss:$8 sps:$4 sm:$0xff]  }
 0x586   : > { %6091 = vmatpush2.bf16.msra.mxu0 %v9535_v32  ;;  %v9620_v32 = vld [vmem:[%s12596_s5 + $0x7f0] ss:$8 sps:$4 sm:$0xff]  }
 0x587   : > { %6132 = vmatpush2.bf16.msra.mxu1 %v9538_v39  ;;  %6092 = vmatprep.subr.bf16.mxu0 %v9543_v56  ;;  %v9625_v39 = vld [vmem:[%s12596_s5 + $0x6e4] ss:$8 sps:$4 sm:$0xff]  }
 0x588   : > { %6133 = vmatprep.subr.bf16.mxu1 %v9546_v3  ;;  %v9628_v56 = vld [vmem:[%s12596_s5 + $0x7e4] ss:$8 sps:$4 sm:$0xff]   ;;  %v9623_v3 = vld [vmem:[%s12596_s5 + $0x6e0] ss:$8 sps:$4 sm:$0xff]  }
 0x58a   : > { %6093 = vmatpush2.bf16.msra.mxu0 %v9541_v1  ;;  %v9626_v1 = vld [vmem:[%s12596_s5 + $0x7e0] ss:$8 sps:$4 sm:$0xff]  }
 0x58b   : > { %6134 = vmatpush2.bf16.msra.mxu1 %v9544_v44  ;;  %6094 = vmatprep.subr.bf16.mxu0 %v9549_v46  ;;  %v9631_v44 = vld [vmem:[%s12596_s5 + $0x6d4] ss:$8 sps:$4 sm:$0xff]  }
 0x58c   : > { %6135 = vmatprep.subr.bf16.mxu1 %v9552_v62  ;;  %v9634_v46 = vld [vmem:[%s12596_s5 + $0x7d4] ss:$8 sps:$4 sm:$0xff]   ;;  %v9629_v62 = vld [vmem:[%s12596_s5 + $0x6d0] ss:$8 sps:$4 sm:$0xff]  }
 0x58e   : > { %6095 = vmatpush2.bf16.msra.mxu0 %v9547_v17  ;;  %v9632_v17 = vld [vmem:[%s12596_s5 + $0x7d0] ss:$8 sps:$4 sm:$0xff]  }
 0x58f   : > { %6136 = vmatpush2.bf16.msra.mxu1 %v9550_v35  ;;  %6096 = vmatprep.subr.bf16.mxu0 %v9555_v28  ;;  %v9637_v35 = vld [vmem:[%s12596_s5 + $0x6c4] ss:$8 sps:$4 sm:$0xff]  }
 0x590   : > { %6137 = vmatprep.subr.bf16.mxu1 %v9558_v52  ;;  %v9640_v28 = vld [vmem:[%s12596_s5 + $0x7c4] ss:$8 sps:$4 sm:$0xff]   ;;  %v9635_v52 = vld [vmem:[%s12596_s5 + $0x6c0] ss:$8 sps:$4 sm:$0xff]  }
 0x592   : > { %6097 = vmatpush2.bf16.msra.mxu0 %v9553_v58  ;;  %v9638_v58 = vld [vmem:[%s12596_s5 + $0x7c0] ss:$8 sps:$4 sm:$0xff]  }
 0x593   : > { %6138 = vmatpush2.bf16.msra.mxu1 %v9556_v53  ;;  %6098 = vmatprep.subr.bf16.mxu0 %v9561_v34  ;;  %v9643_v53 = vld [vmem:[%s12596_s5 + $0x6b4] ss:$8 sps:$4 sm:$0xff]  }
 0x594   : > { %6139 = vmatprep.subr.bf16.mxu1 %v9564_v51  ;;  %v9646_v34 = vld [vmem:[%s12596_s5 + $0x7b4] ss:$8 sps:$4 sm:$0xff]   ;;  %v9641_v51 = vld [vmem:[%s12596_s5 + $0x6b0] ss:$8 sps:$4 sm:$0xff]  }
 0x596   : > { %6099 = vmatpush2.bf16.msra.mxu0 %v9559_v37  ;;  %v9644_v37 = vld [vmem:[%s12596_s5 + $0x7b0] ss:$8 sps:$4 sm:$0xff]  }
 0x597   : > { %6140 = vmatpush2.bf16.msra.mxu1 %v9562_v21  ;;  %6557 = vmatprep.subr.bf16.mxu0 %v9567_v20  ;;  %v9652_v21 = vld [vmem:[%s12596_s5 + $0x7a4] ss:$8 sps:$4 sm:$0xff]   ;;  %v9647_v20 = vld [vmem:[%s12596_s5 + $0x6a0] ss:$8 sps:$4 sm:$0xff]  }
 0x598   : > { %6598 = vmatprep.subr.bf16.mxu1 %v9570_v6  ;;  %v9655_v6 = vld [vmem:[%s12596_s5 + $0x694] ss:$8 sps:$4 sm:$0xff]  }
 0x599   : > { %6101 = vmatmul.mubr.bf16.vlgmr.msra.gmra.mxu0 %v5740_v41  ;;  %v9661_v41 = vld [vmem:[%s12596_s5 + $0x684] ss:$8 sps:$4 sm:$0xff]  }
 0x59a   : > { %6142 = vmatmul.mubr.bf16.vlgmr.msra.gmra.mxu1 %v5742_v55  ;;  %6558 = vmatpush1.bf16.msra.mxu0 %v9565_v12  ;;  %v9653_v12 = vld [vmem:[%s12596_s5 + $0x690] ss:$8 sps:$4 sm:$0xff]   ;;  %v9659_v55 = vld [vmem:[%s12596_s5 + $0x680] ss:$8 sps:$4 sm:$0xff]  }
 0x59b   : > { %6589 = vmatprep.mubr.bf16.mxu0 %v6230_v57  ;;  %6599 = vmatpush1.bf16.msra.mxu1 %v9568_v26  ;;  %v9664_v26 = vld [vmem:[%s12596_s5 + $0x784] ss:$8 sps:$4 sm:$0xff]   ;;  %v9662_v57 = vld [vmem:[%s12596_s5 + $0x780] ss:$8 sps:$4 sm:$0xff]  }
 0x59c   : > { %6630 = vmatprep.mubr.bf16.mxu1 %v6232_v24  ;;  %6559 = vmatprep.subr.bf16.mxu0 %v9577_v45  ;;  %v8306_v45 = vcombine.low %v12091_v13, %v12091_v13 }
 0x59d   : > { %6600 = vmatprep.subr.bf16.mxu1 %v9580_v40  ;;  %v8308_v40 = vcombine.low %v12101_v19, %v12101_v19 }
 0x59e   : > { %6560 = vmatpush1.bf16.msra.mxu0 %v9575_v15  ;;  %v6229_v24 = vrot.slane %v8306_v45, 1 }
 0x59f   : > { %6601 = vmatpush1.bf16.msra.mxu1 %v9578_v60  ;;  %6561 = vmatprep.subr.bf16.mxu0 %v9583_v9  ;;  %v6231_v15 = vrot.slane %v8308_v40, 1 }
 0x5a0   : > { %6602 = vmatprep.subr.bf16.mxu1 %v9586_v2 }
 0x5a2   : > { %6562 = vmatpush1.bf16.msra.mxu0 %v9581_v8 }
 0x5a3   : > { %6603 = vmatpush1.bf16.msra.mxu1 %v9584_v54  ;;  %6563 = vmatprep.subr.bf16.mxu0 %v9589_v30 }
 0x5a4   : > { %6604 = vmatprep.subr.bf16.mxu1 %v9592_v14 }
 0x5a6   : > { %6564 = vmatpush1.bf16.msra.mxu0 %v9587_v23 }
 0x5a7   : > { %6605 = vmatpush1.bf16.msra.mxu1 %v9590_v7  ;;  %6565 = vmatprep.subr.bf16.mxu0 %v9595_v42 }
 0x5a8   : > { %6606 = vmatprep.subr.bf16.mxu1 %v9598_v4 }
 0x5aa   : > { %6566 = vmatpush1.bf16.msra.mxu0 %v9593_v10 }
 0x5ab   : > { %6607 = vmatpush1.bf16.msra.mxu1 %v9596_v18  ;;  %6567 = vmatprep.subr.bf16.mxu0 %v9601_v43 }
 0x5ac   : > { %6608 = vmatprep.subr.bf16.mxu1 %v9604_v31 }
 0x5ae   : > { %6568 = vmatpush1.bf16.msra.mxu0 %v9599_v38 }
 0x5af   : > { %6609 = vmatpush1.bf16.msra.mxu1 %v9602_v25  ;;  %6569 = vmatprep.subr.bf16.mxu0 %v9607_v22 }
 0x5b0   : > { %6610 = vmatprep.subr.bf16.mxu1 %v9610_v36 }
 0x5b2   : > { %6570 = vmatpush1.bf16.msra.mxu0 %v9605_v33 }
 0x5b3   : > { %6611 = vmatpush1.bf16.msra.mxu1 %v9608_v59  ;;  %6571 = vmatprep.subr.bf16.mxu0 %v9613_v29 }
 0x5b4   : > { %6612 = vmatprep.subr.bf16.mxu1 %v9616_v61  ;;  %v6712_v61 = vld [vmem:[#allocation11] sm:$0x77] }
 0x5b6   : > { %6572 = vmatpush1.bf16.msra.mxu0 %v9611_v50  ;;  %v6715_v50 = vld [vmem:[#allocation11 + $0x8] sm:$0x77] }
 0x5b7   : > { %6613 = vmatpush1.bf16.msra.mxu1 %v9614_v0  ;;  %6573 = vmatprep.subr.bf16.mxu0 %v9619_v63 }
 0x5b8   : > { %6614 = vmatprep.subr.bf16.mxu1 %v9622_v5  ;;  %v6718_v5 = vld [vmem:[#allocation11 + $0x20] sm:$0x77] }
 0x5ba   : > { %6574 = vmatpush2.bf16.msra.mxu0 %v9617_v27  ;;  %v6721_v27 = vld [vmem:[#allocation11 + $0x18] sm:$0x77] }
 0x5bb   : > { %6615 = vmatpush2.bf16.msra.mxu1 %v9620_v32  ;;  %6575 = vmatprep.subr.bf16.mxu0 %v9625_v39  ;;  %v6724_v39 = vld [vmem:[#allocation11 + $0x10] sm:$0x77] }
 0x5bc   : > { %6616 = vmatprep.subr.bf16.mxu1 %v9628_v56 }
 0x5be   : > { %6576 = vmatpush2.bf16.msra.mxu0 %v9623_v3 }
 0x5bf   : > { %6617 = vmatpush2.bf16.msra.mxu1 %v9626_v1  ;;  %6577 = vmatprep.subr.bf16.mxu0 %v9631_v44  ;;  %v6713_v1 = vsel %vm6711_vm6, 0, %v6712_v61  ;;  %v6716_v44 = vsel %vm6711_vm6, 0, %v6715_v50 }
 0x5c0   : > { %6618 = vmatprep.subr.bf16.mxu1 %v9634_v46  ;;  %6714 = vst [vmem:[#allocation11] sm:$0x77] %v6713_v1  ;;  %6717 = vst [vmem:[#allocation11 + $0x8] sm:$0x77] %v6716_v44 }
 0x5c2   : > { %6578 = vmatpush2.bf16.msra.mxu0 %v9629_v62  ;;  %v6719_v62 = vsel %vm6711_vm6, 0, %v6718_v5  ;;  %v6785_v5 = vld [vmem:[%s12597_s6] ss:$8 sm:$0x3] }
 0x5c3   : > { %6619 = vmatpush2.bf16.msra.mxu1 %v9632_v17  ;;  %6579 = vmatprep.subr.bf16.mxu0 %v9637_v35  ;;  %v6722_v17 = vsel %vm6711_vm6, 0, %v6721_v27  ;;  %v6725_v35 = vsel %vm6711_vm6, 0, %v6724_v39  ;;  %6720 = vst [vmem:[#allocation11 + $0x20] sm:$0x77] %v6719_v62 }
 0x5c4   : > { %6620 = vmatprep.subr.bf16.mxu1 %v9640_v28  ;;  %6723 = vst [vmem:[#allocation11 + $0x18] sm:$0x77] %v6722_v17  ;;  %6726 = vst [vmem:[#allocation11 + $0x10] sm:$0x77] %v6725_v35 }
 0x5c6   : > { %6580 = vmatpush2.bf16.msra.mxu0 %v9635_v52 }
 0x5c7   : > { %6621 = vmatpush2.bf16.msra.mxu1 %v9638_v58  ;;  %6581 = vmatprep.subr.bf16.mxu0 %v9643_v53  ;;  %v12303_v58 = vsub.s32 0, %v10064_v11  ;;  %v6641_v53 = vld [vmem:[%s12601_s10] sm:$0x3]  ;;  %v6844_v44 = vld [vmem:[#allocation11] sm:$0x22] }
 0x5c8   : > { %6622 = vmatprep.subr.bf16.mxu1 %v9646_v34 }
 0x5c9   : > { %v12338_v17 = vrot.slane %v6785_v5, %v12303_v58 }
 0x5ca   : > { %6582 = vmatpush2.bf16.msra.mxu0 %v9641_v51 }
 0x5cb   : > { %6623 = vmatpush2.bf16.msra.mxu1 %v9644_v37  ;;  %6583 = vmatprep.subr.bf16.mxu0 %v9649_v16  ;;  %v12309_v37 = vsub.s32 1, %v10064_v11 }
 0x5cc   : > { %6624 = vmatprep.subr.bf16.mxu1 %v9652_v21 }
 0x5cd   : > { %v12341_v35 = vrot.slane %v6785_v5, %v12309_v37 }
 0x5ce   : > { %6584 = vmatpush2.bf16.msra.mxu0 %v9647_v20  ;;  %v6646_v20 = vrot.slane %v6641_v53, %v12303_v58 }
 0x5cf   : > { %6625 = vmatpush2.bf16.msra.mxu1 %v9650_v47  ;;  %6585 = vmatprep.subr.bf16.mxu0 %v9655_v6 }
 0x5d0   : > { %6626 = vmatprep.subr.bf16.mxu1 %v9658_v49 }
 0x5d2   : > { %6586 = vmatpush2.bf16.msra.mxu0 %v9653_v12 }
 0x5d3   : > { %6627 = vmatpush2.bf16.msra.mxu1 %v9656_v48  ;;  %6587 = vmatprep.subr.bf16.mxu0 %v9661_v41  ;;  %v6650_v41 = vrot.slane %v6641_v53, %v12309_v37 }
 0x5d4   : > { %6628 = vmatprep.subr.bf16.mxu1 %v9664_v26 }
 0x5d6   : > { %6588 = vmatpush2.bf16.msra.mxu0 %v9659_v55 }
 0x5d7   : > { %6629 = vmatpush2.bf16.msra.mxu1 %v9662_v57 }
 0x5d9   : > { %6590 = vmatmul.mubr.bf16.vlgmr.msra.gmra.mxu0 %v6229_v24  ;;  %v5199_v60 = vpop.f32.mrf.mxu0 }
 0x5da   : > { %v5240_v9 = vpop.f32.mrf.mxu1  ;;  %6631 = vmatmul.mubr.bf16.vlgmr.msra.gmra.mxu1 %v6231_v15 }
 0x5db   : > { %v5241_v2 = vadd.f32 %v5240_v9, %v5199_v60  ;;  %v5201_v13 = vpop.f32.mrf.mxu0 }
 0x5dc   : > { %v5242_v8 = vpop.f32.mrf.mxu1 }
 0x5dd   : > { %v5243_v54 = vadd.f32 %v5242_v8, %v5201_v13  ;;  %v5203_v30 = vpop.f32.mrf.mxu0 }
 0x5de   : > { %v5244_v14 = vpop.f32.mrf.mxu1 }
 0x5df   : > { %v5204_v23 = vpop.f32.mrf.mxu0 }
 0x5e0   : > { %v5245_v7 = vpop.f32.mrf.mxu1 }
 0x619   : > { %v5615_v42 = vpop.f32.mrf.mxu0 }
 0x61a   : > { %v5656_v4 = vpop.f32.mrf.mxu1  ;;  %v5616_v19 = vadd.f32 %v5615_v42, %v5241_v2 }
 0x61b   : > { %v5617_v10 = vpop.f32.mrf.mxu0 }
 0x61c   : > { %v5658_v18 = vpop.f32.mrf.mxu1  ;;  %v5657_v43 = vadd.f32 %v5656_v4, %v5616_v19  ;;  %v5618_v31 = vadd.f32 %v5617_v10, %v5243_v54 }
 0x61d   : > { %v5619_v38 = vpop.f32.mrf.mxu0 }
 0x61e   : > { %v5660_v25 = vpop.f32.mrf.mxu1  ;;  %v5659_v22 = vadd.f32 %v5658_v18, %v5618_v31 }
 0x61f   : > { %v5620_v36 = vpop.f32.mrf.mxu0 }
 0x620   : > { %v5661_v33 = vpop.f32.mrf.mxu1 }
 0x659   : > { %v6102_v59 = vpop.f32.mrf.mxu0 }
 0x65a   : > { %v6143_v29 = vpop.f32.mrf.mxu1 }
 0x65b   : > { %v6144_v0 = vadd.f32 %v6143_v29, %v6102_v59  ;;  %v6104_v63 = vpop.f32.mrf.mxu0  ;;  %v6805_v59 = vld [vmem:[#allocation11] sm:$0x33] }
 0x65c   : > { %v6145_v32 = vpop.f32.mrf.mxu1  ;;  %v8376_v29 = vld [vmem:[%s12597_s6 + $0x1] ss:$8 sm:$0x3]  ;;  %v6807_v27 = vunpack.c.l.bf16 %v6805_v59 }
 0x65d   : > { %v6150_v56 = vadd.f32 %v6144_v0, %v5657_v43  ;;  %v6106_v3 = vpop.f32.mrf.mxu0  ;;  %v6146_v34 = vadd.f32 %v6145_v32, %v6104_v63  ;;  %v6779_v63 = vld [vmem:[#allocation11] sm:$0x11]  ;;  %v6808_v32 = vunpack.c.h.bf16 %v6805_v59  ;;  %v12332_v39 = vrot.slane %v8376_v29, %v12303_v58  ;;  %v8380_v59 = vld [vmem:[%s12597_s6 + $0x5] ss:$8 sm:$0x3] }
 0x65e   : > { %v6147_v46 = vpop.f32.mrf.mxu1  ;;  %v6782_v62 = vunpack.c.h.bf16 %v6779_v63 }
 0x65f   : > { %v6107_v28 = vpop.f32.mrf.mxu0  ;;  %v6151_v49 = vadd.f32 %v6146_v34, %v5659_v22  ;;  %v6781_v46 = vunpack.c.l.bf16 %v6779_v63  ;;  %v6824_v34 = vmul.f32 %v12332_v39, %v6807_v27 }
 0x660   : > { %v6148_v52 = vpop.f32.mrf.mxu1  ;;  %v8377_v28 = vld [vmem:[%s12597_s6 + $0x2] ss:$8 sm:$0x3] }
 0x699   : > { %v6591_v51 = vpop.f32.mrf.mxu0 }
 0x69a   : > { %v6632_v16 = vpop.f32.mrf.mxu1 }
 0x69b   : > { %v6633_v21 = vadd.f32 %v6632_v16, %v6591_v51  ;;  %v6593_v47 = vpop.f32.mrf.mxu0  ;;  %v6846_v16 = vunpack.c.l.bf16 %v6844_v44 }
 0x69c   : > { %v6634_v6 = vpop.f32.mrf.mxu1 }
 0x69d   : > { %v6639_v12 = vadd.f32 %v6633_v21, %v6150_v56  ;;  %v6635_v48 = vadd.f32 %v6634_v6, %v6593_v47  ;;  %v6595_v26 = vpop.f32.mrf.mxu0  ;;  %v12335_v56 = vrot.slane %v8376_v29, %v12309_v37  ;;  %v6847_v21 = vunpack.c.h.bf16 %v6844_v44 }
 0x69e   : > { %v6636_v55 = vpop.f32.mrf.mxu1  ;;  %v6798_v26 = vmul.f32 %v12341_v35, %v6782_v62  ;;  %v12382_v44 = vrot.slane %v8380_v59, %v12303_v58  ;;  %v6989_v62 = vld [vmem:[#allocation11 + $0x8] sm:$0x22] }
 0x69f   : > { %v6653_v45 = vadd.f32 %v6646_v20, %v6639_v12  ;;  %v6640_v57 = vadd.f32 %v6635_v48, %v6151_v49  ;;  %v6596_v40 = vpop.f32.mrf.mxu0  ;;  %v6825_v51 = vmul.f32 %v12335_v56, %v6808_v32  ;;  %v6883_v20 = vld [vmem:[#allocation11] sm:$0x66]  ;;  %v12349_v49 = vrot.slane %v8377_v28, %v12303_v58  ;;  %v8378_v48 = vld [vmem:[%s12597_s6 + $0x3] ss:$8 sm:$0x3] }
 0x6a0   : > { %v6637_v24 = vpop.f32.mrf.mxu1  ;;  %v12352_v12 = vrot.slane %v8377_v28, %v12309_v37  ;;  %v6886_v40 = vunpack.c.h.bf16 %v6883_v20  ;;  %v8381_v28 = vld [vmem:[%s12597_s6 + $0x6] ss:$8 sm:$0x3] }
 0x6a1   : > { %v6656_v15 = vsel %vm6655_vm13, %v6653_v45, 0.0  ;;  %v6654_v60 = vadd.f32 %v6650_v41, %v6640_v57  ;;  %v6797_v41 = vmul.f32 %v12338_v17, %v6781_v46  ;;  %v6885_v57 = vunpack.c.l.bf16 %v6883_v20 }
 0x6a2   : > { %v6657_v9 = vrot.slane %v6656_v15, 4  ;;  %v6832_v24 = vrot.slane %v6824_v34, 1  ;;  %v12385_v46 = vrot.slane %v8380_v59, %v12309_v37 }
 0x6a3   : > { %v6663_v2 = vsel %vm6655_vm13, %v6654_v60, 0.0 }
 0x6a4   : > { %v6658_v13 = vadd.f32 %v6657_v9, %v6656_v15  ;;  %v6664_v8 = vrot.slane %v6663_v2, 4  ;;  %v6833_v15 = vrot.slane %v6825_v51, 1  ;;  %v12363_v9 = vrot.slane %v8378_v48, %v12309_v37 }
 0x6a6   : > { %v6659_v54 = vrot.slane %v6658_v13, 2  ;;  %v6665_v30 = vadd.f32 %v6664_v8, %v6663_v2  ;;  %v6863_v8 = vmul.f32 %v12349_v49, %v6846_v16 }
 0x6a8   : > { %v6660_v14 = vadd.f32 %v6659_v54, %v6658_v13  ;;  %v6666_v23 = vrot.slane %v6665_v30, 2  ;;  %v6864_v54 = vmul.f32 %v12352_v12, %v6847_v21 }
 0x6aa   : > { %v6661_v7 = vrot.slane %v6660_v14, 1  ;;  %v6667_v42 = vadd.f32 %v6666_v23, %v6665_v30  ;;  %v6840_v23 = vadd.f32 %v6832_v24, %v6797_v41  ;;  %v12398_v41 = vrot.slane %v8381_v28, %v12309_v37 }
 0x6ac   : > { %v6662_v4 = vadd.f32 %v6661_v7, %v6660_v14  ;;  %v6668_v19 = vrot.slane %v6667_v42, 1  ;;  %v6841_v7 = vadd.f32 %v6833_v15, %v6798_v26  ;;  %v7028_v26 = vld [vmem:[#allocation11 + $0x8] sm:$0x66] }
 0x6ae   : > { %v6671_v10 = vmul.f32 0.25, %v6662_v4  ;;  %v6669_v18 = vadd.f32 %v6668_v19, %v6667_v42  ;;  %v6903_v4 = vmul.f32 %v12363_v9, %v6886_v40 }
 0x6b0   : > { %v12315_v43 = vsub.f32 %v6653_v45, %v6671_v10  ;;  %v6672_v31 = vmul.f32 0.25, %v6669_v18  ;;  %v6871_v10 = vrot.slane %v6863_v8, 2  ;;  %v6872_v18 = vrot.slane %v6864_v54, 2  ;;  %v6806_v8 = vld [vmem:[#allocation11 + $0x8] sm:$0x33] }
 0x6b2   : > { %v6675_v38 = vmul.f32 %v12315_v43, %v12315_v43  ;;  %v12319_v25 = vsub.f32 %v6654_v60, %v6672_v31  ;;  %v12360_v60 = vrot.slane %v8378_v48, %v12303_v58  ;;  %v6923_v31 = vld [vmem:[#allocation11 + $0x8] sm:$0x11]  ;;  %v6879_v63 = vadd.f32 %v6871_v10, %v6840_v23 }
 0x6b3   : > { %v6880_v5 = vadd.f32 %v6872_v18, %v6841_v7  ;;  %v12395_v48 = vrot.slane %v8381_v28, %v12303_v58  ;;  %v7030_v23 = vunpack.c.l.bf16 %v7028_v26 }
 0x6b4   : > { %v6677_v22 = vsel %vm6655_vm13, %v6675_v38, 0.0  ;;  %v6676_v36 = vmul.f32 %v12319_v25, %v12319_v25  ;;  %v6902_v42 = vmul.f32 %v12360_v60, %v6885_v57  ;;  %v8379_v38 = vld [vmem:[%s12597_s6 + $0x4] ss:$8 sm:$0x3] }
 0x6b5   : > { %v6678_v33 = vrot.slane %v6677_v22, 4  ;;  %v12376_v27 = vrot.slane %v8379_v38, %v12303_v58  ;;  %v12379_v32 = vrot.slane %v8379_v38, %v12309_v37  ;;  %v12406_v57 = vld [vmem:[#allocation11 + $0x20] sm:$0x11]  ;;  %v6780_v38 = vld [vmem:[#allocation11 + $0x8] sm:$0x11] }
 0x6b6   : > { %v6684_v61 = vsel %vm6655_vm13, %v6676_v36, 0.0  ;;  %v6910_v29 = vrot.slane %v6902_v42, 3  ;;  %v7031_v42 = vunpack.c.h.bf16 %v7028_v26  ;;  %v7069_v10 = vunpack.c.l.bf16 %v12406_v57 }
 0x6b7   : > { %v6679_v50 = vadd.f32 %v6678_v33, %v6677_v22  ;;  %v6685_v0 = vrot.slane %v6684_v61, 4  ;;  %v9685_v22 = vmov 1983009808   ;;  %v6950_v33 = vld [vmem:[#allocation11 + $0x8] sm:$0x33] }
 0x6b8   : > { %v6731_v36 = vunpack.c.l.s4 %v9685_v22  ;;  %v6918_v51 = vadd.f32 %v6910_v29, %v6879_v63  ;;  %v6810_v22 = vunpack.c.h.bf16 %v6806_v8  ;;  %v7070_v29 = vunpack.c.h.bf16 %v12406_v57 }
 0x6b9   : > { %v6680_v3 = vrot.slane %v6679_v50, 2  ;;  %v6686_v1 = vadd.f32 %v6685_v0, %v6684_v61  ;;  %v6911_v61 = vrot.slane %v6903_v4, 3  ;;  %v6926_v0 = vunpack.c.h.bf16 %v6923_v31 }
 0x6bb   : > { %v6681_v52 = vadd.f32 %v6680_v3, %v6679_v50  ;;  %v6687_v53 = vrot.slane %v6686_v1, 2  ;;  %v6925_v50 = vunpack.c.l.bf16 %v6923_v31  ;;  %v6952_v3 = vunpack.c.l.bf16 %v6950_v33 }
 0x6bc   : > { %v6943_v34 = vmul.f32 %v12379_v32, %v6926_v0  ;;  %v6919_v16 = vadd.f32 %v6911_v61, %v6880_v5  ;;  %v8383_v61 = vld [vmem:[%s12597_s6 + $0x10] ss:$8 sm:$0x3]  ;;  %v6783_v5 = vunpack.c.l.bf16 %v6780_v38 }
 0x6bd   : > { %v6682_v47 = vrot.slane %v6681_v52, 1  ;;  %v6688_v6 = vadd.f32 %v6687_v53, %v6686_v1  ;;  %v6953_v1 = vunpack.c.h.bf16 %v6950_v33  ;;  %v6942_v53 = vmul.f32 %v12376_v27, %v6925_v50 }
 0x6be   : > { %v6969_v21 = vmul.f32 %v12382_v44, %v6952_v3  ;;  %v6947_v15 = vadd.f32 %v6943_v34, %v6919_v16  ;;  %v6784_v3 = vunpack.c.h.bf16 %v6780_v38  ;;  %v6827_v34 = vmul.f32 %v12335_v56, %v6810_v22 }
 0x6bf   : > { %v6683_v55 = vadd.f32 %v6682_v47, %v6681_v52  ;;  %v6689_v45 = vrot.slane %v6688_v6, 1  ;;  %v6732_v52 = vunpack.c.0.s8 %v6731_v36  ;;  %v6970_v20 = vmul.f32 %v12385_v46, %v6953_v1  ;;  %v6845_v36 = vld [vmem:[#allocation11 + $0x8] sm:$0x22] }
 0x6c0   : > { %v6991_v47 = vunpack.c.l.bf16 %v6989_v62  ;;  %v6946_v24 = vadd.f32 %v6942_v53, %v6918_v51  ;;  %v6849_v1 = vunpack.c.h.bf16 %v6845_v36  ;;  %v12431_v26 = vrot.slane %v8383_v61, %v12309_v37 }
 0x6c1   : > { %v6691_v2 = vmul.f32 0.25, %v6683_v55  ;;  %v6690_v13 = vadd.f32 %v6689_v45, %v6688_v6  ;;  %v6992_v6 = vunpack.c.h.bf16 %v6989_v62  ;;  %v12401_v55 = vsub.s32 %v6732_v52, %v10064_v11  ;;  %v8382_v45 = vld [vmem:[%s12597_s6 + $0x7] ss:$8 sm:$0x3]  ;;  %v6884_v62 = vld [vmem:[#allocation11 + $0x8] sm:$0x66] }
 0x6c2   : > { %v12412_v4 = vrot.slane %v8382_v45, %v12303_v58  ;;  %v6799_v57 = vmul.f32 %v12338_v17, %v6783_v5 }
 0x6c3   : > { %v6693_v30 = vadd.f32 1e-05, %v6691_v2  ;;  %v6692_v14 = vmul.f32 0.25, %v6690_v13  ;;  %v6977_v2 = vrot.slane %v6969_v21, 1  ;;  %v6978_v13 = vrot.slane %v6970_v20, 1 }
 0x6c4   : > { %v7047_v16 = vmul.f32 %v12412_v4, %v7030_v23  ;;  %v12428_v20 = vrot.slane %v8383_v61, %v12303_v58 }
 0x6c5   : > { %9669 = vrsqrt.f32 %v6693_v30  ;;  %v6694_v19 = vadd.f32 1e-05, %v6692_v14  ;;  %v7008_v30 = vmul.f32 %v12395_v48, %v6991_v47  ;;  %v7009_v14 = vmul.f32 %v12398_v41, %v6992_v6 }
 0x6c6   : > { %v6985_v33 = vadd.f32 %v6977_v2, %v6946_v24  ;;  %v6986_v59 = vadd.f32 %v6978_v13, %v6947_v15  ;;  %v6888_v24 = vunpack.c.h.bf16 %v6884_v62  ;;  %v6835_v2 = vrot.slane %v6827_v34, 1 }
 0x6c7   : > { %9671 = vrsqrt.f32 %v6694_v19  ;;  %v12415_v19 = vrot.slane %v8382_v45, %v12309_v37  ;;  %v7016_v0 = vrot.slane %v7008_v30, 2  ;;  %v7017_v63 = vrot.slane %v7009_v14, 2  ;;  %v8384_v45 = vld [vmem:[%s12597_s6 + $0x11] ss:$8 sm:$0x3] }
 0x6c8   : > { %v12443_v14 = vrot.slane %v8384_v45, %v12303_v58  ;;  %v12446_v23 = vrot.slane %v8384_v45, %v12309_v37 }
 0x6c9   : > { %v7048_v21 = vmul.f32 %v12415_v19, %v7031_v42  ;;  %v7024_v47 = vadd.f32 %v7016_v0, %v6985_v33  ;;  %v7025_v6 = vadd.f32 %v7017_v63, %v6986_v59  ;;  %v7087_v42 = vmul.f32 %v12431_v26, %v7070_v29  ;;  %v6924_v59 = vld [vmem:[#allocation11 + $0x20] sm:$0x11] }
 0x6cb   : > { %v7056_v17 = vrot.slane %v7048_v21, 3  ;;  %v7068_v21 = vld [vmem:[#allocation11 + $0x18] sm:$0x11] }
 0x6cd   : > { %v7064_v63 = vadd.f32 %v7056_v17, %v7025_v6 }
 0x6d2   : > { %v9670_v40 = vpop.eup %9669 }
 0x6d3   : > { %v6697_v54 = vmul.f32 %v9670_v40, %v12315_v43  ;;  %v6809_v43 = vunpack.c.l.bf16 %v6806_v8  ;;  %v6800_v40 = vmul.f32 %v12341_v35, %v6784_v3  ;;  %v6866_v8 = vmul.f32 %v12352_v12, %v6849_v1  ;;  %v8387_v3 = vld [vmem:[%s12597_s6 + $0x14] ss:$8 sm:$0x3] }
 0x6d4   : > { %v9672_v7 = vpop.eup %9671  ;;  %v7086_v35 = vmul.f32 %v12428_v20, %v7069_v10 }
 0x6d5   : > { %v6701_v18 = vmul.f32 0.2, %v6697_v54  ;;  %v6698_v31 = vmul.f32 %v9672_v7, %v12319_v25  ;;  %vm6699_vm10 = vcmp.gt.f32.partialorder %v6697_v54, 0.0  ;;  %v6848_v25 = vunpack.c.l.bf16 %v6845_v36 }
 0x6d6   : > { %v6826_v53 = vmul.f32 %v12332_v39, %v6809_v43  ;;  %v6887_v39 = vunpack.c.l.bf16 %v6884_v62  ;;  %v7055_v7 = vrot.slane %v7047_v16, 3  ;;  %v6905_v43 = vmul.f32 %v12363_v9, %v6888_v24  ;;  %v7212_v9 = vld [vmem:[#allocation11 + $0x18] sm:$0x11]  ;;  %v8388_v62 = vld [vmem:[%s12597_s6 + $0x15] ss:$8 sm:$0x3] }
 0x6d7   : > { %vm6700_vm14 = vcmp.gt.f32.partialorder %v6698_v31, 0.0  ;;  %v6702_v50 = vmul.f32 0.2, %v6698_v31  ;;  %v6703_v28 = vsel %vm6699_vm10, %v6697_v54, %v6701_v18  ;;  %v6865_v13 = vmul.f32 %v12349_v49, %v6848_v25  ;;  %v8385_v49 = vld [vmem:[%s12597_s6 + $0x12] ss:$8 sm:$0x3] }
 0x6d8   : > { %v6834_v15 = vrot.slane %v6826_v53, 1  ;;  %v6904_v38 = vmul.f32 %v12360_v60, %v6887_v39  ;;  %v6843_v36 = vadd.f32 %v6835_v2, %v6800_v40  ;;  %v6874_v33 = vrot.slane %v6866_v8, 2  ;;  %v8389_v2 = vld [vmem:[%s12597_s6 + $0x16] ss:$8 sm:$0x3] }
 0x6d9   : > { %v6704_v52 = vsel %vm6700_vm14, %v6698_v31, %v6702_v50  ;;  %v8386_v31 = vld [vmem:[%s12597_s6 + $0x13] ss:$8 sm:$0x3]  ;;  %v6873_v10 = vrot.slane %v6865_v13, 2  ;;  %v12460_v50 = vrot.slane %v8385_v49, %v12303_v58  ;;  %v7063_v0 = vadd.f32 %v7055_v7, %v7024_v47  ;;  %v7240_v47 = vld [vmem:[#allocation11 + $0x10] sm:$0x33] }
 0x6da   : > { %v6729_v51 = vcombine.low %v6703_v28, %v6704_v52  ;;  %v6842_v22 = vadd.f32 %v6834_v15, %v6799_v57  ;;  %v12466_v5 = vrot.slane %v8386_v31, %v12303_v58  ;;  %v12469_v60 = vrot.slane %v8386_v31, %v12309_v37  ;;  %v8390_v13 = vld [vmem:[%s12597_s6 + $0x17] ss:$8 sm:$0x3]  ;;  %v12494_v7 = vld [vmem:[#allocation11 + $0x10] sm:$0x11] }
 0x6db   : > { %v6927_v28 = vunpack.c.l.bf16 %v6924_v59  ;;  %v6928_v52 = vunpack.c.h.bf16 %v6924_v59  ;;  %v6882_v34 = vadd.f32 %v6874_v33, %v6843_v36  ;;  %v6913_v16 = vrot.slane %v6905_v43, 3 }
 0x6dc   : > { %v6736_v56 = vrot.slane %v6729_v51, %v12401_v55  ;;  %v6881_v53 = vadd.f32 %v6873_v10, %v6842_v22  ;;  %v6912_v51 = vrot.slane %v6904_v38, 3  ;;  %v7214_v45 = vunpack.c.l.bf16 %v7212_v9 }
 0x6dd   : > { %v7215_v39 = vunpack.c.h.bf16 %v7212_v9  ;;  %v12480_v57 = vadd.f32 %v7086_v35, %v7063_v0  ;;  %v12483_v40 = vrot.slane %v8387_v3, %v12309_v37  ;;  %v7251_v24 = vrot.slane %v8388_v62, %v12303_v58 }
 0x6de   : > { %v6737_v54 = vcombine.high %v6736_v56, %v6736_v56  ;;  %v6744_v30 = vrot.slane %v6736_v56, %v12401_v55  ;;  %v12478_v56 = vrot.slane %v8387_v3, %v12303_v58  ;;  %v7255_v15 = vrot.slane %v8388_v62, %v12309_v37 }
 0x6df   : > { %v6944_v8 = vmul.f32 %v12376_v27, %v6927_v28  ;;  %v7243_v17 = vunpack.c.l.bf16 %v7240_v47  ;;  %v6920_v35 = vadd.f32 %v6912_v51, %v6881_v53  ;;  %v7091_v31 = vadd.f32 %v7087_v42, %v7064_v63  ;;  %v12506_v27 = vld [vmem:[#allocation11 + $0x10] sm:$0x22] }
 0x6e0   : > { %v6745_v12 = vcombine.high %v6744_v30, %v6744_v30  ;;  %v6752_v18 = vrot.slane %v6737_v54, %v12401_v55  ;;  %v12463_v55 = vrot.slane %v8385_v49, %v12309_v37  ;;  %v7071_v54 = vunpack.c.l.bf16 %v7068_v21 }
 0x6e1   : > { %v6921_v49 = vadd.f32 %v6913_v16, %v6882_v34  ;;  %v12498_v38 = vmul.f32 %v12478_v56, %v7214_v45  ;;  %v12501_v43 = vrot.slane %v8389_v2, %v12303_v58  ;;  %v12504_v22 = vrot.slane %v8389_v2, %v12309_v37 }
 0x6e2   : > { %v6753_v29 = vcombine.high %v6752_v18, %v6752_v18  ;;  %v8407_v61 = vpack.c.bf16 %v6745_v12, %v6744_v30  ;;  %v7072_v30 = vunpack.c.h.bf16 %v7068_v21  ;;  %v6945_v12 = vmul.f32 %v12379_v32, %v6928_v52 }
 0x6e3   : > { %v12509_v36 = vmul.f32 %v12483_v40, %v7215_v39  ;;  %v12512_v10 = vrot.slane %v8390_v13, %v12303_v58  ;;  %v12515_v32 = vrot.slane %v8390_v13, %v12309_v37  ;;  %v7216_v42 = vunpack.c.l.bf16 %v12494_v7 }
 0x6e4   : > { %v8408_v25 = vpack.c.bf16 %v6753_v29, %v6752_v18  ;;  %v6772_v1 = vrot.slane %v8407_v61, 7  ;;  %v7244_v18 = vunpack.c.h.bf16 %v7240_v47  ;;  %v12519_v33 = vmul.f32 %v12428_v20, %v7071_v54 }
 0x6e5   : > { %v12522_v59 = vmul.f32 %v12431_v26, %v7072_v30  ;;  %v12525_v61 = vmul.f32 %v7251_v24, %v7243_v17  ;;  %v12527_v58 = vadd.f32 %v6944_v8, %v6920_v35  ;;  %v12529_v3 = vadd.f32 %v6945_v12, %v6921_v49 }
 0x6e6   : > { %v6773_v6 = vrot.slane %v8408_v25, 7  ;;  %6777 = vst [vmem:[#allocation11 + $0x20] sm:$0x22] %v6772_v1  ;;  %v12531_v37 = vmul.f32 %v7255_v15, %v7244_v18 }
 0x6e8   : > { %6778 = vst [vmem:[#allocation11 + $0x18] sm:$0x22] %v6773_v6 }
 0x6ed   : > { %v7094_v0 = vld [vmem:[#allocation11 + $0x20] sm:$0x33] }
 0x6ee   : > { %v7133_v63 = vld [vmem:[#allocation11 + $0x20] sm:$0x22]  ;;  %v7096_v20 = vunpack.c.l.bf16 %v7094_v0  ;;  %v7097_v1 = vunpack.c.h.bf16 %v7094_v0 }
 0x6ef   : > { %v7172_v9 = vld [vmem:[#allocation11 + $0x20] sm:$0x66]  ;;  %v7135_v62 = vunpack.c.l.bf16 %v7133_v63  ;;  %v7136_v26 = vunpack.c.h.bf16 %v7133_v63  ;;  %v7239_v34 = vld [vmem:[#allocation11 + $0x18] sm:$0x33] }
 0x6f0   : > { %v6951_v28 = vld [vmem:[#allocation11 + $0x20] sm:$0x33]  ;;  %v7174_v52 = vunpack.c.l.bf16 %v7172_v9  ;;  %v7175_v53 = vunpack.c.h.bf16 %v7172_v9  ;;  %v7113_v21 = vmul.f32 %v12443_v14, %v7096_v20  ;;  %v7114_v47 = vmul.f32 %v12446_v23, %v7097_v1  ;;  %v7278_v54 = vld [vmem:[#allocation11 + $0x18] sm:$0x22] }
 0x6f1   : > { %v6954_v51 = vunpack.c.l.bf16 %v6951_v28  ;;  %v6955_v16 = vunpack.c.h.bf16 %v6951_v28  ;;  %v7152_v6 = vmul.f32 %v12460_v50, %v7135_v62  ;;  %v7153_v45 = vmul.f32 %v12463_v55, %v7136_v26  ;;  %v7317_v12 = vld [vmem:[#allocation11 + $0x18] sm:$0x66] }
 0x6f2   : > { %v7191_v39 = vmul.f32 %v12466_v5, %v7174_v52  ;;  %v7192_v2 = vmul.f32 %v12469_v60, %v7175_v53  ;;  %v7241_v13 = vunpack.c.l.bf16 %v7239_v34  ;;  %v7242_v8 = vunpack.c.h.bf16 %v7239_v34 }
 0x6f3   : > { %v7121_v30 = vrot.slane %v7113_v21, 1  ;;  %v7122_v17 = vrot.slane %v7114_v47, 1  ;;  %v7160_v35 = vrot.slane %v7152_v6, 2  ;;  %v7161_v49 = vrot.slane %v7153_v45, 2 }
 0x6f4   : > { %v7199_v18 = vrot.slane %v7191_v39, 3  ;;  %v7200_v0 = vrot.slane %v7192_v2, 3  ;;  %v7258_v63 = vmul.f32 %v7251_v24, %v7241_v13  ;;  %v7259_v9 = vmul.f32 %v7255_v15, %v7242_v8  ;;  %v7029_v8 = vld [vmem:[#allocation11 + $0x20] sm:$0x66] }
 0x6f5   : > { %v7129_v20 = vadd.f32 %v7121_v30, %v12480_v57  ;;  %v7130_v1 = vadd.f32 %v7122_v17, %v7091_v31  ;;  %v7280_v62 = vunpack.c.l.bf16 %v7278_v54  ;;  %v7281_v26 = vunpack.c.h.bf16 %v7278_v54  ;;  %v6990_v31 = vld [vmem:[#allocation11 + $0x20] sm:$0x22] }
 0x6f6   : > { %v7266_v28 = vrot.slane %v7258_v63, 1  ;;  %v7267_v52 = vrot.slane %v7259_v9, 1  ;;  %v7319_v53 = vunpack.c.l.bf16 %v7317_v12  ;;  %v7320_v25 = vunpack.c.h.bf16 %v7317_v12  ;;  %v7095_v9 = vld [vmem:[#allocation11 + $0x18] sm:$0x33] }
 0x6f7   : > { %v7168_v34 = vadd.f32 %v7160_v35, %v7129_v20  ;;  %v7169_v29 = vadd.f32 %v7161_v49, %v7130_v1  ;;  %v7297_v21 = vmul.f32 %v12501_v43, %v7280_v62  ;;  %v7298_v47 = vmul.f32 %v12504_v22, %v7281_v26 }
 0x6f8   : > { %v7336_v6 = vmul.f32 %v12512_v10, %v7319_v53  ;;  %v7337_v24 = vmul.f32 %v12515_v32, %v7320_v25  ;;  %v6971_v57 = vmul.f32 %v12382_v44, %v6954_v51  ;;  %v6972_v15 = vmul.f32 %v12385_v46, %v6955_v16 }
 0x6f9   : > { %v7207_v45 = vadd.f32 %v7199_v18, %v7168_v34  ;;  %v7208_v39 = vadd.f32 %v7200_v0, %v7169_v29  ;;  %v7305_v2 = vrot.slane %v7297_v21, 2  ;;  %v7306_v13 = vrot.slane %v7298_v47, 2  ;;  %v7134_v21 = vld [vmem:[#allocation11 + $0x18] sm:$0x22] }
 0x6fa   : > { %v7344_v54 = vrot.slane %v7336_v6, 3  ;;  %v7345_v30 = vrot.slane %v7337_v24, 3  ;;  %v6979_v17 = vrot.slane %v6971_v57, 1  ;;  %v6980_v35 = vrot.slane %v6972_v15, 1 }
 0x6fb   : > { %v7235_v49 = vadd.f32 %v12498_v38, %v7207_v45  ;;  %v7236_v12 = vadd.f32 %v12509_v36, %v7208_v39  ;;  %v6993_v25 = vunpack.c.l.bf16 %v6990_v31  ;;  %v6994_v63 = vunpack.c.h.bf16 %v6990_v31 }
 0x6fc   : > { %v6987_v44 = vadd.f32 %v6979_v17, %v12527_v58  ;;  %v6988_v46 = vadd.f32 %v6980_v35, %v12529_v3  ;;  %v7032_v51 = vunpack.c.l.bf16 %v7029_v8  ;;  %v7033_v29 = vunpack.c.h.bf16 %v7029_v8  ;;  %v7318_v8 = vld [vmem:[#allocation11 + $0x10] sm:$0x66] }
 0x6fd   : > { %v7274_v16 = vadd.f32 %v7266_v28, %v7235_v49  ;;  %v7275_v18 = vadd.f32 %v7267_v52, %v7236_v12  ;;  %v7010_v0 = vmul.f32 %v12395_v48, %v6993_v25  ;;  %v7011_v20 = vmul.f32 %v12398_v41, %v6994_v63 }
 0x6fe   : > { %v7049_v1 = vmul.f32 %v12412_v4, %v7032_v51  ;;  %v7050_v38 = vmul.f32 %v12415_v19, %v7033_v29  ;;  %v7098_v36 = vunpack.c.l.bf16 %v7095_v9  ;;  %v7099_v62 = vunpack.c.h.bf16 %v7095_v9  ;;  %v7173_v4 = vld [vmem:[#allocation11 + $0x18] sm:$0x66] }
 0x6ff   : > { %v7313_v26 = vadd.f32 %v7305_v2, %v7274_v16  ;;  %v7314_v53 = vadd.f32 %v7306_v13, %v7275_v18  ;;  %v7018_v34 = vrot.slane %v7010_v0, 2  ;;  %v7019_v58 = vrot.slane %v7011_v20, 2 }
 0x700   : > { %v7057_v3 = vrot.slane %v7049_v1, 3  ;;  %v7058_v47 = vrot.slane %v7050_v38, 3  ;;  %v7115_v28 = vmul.f32 %v12443_v14, %v7098_v36  ;;  %v7116_v52 = vmul.f32 %v12446_v23, %v7099_v62 }
 0x701   : > { %v7352_v48 = vadd.f32 %v7344_v54, %v7313_v26  ;;  %v7353_v6 = vadd.f32 %v7345_v30, %v7314_v53  ;;  %v7026_v41 = vadd.f32 %v7018_v34, %v6987_v44  ;;  %v7027_v24 = vadd.f32 %v7019_v58, %v6988_v46 }
 0x702   : > { %v7123_v57 = vrot.slane %v7115_v28, 1  ;;  %v7137_v19 = vunpack.c.l.bf16 %v7134_v21  ;;  %v7138_v15 = vunpack.c.h.bf16 %v7134_v21  ;;  %v7283_v31 = vunpack.c.h.bf16 %v12506_v27 }
 0x703   : > { %v7357_v45 = vsel %vm7356_vm5, %v7352_v48, 0.0  ;;  %v7358_v39 = vsel %vm7356_vm5, %v7353_v6, 0.0  ;;  %v7065_v2 = vadd.f32 %v7057_v3, %v7026_v41  ;;  %v7066_v13 = vadd.f32 %v7058_v47, %v7027_v24 }
 0x704   : > { %v7359_v14 = vadd.f32 %v7358_v39, %v7357_v45  ;;  %v7154_v23 = vmul.f32 %v12460_v50, %v7137_v19  ;;  %v7155_v54 = vmul.f32 %v12463_v55, %v7138_v15  ;;  %v7176_v30 = vunpack.c.l.bf16 %v7173_v4 }
 0x705   : > { %v7092_v17 = vadd.f32 %v12519_v33, %v7065_v2  ;;  %v7093_v35 = vadd.f32 %v12522_v59, %v7066_v13  ;;  %v7124_v49 = vrot.slane %v7116_v52, 1  ;;  %v7177_v12 = vunpack.c.h.bf16 %v7173_v4 }
 0x706   : > { %7360 = vadd.xlane.f32.xlu1 %v7359_v14  ;;  %v7162_v25 = vrot.slane %v7154_v23, 2  ;;  %v7193_v63 = vmul.f32 %v12466_v5, %v7176_v30  ;;  %v7321_v9 = vunpack.c.l.bf16 %v7318_v8  ;;  %v7322_v44 = vunpack.c.h.bf16 %v7318_v8 }
 0x707   : > { %v7131_v46 = vadd.f32 %v7123_v57, %v7092_v17  ;;  %v7132_v51 = vadd.f32 %v7124_v49, %v7093_v35  ;;  %v7163_v29 = vrot.slane %v7155_v54, 2  ;;  %v7194_v50 = vmul.f32 %v12469_v60, %v7177_v12 }
 0x708   : > { %v7233_v55 = vmul.f32 %v12478_v56, %v7216_v42  ;;  %v12920_v33 = vunpack.c.h.bf16 %v12494_v7  ;;  %v12921_v16 = vunpack.c.l.bf16 %v12506_v27  ;;  %v7300_v5 = vmul.f32 %v12504_v22, %v7283_v31 }
 0x709   : > { %v7170_v0 = vadd.f32 %v7162_v25, %v7131_v46  ;;  %v7171_v20 = vadd.f32 %v7163_v29, %v7132_v51  ;;  %v7201_v1 = vrot.slane %v7193_v63, 3  ;;  %v7202_v38 = vrot.slane %v7194_v50, 3 }
 0x70a   : > { %v7234_v59 = vmul.f32 %v12483_v40, %v12920_v33  ;;  %v7299_v18 = vmul.f32 %v12501_v43, %v12921_v16  ;;  %v7268_v60 = vrot.slane %v12525_v61, 1  ;;  %v7269_v36 = vrot.slane %v12531_v37, 1 }
 0x70b   : > { %v7209_v62 = vadd.f32 %v7201_v1, %v7170_v0  ;;  %v7210_v56 = vadd.f32 %v7202_v38, %v7171_v20  ;;  %v7338_v7 = vmul.f32 %v12512_v10, %v7321_v9  ;;  %v7339_v40 = vmul.f32 %v12515_v32, %v7322_v44 }
 0x70c   : > { %v7307_v26 = vrot.slane %v7299_v18, 2  ;;  %v7308_v43 = vrot.slane %v7300_v5, 2  ;;  %v12922_v32 = vlaneseq }
 0x70d   : > { %v7237_v42 = vadd.f32 %v7233_v55, %v7209_v62  ;;  %v7238_v27 = vadd.f32 %v7234_v59, %v7210_v56  ;;  %v7346_v34 = vrot.slane %v7338_v7, 3  ;;  %v7347_v58 = vrot.slane %v7339_v40, 3 }
 0x70e   : > { %v7370_v52 = vand.u32 127, %v12922_v32 }
 0x70f   : > { %v7276_v22 = vadd.f32 %v7268_v60, %v7237_v42  ;;  %v7277_v53 = vadd.f32 %v7269_v36, %v7238_v27 }
 0x710   : > { %v7373_v48 = vsub.s32 %v7370_v52, %v10064_v11 }
 0x711   : > { %v7315_v21 = vadd.f32 %v7307_v26, %v7276_v22  ;;  %v7316_v3 = vadd.f32 %v7308_v43, %v7277_v53 }
 0x713   : > { %v7354_v61 = vadd.f32 %v7346_v34, %v7315_v21  ;;  %v7355_v47 = vadd.f32 %v7347_v58, %v7316_v3 }
 0x715   : > { %v7362_v37 = vsel %vm7356_vm5, %v7354_v61, 0.0  ;;  %v7363_v28 = vsel %vm7356_vm5, %v7355_v47, 0.0 }
 0x716   : > { %v7364_v10 = vadd.f32 %v7363_v28, %v7362_v37 }
 0x718   : > { %7365 = vadd.xlane.f32.xlu0 %v7364_v10 }
 0x78f   : > { %v7361_v6 = vpop.xlane.xlu1 %7360 }
 0x790   : > { %v7374_v24 = vrot.slane %v7361_v6, %v7373_v48 }
 0x7a1   : > { %v7366_v41 = vpop.xlane.xlu0 %7365 }
 0x7a2   : > { %v7378_v4 = vrot.slane %v7366_v41, %v7373_v48 }
 0x7a4   : > { %v7380_v57 = vsel %vm7379_vm1, %v7378_v4, %v7374_v24 }
 0x7a5   : > { %7383 = vst.msk [vmem:[%s404_s22] sm:$0x3] %vm7382_vm4, %v7380_v57 }
 0x7a6 PF: > { %s21_s17 = sadd.s32 1, %s9679_s17  }
 0x7a7   : > { %p18_p4 = scmp.ge.s32.totalorder %s21_s17, 4  }
 0x7a9   :  { %20 = sbr.rel (!%p18_p4) target bundleno = 1 (0x1), region = 166 }

</bundles_post_ra>
